<compile_context>
chip_gen: v5e
topology: v5e:2x2
jax: 0.10.0
libtpu: 0.0.40
codegen_flags: <defaults>
</compile_context>

<pallas_src>
import jax
import jax.numpy as jnp
from jax.experimental import pallas as pl
from jax.experimental.pallas import tpu as pltpu

# ----------------------------- hyper-parameters ------------------------------
INPUT_SIZE = 16
HIDDEN_SIZE = 24
OUTPUT_SIZE = 4

HID_THRESHOLD = 1.0
OUTPUT_THRESHOLD = 10000.0       # only affects spk4, which is never returned
BETA_HIDDEN_1 = 0.9              # Synaptic alpha (syn decay) of layer 1
BETA_HIDDEN_2 = 0.8
BETA_HIDDEN_3 = 0.7
BETA_OUTPUT = 0.95               # Leaky beta of the output layer
CUBA_BETA = 0.5                  # Synaptic beta (mem decay) of all hidden layers
# hidden_reset_mechanism = 'subtract', output_reset_mechanism = 'none'


def snnqut_kernel(x_ref, w1t_ref, wcat_ref, mem4_out_ref, spk3_out_ref, cur1_ref):
    """One batch-tile. x_ref: (T, Bt, I); w1t_ref: (I, H); wcat_ref: (H, 2H+O).
    Outputs: mem4 (T, Bt, O), spk3 (T, Bt, H). cur1_ref: VMEM scratch (T, Bt, H)."""
    T, Bt, I = x_ref.shape
    H = w1t_ref.shape[1]
    O = mem4_out_ref.shape[2]
    f32 = jnp.float32

    # ---- layer 1 has no recurrent dependence: one MXU pass for all timesteps ----
    x_flat = x_ref[...].reshape(T * Bt, I)                     # leading-dim collapse, layout-preserving
    cur1_ref[...] = jnp.dot(x_flat, w1t_ref[...],
                            preferred_element_type=f32).reshape(T, Bt, H)

    # Loop-invariant fused recurrent weight [w2^T | w3^T | w4^T]  -> (H, 2H+O)
    w_cat = wcat_ref[...]

    zero_bh = jnp.zeros((Bt, H), f32)
    syn1 = mem1 = syn2 = mem2 = syn3 = mem3 = zero_bh
    spk1 = spk2 = spk3 = zero_bh
    cur2 = cur3 = zero_bh
    mem4 = jnp.zeros((Bt, O), f32)

    def synaptic(cur, syn, mem, alpha, beta, thr):
        # spike detection on the OLD membrane (snnTorch mem_reset), 'subtract' reset
        reset = (mem > thr).astype(f32)
        syn_new = alpha * syn + cur
        mem_new = beta * mem + syn_new - reset * thr
        spk = (mem_new > thr).astype(f32)
        return spk, syn_new, mem_new

    # Statically unrolled wavefront over diagonals d = 0 .. T+1.
    # At diagonal d: layer1 handles timestep d, layer2 timestep d-1, layer3
    # timestep d-2 (VPU only), then ONE fused MXU pass produces
    #   cur2(d) = spk1(d) @ w2^T, cur3(d-1) = spk2(d-1) @ w3^T, cur4(d-2) = spk3(d-2) @ w4^T.
    # Boundary conditions are static Python ifs; unused matmul slices are DCE'd.
    for d in range(T + 2):
        # ---- VPU wavefront stage --------------------------------------------
        if d < T:
            spk1, syn1, mem1 = synaptic(cur1_ref[d], syn1, mem1,
                                        BETA_HIDDEN_1, CUBA_BETA, HID_THRESHOLD)
        if 0 <= d - 1 < T:
            spk2, syn2, mem2 = synaptic(cur2, syn2, mem2,
                                        BETA_HIDDEN_2, CUBA_BETA, HID_THRESHOLD)
        if 0 <= d - 2 < T:
            spk3, syn3, mem3 = synaptic(cur3, syn3, mem3,
                                        BETA_HIDDEN_3, CUBA_BETA, HID_THRESHOLD)
            spk3_out_ref[d - 2] = spk3

        # ---- fused MXU stage: one pass replaces the three per-step matmuls ----
        # (3*Bt rows x H contraction x 2H+O lanes: still a single MXU pass;
        #  cross-block products are discarded for free.)
        lhs = jnp.concatenate([spk1, spk2, spk3], axis=0)           # (3*Bt, H)
        fused = jnp.dot(lhs, w_cat, preferred_element_type=f32)     # (3*Bt, 2H+O)
        cur2 = fused[0:Bt, 0:H]                                     # cur2 at time d
        cur3 = fused[Bt:2 * Bt, H:2 * H]                            # cur3 at time d-1
        cur4 = fused[2 * Bt:3 * Bt, 2 * H:2 * H + O]                # cur4 at time d-2

        # ---- output layer: Leaky, reset='none' --------------------------------
        if 0 <= d - 2 < T:
            mem4 = BETA_OUTPUT * mem4 + cur4
            mem4_out_ref[d - 2] = mem4
        # spk4 = heaviside(mem4 - OUTPUT_THRESHOLD) is never returned -> omitted.


def _batch_tile(B):
    """Batch rows folded into one kernel invocation. 3*Bt <= 128 keeps the fused
    recurrent matmul a single MXU pass; multiple tiles split across the grid
    (megacore-parallel on v7x)."""
    if 3 * B <= 128:
        return B
    for bt in (40, 32, 24, 16, 8):
        if B % bt == 0:
            return bt
    return B


@jax.jit
def snnqut_forward(x_btI, w1, w2, w3, w4):
    """x_btI: (B, T, input_size) like the PyTorch forward.
    Weights are (out, in) as in nn.Linear (bias=False).
    Returns (mem4_rec, spk3_rec) stacked over time: (T, B, out) / (T, B, hidden)."""
    x = x_btI.astype(jnp.float32)
    B, T, I = x.shape
    H = w1.shape[0]
    O = w4.shape[0]

    # (T, B, I): per-timestep slices become contiguous tiles inside the kernel.
    # This transpose is a few KB and sits off the kernel's critical path.
    x_tbi = jnp.transpose(x, (1, 0, 2))

    # Pre-transpose weights to (in, out): plain a @ w contractions in-kernel.
    w1t = w1.astype(jnp.float32).T                                   # (I, H)
    w_cat = jnp.concatenate([w2.astype(jnp.float32).T,               # (H, H)
                             w3.astype(jnp.float32).T,               # (H, H)
                             w4.astype(jnp.float32).T], axis=1)      # (H, 2H+O)

    Bt = _batch_tile(B)
    grid = (B // Bt,)

    grid_spec = pltpu.PrefetchScalarGridSpec(
        num_scalar_prefetch=0,
        grid=grid,  # batch tiles are independent -> parallel (megacore on v7x)
        in_specs=[
            pl.BlockSpec((T, Bt, I), lambda b: (0, b, 0)),
            pl.BlockSpec((I, H), lambda b: (0, 0)),
            pl.BlockSpec((H, 2 * H + O), lambda b: (0, 0)),
        ],
        out_specs=[
            pl.BlockSpec((T, Bt, O), lambda b: (0, b, 0)),
            pl.BlockSpec((T, Bt, H), lambda b: (0, b, 0)),
        ],
        scratch_shapes=[pltpu.VMEM((T, Bt, H), jnp.float32)],  # hoisted layer-1 currents
    )

    mem4_rec, spk3_rec = pl.pallas_call(
        snnqut_kernel,
        out_shape=(
            jax.ShapeDtypeStruct((T, B, O), jnp.float32),
            jax.ShapeDtypeStruct((T, B, H), jnp.float32),
        ),
        grid_spec=grid_spec,
        compiler_params=pltpu.CompilerParams(
            dimension_semantics=("parallel",)),
    )(x_tbi, w1t, w_cat)

    # Matches torch.stack(..., dim=0): (time, batch, features)
    return mem4_rec, spk3_rec


# ------------------------- pure-JAX reference check ---------------------------
def snnqut_reference(x_btI, w1, w2, w3, w4):
    x = x_btI.astype(jnp.float32)
    B, T, _ = x.shape
    H, O = w1.shape[0], w4.shape[0]
    syn1 = mem1 = syn2 = mem2 = syn3 = mem3 = jnp.zeros((B, H), jnp.float32)
    mem4 = jnp.zeros((B, O), jnp.float32)
    mem4_rec, spk3_rec = [], []
    for t in range(T):
        cur1 = x[:, t, :] @ w1.T
        r1 = (mem1 > HID_THRESHOLD).astype(jnp.float32)
        syn1 = BETA_HIDDEN_1 * syn1 + cur1
        mem1 = CUBA_BETA * mem1 + syn1 - r1 * HID_THRESHOLD
        spk1 = (mem1 > HID_THRESHOLD).astype(jnp.float32)
        cur2 = spk1 @ w2.T
        r2 = (mem2 > HID_THRESHOLD).astype(jnp.float32)
        syn2 = BETA_HIDDEN_2 * syn2 + cur2
        mem2 = CUBA_BETA * mem2 + syn2 - r2 * HID_THRESHOLD
        spk2 = (mem2 > HID_THRESHOLD).astype(jnp.float32)
        cur3 = spk2 @ w3.T
        r3 = (mem3 > HID_THRESHOLD).astype(jnp.float32)
        syn3 = BETA_HIDDEN_3 * syn3 + cur3
        mem3 = CUBA_BETA * mem3 + syn3 - r3 * HID_THRESHOLD
        spk3 = (mem3 > HID_THRESHOLD).astype(jnp.float32)
        cur4 = spk3 @ w4.T
        mem4 = BETA_OUTPUT * mem4 + cur4
        mem4_rec.append(mem4)
        spk3_rec.append(spk3)
    return jnp.stack(mem4_rec, 0), jnp.stack(spk3_rec, 0)


if __name__ == "__main__":
    key = jax.random.PRNGKey(0)
    k_x, k1, k2, k3, k4 = jax.random.split(key, 5)

    B, T = 32, 8  # module's batch_size=32; time_steps=8
    x = jax.random.normal(k_x, (B, T, INPUT_SIZE), dtype=jnp.float32)

    # nn.init.uniform_(w, a=-0.1, b=0.1); nn.Linear weight shape is (out, in)
    w1 = jax.random.uniform(k1, (HIDDEN_SIZE, INPUT_SIZE), minval=-0.1, maxval=0.1)
    w2 = jax.random.uniform(k2, (HIDDEN_SIZE, HIDDEN_SIZE), minval=-0.1, maxval=0.1)
    w3 = jax.random.uniform(k3, (HIDDEN_SIZE, HIDDEN_SIZE), minval=-0.1, maxval=0.1)
    w4 = jax.random.uniform(k4, (OUTPUT_SIZE, HIDDEN_SIZE), minval=-0.1, maxval=0.1)

    mem4_rec, spk3_rec = snnqut_forward(x, w1, w2, w3, w4)
    jax.block_until_ready((mem4_rec, spk3_rec))

    ref_mem4, ref_spk3 = snnqut_reference(x, w1, w2, w3, w4)
    assert mem4_rec.shape == (T, B, OUTPUT_SIZE)
    assert spk3_rec.shape == (T, B, HIDDEN_SIZE)
    assert jnp.allclose(mem4_rec, ref_mem4, atol=1e-5, rtol=1e-5)
    assert jnp.allclose(spk3_rec, ref_spk3, atol=1e-5, rtol=1e-5)

    print("KERNEL_OK")
</pallas_src>

<mosaic_0001>
module attributes {stable_mosaic.version = 11 : i64} {
  func.func @snnqut_kernel(%arg0: i32, %arg1: memref<8x32x16xf32, #tpu.memory_space<vmem>>, %arg2: memref<16x24xf32, #tpu.memory_space<vmem>>, %arg3: memref<24x52xf32, #tpu.memory_space<vmem>>, %arg4: memref<8x32x4xf32, #tpu.memory_space<vmem>>, %arg5: memref<8x32x24xf32, #tpu.memory_space<vmem>>, %arg6: memref<8x32x24xf32, #tpu.memory_space<vmem>>) attributes {dimension_semantics = [#tpu.dimension_semantics<parallel>], iteration_bounds = array<i64: 1>, scalar_prefetch = 0 : i64, scratch_operands = 1 : i64, tpu.core_type = #tpu.core_type<tc>, window_params = [{transform_indices = @transform_0, window_bounds = array<i64: 8, 32, 16>}, {pipeline_mode = #tpu.pipeline_mode<synchronous>, transform_indices = @transform_1, window_bounds = array<i64: 16, 24>}, {pipeline_mode = #tpu.pipeline_mode<synchronous>, transform_indices = @transform_2, window_bounds = array<i64: 24, 52>}, {transform_indices = @transform_3, window_bounds = array<i64: 8, 32, 4>}, {transform_indices = @transform_4, window_bounds = array<i64: 8, 32, 24>}]} {
    %c0 = arith.constant 0 : index
    %c0_0 = arith.constant 0 : index
    %c0_1 = arith.constant 0 : index
    %0 = vector.load %arg1[%c0, %c0_0, %c0_1] : memref<8x32x16xf32, #tpu.memory_space<vmem>>, vector<8x32x16xf32>
    %1 = vector.shape_cast %0 : vector<8x32x16xf32> to vector<256x16xf32>
    %c0_2 = arith.constant 0 : index
    %c0_3 = arith.constant 0 : index
    %2 = vector.load %arg2[%c0_2, %c0_3] : memref<16x24xf32, #tpu.memory_space<vmem>>, vector<16x24xf32>
    %cst = arith.constant dense<0.000000e+00> : vector<256x24xf32>
    %3 = tpu.matmul %1, %2, %cst {dimension_numbers = #tpu.dot_dimension_numbers<[1], [0], [0], [1], [0, 0, 1, 1], [], []>} : vector<256x16xf32>, vector<16x24xf32>, vector<256x24xf32> -> vector<256x24xf32>
    %4 = vector.shape_cast %3 : vector<256x24xf32> to vector<8x32x24xf32>
    %c0_4 = arith.constant 0 : index
    %c0_5 = arith.constant 0 : index
    %c0_6 = arith.constant 0 : index
    %5 = vector.load %arg6[%c0_4, %c0_5, %c0_6] : memref<8x32x24xf32, #tpu.memory_space<vmem>>, vector<8x32x24xf32>
    tpu.vector_store %arg6[%c0_4, %c0_5, %c0_6], %4 {strides = array<i32>} : memref<8x32x24xf32, #tpu.memory_space<vmem>>, vector<8x32x24xf32>,
    %c0_7 = arith.constant 0 : index
    %c0_8 = arith.constant 0 : index
    %6 = vector.load %arg3[%c0_7, %c0_8] : memref<24x52xf32, #tpu.memory_space<vmem>>, vector<24x52xf32>
    %cst_9 = arith.constant 0.000000e+00 : f32
    %7 = vector.broadcast %cst_9 : f32 to vector<32x24xf32>
    %cst_10 = arith.constant 0.000000e+00 : f32
    %8 = vector.broadcast %cst_10 : f32 to vector<32x4xf32>
    %c0_11 = arith.constant 0 : index
    %c0_12 = arith.constant 0 : index
    %c0_13 = arith.constant 0 : index
    %9 = vector.load %arg6[%c0_11, %c0_12, %c0_13] : memref<8x32x24xf32, #tpu.memory_space<vmem>>, vector<1x32x24xf32>
    %10 = vector.shape_cast %9 : vector<1x32x24xf32> to vector<32x24xf32>
    %cst_14 = arith.constant 1.000000e+00 : f32
    %11 = vector.broadcast %cst_14 : f32 to vector<32x24xf32>
    %12 = arith.cmpf ogt, %7, %11 : vector<32x24xf32>
    %13 = arith.extui %12 : vector<32x24xi1> to vector<32x24xi32>
    %14 = arith.sitofp %13 : vector<32x24xi32> to vector<32x24xf32>
    %cst_15 = arith.constant 0.899999976 : f32
    %15 = vector.broadcast %cst_15 : f32 to vector<32x24xf32>
    %16 = arith.mulf %15, %7 : vector<32x24xf32>
    %17 = arith.addf %16, %10 : vector<32x24xf32>
    %cst_16 = arith.constant 5.000000e-01 : f32
    %18 = vector.broadcast %cst_16 : f32 to vector<32x24xf32>
    %19 = arith.mulf %18, %7 : vector<32x24xf32>
    %20 = arith.addf %19, %17 : vector<32x24xf32>
    %cst_17 = arith.constant 1.000000e+00 : f32
    %21 = vector.broadcast %cst_17 : f32 to vector<32x24xf32>
    %22 = arith.mulf %14, %21 : vector<32x24xf32>
    %23 = arith.subf %20, %22 : vector<32x24xf32>
    %cst_18 = arith.constant 1.000000e+00 : f32
    %24 = vector.broadcast %cst_18 : f32 to vector<32x24xf32>
    %25 = arith.cmpf ogt, %23, %24 : vector<32x24xf32>
    %26 = arith.extui %25 : vector<32x24xi1> to vector<32x24xi32>
    %27 = arith.sitofp %26 : vector<32x24xi32> to vector<32x24xf32>
    %28 = tpu.concatenate %27, %7, %7 in 0 : vector<32x24xf32>, vector<32x24xf32>, vector<32x24xf32> -> vector<96x24xf32>
    %cst_19 = arith.constant dense<0.000000e+00> : vector<96x52xf32>
    %29 = tpu.matmul %28, %6, %cst_19 {dimension_numbers = #tpu.dot_dimension_numbers<[1], [0], [0], [1], [0, 0, 1, 1], [], []>} : vector<96x24xf32>, vector<24x52xf32>, vector<96x52xf32> -> vector<96x52xf32>
    %30 = vector.extract_strided_slice %29 {offsets = [0, 0], sizes = [32, 24], strides = [1, 1]} : vector<96x52xf32> to vector<32x24xf32>
    %c1 = arith.constant 1 : index
    %c0_20 = arith.constant 0 : index
    %c0_21 = arith.constant 0 : index
    %31 = vector.load %arg6[%c1, %c0_20, %c0_21] : memref<8x32x24xf32, #tpu.memory_space<vmem>>, vector<1x32x24xf32>
    %32 = vector.shape_cast %31 : vector<1x32x24xf32> to vector<32x24xf32>
    %cst_22 = arith.constant 1.000000e+00 : f32
    %33 = vector.broadcast %cst_22 : f32 to vector<32x24xf32>
    %34 = arith.cmpf ogt, %23, %33 : vector<32x24xf32>
    %35 = arith.extui %34 : vector<32x24xi1> to vector<32x24xi32>
    %36 = arith.sitofp %35 : vector<32x24xi32> to vector<32x24xf32>
    %cst_23 = arith.constant 0.899999976 : f32
    %37 = vector.broadcast %cst_23 : f32 to vector<32x24xf32>
    %38 = arith.mulf %37, %17 : vector<32x24xf32>
    %39 = arith.addf %38, %32 : vector<32x24xf32>
    %cst_24 = arith.constant 5.000000e-01 : f32
    %40 = vector.broadcast %cst_24 : f32 to vector<32x24xf32>
    %41 = arith.mulf %40, %23 : vector<32x24xf32>
    %42 = arith.addf %41, %39 : vector<32x24xf32>
    %cst_25 = arith.constant 1.000000e+00 : f32
    %43 = vector.broadcast %cst_25 : f32 to vector<32x24xf32>
    %44 = arith.mulf %36, %43 : vector<32x24xf32>
    %45 = arith.subf %42, %44 : vector<32x24xf32>
    %cst_26 = arith.constant 1.000000e+00 : f32
    %46 = vector.broadcast %cst_26 : f32 to vector<32x24xf32>
    %47 = arith.cmpf ogt, %45, %46 : vector<32x24xf32>
    %48 = arith.extui %47 : vector<32x24xi1> to vector<32x24xi32>
    %49 = arith.sitofp %48 : vector<32x24xi32> to vector<32x24xf32>
    %cst_27 = arith.constant 1.000000e+00 : f32
    %50 = vector.broadcast %cst_27 : f32 to vector<32x24xf32>
    %51 = arith.cmpf ogt, %7, %50 : vector<32x24xf32>
    %52 = arith.extui %51 : vector<32x24xi1> to vector<32x24xi32>
    %53 = arith.sitofp %52 : vector<32x24xi32> to vector<32x24xf32>
    %cst_28 = arith.constant 8.000000e-01 : f32
    %54 = vector.broadcast %cst_28 : f32 to vector<32x24xf32>
    %55 = arith.mulf %54, %7 : vector<32x24xf32>
    %56 = arith.addf %55, %30 : vector<32x24xf32>
    %cst_29 = arith.constant 5.000000e-01 : f32
    %57 = vector.broadcast %cst_29 : f32 to vector<32x24xf32>
    %58 = arith.mulf %57, %7 : vector<32x24xf32>
    %59 = arith.addf %58, %56 : vector<32x24xf32>
    %cst_30 = arith.constant 1.000000e+00 : f32
    %60 = vector.broadcast %cst_30 : f32 to vector<32x24xf32>
    %61 = arith.mulf %53, %60 : vector<32x24xf32>
    %62 = arith.subf %59, %61 : vector<32x24xf32>
    %cst_31 = arith.constant 1.000000e+00 : f32
    %63 = vector.broadcast %cst_31 : f32 to vector<32x24xf32>
    %64 = arith.cmpf ogt, %62, %63 : vector<32x24xf32>
    %65 = arith.extui %64 : vector<32x24xi1> to vector<32x24xi32>
    %66 = arith.sitofp %65 : vector<32x24xi32> to vector<32x24xf32>
    %67 = tpu.concatenate %49, %66, %7 in 0 : vector<32x24xf32>, vector<32x24xf32>, vector<32x24xf32> -> vector<96x24xf32>
    %cst_32 = arith.constant dense<0.000000e+00> : vector<96x52xf32>
    %68 = tpu.matmul %67, %6, %cst_32 {dimension_numbers = #tpu.dot_dimension_numbers<[1], [0], [0], [1], [0, 0, 1, 1], [], []>} : vector<96x24xf32>, vector<24x52xf32>, vector<96x52xf32> -> vector<96x52xf32>
    %69 = vector.extract_strided_slice %68 {offsets = [0, 0], sizes = [32, 24], strides = [1, 1]} : vector<96x52xf32> to vector<32x24xf32>
    %70 = vector.extract_strided_slice %68 {offsets = [32, 24], sizes = [32, 24], strides = [1, 1]} : vector<96x52xf32> to vector<32x24xf32>
    %c2 = arith.constant 2 : index
    %c0_33 = arith.constant 0 : index
    %c0_34 = arith.constant 0 : index
    %71 = vector.load %arg6[%c2, %c0_33, %c0_34] : memref<8x32x24xf32, #tpu.memory_space<vmem>>, vector<1x32x24xf32>
    %72 = vector.shape_cast %71 : vector<1x32x24xf32> to vector<32x24xf32>
    %cst_35 = arith.constant 1.000000e+00 : f32
    %73 = vector.broadcast %cst_35 : f32 to vector<32x24xf32>
    %74 = arith.cmpf ogt, %45, %73 : vector<32x24xf32>
    %75 = arith.extui %74 : vector<32x24xi1> to vector<32x24xi32>
    %76 = arith.sitofp %75 : vector<32x24xi32> to vector<32x24xf32>
    %cst_36 = arith.constant 0.899999976 : f32
    %77 = vector.broadcast %cst_36 : f32 to vector<32x24xf32>
    %78 = arith.mulf %77, %39 : vector<32x24xf32>
    %79 = arith.addf %78, %72 : vector<32x24xf32>
    %cst_37 = arith.constant 5.000000e-01 : f32
    %80 = vector.broadcast %cst_37 : f32 to vector<32x24xf32>
    %81 = arith.mulf %80, %45 : vector<32x24xf32>
    %82 = arith.addf %81, %79 : vector<32x24xf32>
    %cst_38 = arith.constant 1.000000e+00 : f32
    %83 = vector.broadcast %cst_38 : f32 to vector<32x24xf32>
    %84 = arith.mulf %76, %83 : vector<32x24xf32>
    %85 = arith.subf %82, %84 : vector<32x24xf32>
    %cst_39 = arith.constant 1.000000e+00 : f32
    %86 = vector.broadcast %cst_39 : f32 to vector<32x24xf32>
    %87 = arith.cmpf ogt, %85, %86 : vector<32x24xf32>
    %88 = arith.extui %87 : vector<32x24xi1> to vector<32x24xi32>
    %89 = arith.sitofp %88 : vector<32x24xi32> to vector<32x24xf32>
    %cst_40 = arith.constant 1.000000e+00 : f32
    %90 = vector.broadcast %cst_40 : f32 to vector<32x24xf32>
    %91 = arith.cmpf ogt, %62, %90 : vector<32x24xf32>
    %92 = arith.extui %91 : vector<32x24xi1> to vector<32x24xi32>
    %93 = arith.sitofp %92 : vector<32x24xi32> to vector<32x24xf32>
    %cst_41 = arith.constant 8.000000e-01 : f32
    %94 = vector.broadcast %cst_41 : f32 to vector<32x24xf32>
    %95 = arith.mulf %94, %56 : vector<32x24xf32>
    %96 = arith.addf %95, %69 : vector<32x24xf32>
    %cst_42 = arith.constant 5.000000e-01 : f32
    %97 = vector.broadcast %cst_42 : f32 to vector<32x24xf32>
    %98 = arith.mulf %97, %62 : vector<32x24xf32>
    %99 = arith.addf %98, %96 : vector<32x24xf32>
    %cst_43 = arith.constant 1.000000e+00 : f32
    %100 = vector.broadcast %cst_43 : f32 to vector<32x24xf32>
    %101 = arith.mulf %93, %100 : vector<32x24xf32>
    %102 = arith.subf %99, %101 : vector<32x24xf32>
    %cst_44 = arith.constant 1.000000e+00 : f32
    %103 = vector.broadcast %cst_44 : f32 to vector<32x24xf32>
    %104 = arith.cmpf ogt, %102, %103 : vector<32x24xf32>
    %105 = arith.extui %104 : vector<32x24xi1> to vector<32x24xi32>
    %106 = arith.sitofp %105 : vector<32x24xi32> to vector<32x24xf32>
    %cst_45 = arith.constant 1.000000e+00 : f32
    %107 = vector.broadcast %cst_45 : f32 to vector<32x24xf32>
    %108 = arith.cmpf ogt, %7, %107 : vector<32x24xf32>
    %109 = arith.extui %108 : vector<32x24xi1> to vector<32x24xi32>
    %110 = arith.sitofp %109 : vector<32x24xi32> to vector<32x24xf32>
    %cst_46 = arith.constant 0.699999988 : f32
    %111 = vector.broadcast %cst_46 : f32 to vector<32x24xf32>
    %112 = arith.mulf %111, %7 : vector<32x24xf32>
    %113 = arith.addf %112, %70 : vector<32x24xf32>
    %cst_47 = arith.constant 5.000000e-01 : f32
    %114 = vector.broadcast %cst_47 : f32 to vector<32x24xf32>
    %115 = arith.mulf %114, %7 : vector<32x24xf32>
    %116 = arith.addf %115, %113 : vector<32x24xf32>
    %cst_48 = arith.constant 1.000000e+00 : f32
    %117 = vector.broadcast %cst_48 : f32 to vector<32x24xf32>
    %118 = arith.mulf %110, %117 : vector<32x24xf32>
    %119 = arith.subf %116, %118 : vector<32x24xf32>
    %cst_49 = arith.constant 1.000000e+00 : f32
    %120 = vector.broadcast %cst_49 : f32 to vector<32x24xf32>
    %121 = arith.cmpf ogt, %119, %120 : vector<32x24xf32>
    %122 = arith.extui %121 : vector<32x24xi1> to vector<32x24xi32>
    %123 = arith.sitofp %122 : vector<32x24xi32> to vector<32x24xf32>
    %c0_50 = arith.constant 0 : index
    %c0_51 = arith.constant 0 : index
    %c0_52 = arith.constant 0 : index
    %124 = vector.load %arg5[%c0_50, %c0_51, %c0_52] : memref<8x32x24xf32, #tpu.memory_space<vmem>>, vector<1x32x24xf32>
    %125 = vector.shape_cast %124 : vector<1x32x24xf32> to vector<32x24xf32>
    %126 = vector.shape_cast %123 : vector<32x24xf32> to vector<1x32x24xf32>
    tpu.vector_store %arg5[%c0_50, %c0_51, %c0_52], %126 {strides = array<i32>} : memref<8x32x24xf32, #tpu.memory_space<vmem>>, vector<1x32x24xf32>,
    %127 = tpu.concatenate %89, %106, %123 in 0 : vector<32x24xf32>, vector<32x24xf32>, vector<32x24xf32> -> vector<96x24xf32>
    %cst_53 = arith.constant dense<0.000000e+00> : vector<96x52xf32>
    %128 = tpu.matmul %127, %6, %cst_53 {dimension_numbers = #tpu.dot_dimension_numbers<[1], [0], [0], [1], [0, 0, 1, 1], [], []>} : vector<96x24xf32>, vector<24x52xf32>, vector<96x52xf32> -> vector<96x52xf32>
    %129 = vector.extract_strided_slice %128 {offsets = [0, 0], sizes = [32, 24], strides = [1, 1]} : vector<96x52xf32> to vector<32x24xf32>
    %130 = vector.extract_strided_slice %128 {offsets = [32, 24], sizes = [32, 24], strides = [1, 1]} : vector<96x52xf32> to vector<32x24xf32>
    %131 = vector.extract_strided_slice %128 {offsets = [64, 48], sizes = [32, 4], strides = [1, 1]} : vector<96x52xf32> to vector<32x4xf32>
    %cst_54 = arith.constant 0.949999988 : f32
    %132 = vector.broadcast %cst_54 : f32 to vector<32x4xf32>
    %133 = arith.mulf %132, %8 : vector<32x4xf32>
    %134 = arith.addf %133, %131 : vector<32x4xf32>
    %c0_55 = arith.constant 0 : index
    %c0_56 = arith.constant 0 : index
    %c0_57 = arith.constant 0 : index
    %135 = vector.load %arg4[%c0_55, %c0_56, %c0_57] : memref<8x32x4xf32, #tpu.memory_space<vmem>>, vector<1x32x4xf32>
    %136 = vector.shape_cast %135 : vector<1x32x4xf32> to vector<32x4xf32>
    %137 = vector.shape_cast %134 : vector<32x4xf32> to vector<1x32x4xf32>
    tpu.vector_store %arg4[%c0_55, %c0_56, %c0_57], %137 {strides = array<i32>} : memref<8x32x4xf32, #tpu.memory_space<vmem>>, vector<1x32x4xf32>,
    %c3 = arith.constant 3 : index
    %c0_58 = arith.constant 0 : index
    %c0_59 = arith.constant 0 : index
    %138 = vector.load %arg6[%c3, %c0_58, %c0_59] : memref<8x32x24xf32, #tpu.memory_space<vmem>>, vector<1x32x24xf32>
    %139 = vector.shape_cast %138 : vector<1x32x24xf32> to vector<32x24xf32>
    %cst_60 = arith.constant 1.000000e+00 : f32
    %140 = vector.broadcast %cst_60 : f32 to vector<32x24xf32>
    %141 = arith.cmpf ogt, %85, %140 : vector<32x24xf32>
    %142 = arith.extui %141 : vector<32x24xi1> to vector<32x24xi32>
    %143 = arith.sitofp %142 : vector<32x24xi32> to vector<32x24xf32>
    %cst_61 = arith.constant 0.899999976 : f32
    %144 = vector.broadcast %cst_61 : f32 to vector<32x24xf32>
    %145 = arith.mulf %144, %79 : vector<32x24xf32>
    %146 = arith.addf %145, %139 : vector<32x24xf32>
    %cst_62 = arith.constant 5.000000e-01 : f32
    %147 = vector.broadcast %cst_62 : f32 to vector<32x24xf32>
    %148 = arith.mulf %147, %85 : vector<32x24xf32>
    %149 = arith.addf %148, %146 : vector<32x24xf32>
    %cst_63 = arith.constant 1.000000e+00 : f32
    %150 = vector.broadcast %cst_63 : f32 to vector<32x24xf32>
    %151 = arith.mulf %143, %150 : vector<32x24xf32>
    %152 = arith.subf %149, %151 : vector<32x24xf32>
    %cst_64 = arith.constant 1.000000e+00 : f32
    %153 = vector.broadcast %cst_64 : f32 to vector<32x24xf32>
    %154 = arith.cmpf ogt, %152, %153 : vector<32x24xf32>
    %155 = arith.extui %154 : vector<32x24xi1> to vector<32x24xi32>
    %156 = arith.sitofp %155 : vector<32x24xi32> to vector<32x24xf32>
    %cst_65 = arith.constant 1.000000e+00 : f32
    %157 = vector.broadcast %cst_65 : f32 to vector<32x24xf32>
    %158 = arith.cmpf ogt, %102, %157 : vector<32x24xf32>
    %159 = arith.extui %158 : vector<32x24xi1> to vector<32x24xi32>
    %160 = arith.sitofp %159 : vector<32x24xi32> to vector<32x24xf32>
    %cst_66 = arith.constant 8.000000e-01 : f32
    %161 = vector.broadcast %cst_66 : f32 to vector<32x24xf32>
    %162 = arith.mulf %161, %96 : vector<32x24xf32>
    %163 = arith.addf %162, %129 : vector<32x24xf32>
    %cst_67 = arith.constant 5.000000e-01 : f32
    %164 = vector.broadcast %cst_67 : f32 to vector<32x24xf32>
    %165 = arith.mulf %164, %102 : vector<32x24xf32>
    %166 = arith.addf %165, %163 : vector<32x24xf32>
    %cst_68 = arith.constant 1.000000e+00 : f32
    %167 = vector.broadcast %cst_68 : f32 to vector<32x24xf32>
    %168 = arith.mulf %160, %167 : vector<32x24xf32>
    %169 = arith.subf %166, %168 : vector<32x24xf32>
    %cst_69 = arith.constant 1.000000e+00 : f32
    %170 = vector.broadcast %cst_69 : f32 to vector<32x24xf32>
    %171 = arith.cmpf ogt, %169, %170 : vector<32x24xf32>
    %172 = arith.extui %171 : vector<32x24xi1> to vector<32x24xi32>
    %173 = arith.sitofp %172 : vector<32x24xi32> to vector<32x24xf32>
    %cst_70 = arith.constant 1.000000e+00 : f32
    %174 = vector.broadcast %cst_70 : f32 to vector<32x24xf32>
    %175 = arith.cmpf ogt, %119, %174 : vector<32x24xf32>
    %176 = arith.extui %175 : vector<32x24xi1> to vector<32x24xi32>
    %177 = arith.sitofp %176 : vector<32x24xi32> to vector<32x24xf32>
    %cst_71 = arith.constant 0.699999988 : f32
    %178 = vector.broadcast %cst_71 : f32 to vector<32x24xf32>
    %179 = arith.mulf %178, %113 : vector<32x24xf32>
    %180 = arith.addf %179, %130 : vector<32x24xf32>
    %cst_72 = arith.constant 5.000000e-01 : f32
    %181 = vector.broadcast %cst_72 : f32 to vector<32x24xf32>
    %182 = arith.mulf %181, %119 : vector<32x24xf32>
    %183 = arith.addf %182, %180 : vector<32x24xf32>
    %cst_73 = arith.constant 1.000000e+00 : f32
    %184 = vector.broadcast %cst_73 : f32 to vector<32x24xf32>
    %185 = arith.mulf %177, %184 : vector<32x24xf32>
    %186 = arith.subf %183, %185 : vector<32x24xf32>
    %cst_74 = arith.constant 1.000000e+00 : f32
    %187 = vector.broadcast %cst_74 : f32 to vector<32x24xf32>
    %188 = arith.cmpf ogt, %186, %187 : vector<32x24xf32>
    %189 = arith.extui %188 : vector<32x24xi1> to vector<32x24xi32>
    %190 = arith.sitofp %189 : vector<32x24xi32> to vector<32x24xf32>
    %c1_75 = arith.constant 1 : index
    %c0_76 = arith.constant 0 : index
    %c0_77 = arith.constant 0 : index
    %191 = vector.load %arg5[%c1_75, %c0_76, %c0_77] : memref<8x32x24xf32, #tpu.memory_space<vmem>>, vector<1x32x24xf32>
    %192 = vector.shape_cast %191 : vector<1x32x24xf32> to vector<32x24xf32>
    %193 = vector.shape_cast %190 : vector<32x24xf32> to vector<1x32x24xf32>
    tpu.vector_store %arg5[%c1_75, %c0_76, %c0_77], %193 {strides = array<i32>} : memref<8x32x24xf32, #tpu.memory_space<vmem>>, vector<1x32x24xf32>,
    %194 = tpu.concatenate %156, %173, %190 in 0 : vector<32x24xf32>, vector<32x24xf32>, vector<32x24xf32> -> vector<96x24xf32>
    %cst_78 = arith.constant dense<0.000000e+00> : vector<96x52xf32>
    %195 = tpu.matmul %194, %6, %cst_78 {dimension_numbers = #tpu.dot_dimension_numbers<[1], [0], [0], [1], [0, 0, 1, 1], [], []>} : vector<96x24xf32>, vector<24x52xf32>, vector<96x52xf32> -> vector<96x52xf32>
    %196 = vector.extract_strided_slice %195 {offsets = [0, 0], sizes = [32, 24], strides = [1, 1]} : vector<96x52xf32> to vector<32x24xf32>
    %197 = vector.extract_strided_slice %195 {offsets = [32, 24], sizes = [32, 24], strides = [1, 1]} : vector<96x52xf32> to vector<32x24xf32>
    %198 = vector.extract_strided_slice %195 {offsets = [64, 48], sizes = [32, 4], strides = [1, 1]} : vector<96x52xf32> to vector<32x4xf32>
    %cst_79 = arith.constant 0.949999988 : f32
    %199 = vector.broadcast %cst_79 : f32 to vector<32x4xf32>
    %200 = arith.mulf %199, %134 : vector<32x4xf32>
    %201 = arith.addf %200, %198 : vector<32x4xf32>
    %c1_80 = arith.constant 1 : index
    %c0_81 = arith.constant 0 : index
    %c0_82 = arith.constant 0 : index
    %202 = vector.load %arg4[%c1_80, %c0_81, %c0_82] : memref<8x32x4xf32, #tpu.memory_space<vmem>>, vector<1x32x4xf32>
    %203 = vector.shape_cast %202 : vector<1x32x4xf32> to vector<32x4xf32>
    %204 = vector.shape_cast %201 : vector<32x4xf32> to vector<1x32x4xf32>
    tpu.vector_store %arg4[%c1_80, %c0_81, %c0_82], %204 {strides = array<i32>} : memref<8x32x4xf32, #tpu.memory_space<vmem>>, vector<1x32x4xf32>,
    %c4 = arith.constant 4 : index
    %c0_83 = arith.constant 0 : index
    %c0_84 = arith.constant 0 : index
    %205 = vector.load %arg6[%c4, %c0_83, %c0_84] : memref<8x32x24xf32, #tpu.memory_space<vmem>>, vector<1x32x24xf32>
    %206 = vector.shape_cast %205 : vector<1x32x24xf32> to vector<32x24xf32>
    %cst_85 = arith.constant 1.000000e+00 : f32
    %207 = vector.broadcast %cst_85 : f32 to vector<32x24xf32>
    %208 = arith.cmpf ogt, %152, %207 : vector<32x24xf32>
    %209 = arith.extui %208 : vector<32x24xi1> to vector<32x24xi32>
    %210 = arith.sitofp %209 : vector<32x24xi32> to vector<32x24xf32>
    %cst_86 = arith.constant 0.899999976 : f32
    %211 = vector.broadcast %cst_86 : f32 to vector<32x24xf32>
    %212 = arith.mulf %211, %146 : vector<32x24xf32>
    %213 = arith.addf %212, %206 : vector<32x24xf32>
    %cst_87 = arith.constant 5.000000e-01 : f32
    %214 = vector.broadcast %cst_87 : f32 to vector<32x24xf32>
    %215 = arith.mulf %214, %152 : vector<32x24xf32>
    %216 = arith.addf %215, %213 : vector<32x24xf32>
    %cst_88 = arith.constant 1.000000e+00 : f32
    %217 = vector.broadcast %cst_88 : f32 to vector<32x24xf32>
    %218 = arith.mulf %210, %217 : vector<32x24xf32>
    %219 = arith.subf %216, %218 : vector<32x24xf32>
    %cst_89 = arith.constant 1.000000e+00 : f32
    %220 = vector.broadcast %cst_89 : f32 to vector<32x24xf32>
    %221 = arith.cmpf ogt, %219, %220 : vector<32x24xf32>
    %222 = arith.extui %221 : vector<32x24xi1> to vector<32x24xi32>
    %223 = arith.sitofp %222 : vector<32x24xi32> to vector<32x24xf32>
    %cst_90 = arith.constant 1.000000e+00 : f32
    %224 = vector.broadcast %cst_90 : f32 to vector<32x24xf32>
    %225 = arith.cmpf ogt, %169, %224 : vector<32x24xf32>
    %226 = arith.extui %225 : vector<32x24xi1> to vector<32x24xi32>
    %227 = arith.sitofp %226 : vector<32x24xi32> to vector<32x24xf32>
    %cst_91 = arith.constant 8.000000e-01 : f32
    %228 = vector.broadcast %cst_91 : f32 to vector<32x24xf32>
    %229 = arith.mulf %228, %163 : vector<32x24xf32>
    %230 = arith.addf %229, %196 : vector<32x24xf32>
    %cst_92 = arith.constant 5.000000e-01 : f32
    %231 = vector.broadcast %cst_92 : f32 to vector<32x24xf32>
    %232 = arith.mulf %231, %169 : vector<32x24xf32>
    %233 = arith.addf %232, %230 : vector<32x24xf32>
    %cst_93 = arith.constant 1.000000e+00 : f32
    %234 = vector.broadcast %cst_93 : f32 to vector<32x24xf32>
    %235 = arith.mulf %227, %234 : vector<32x24xf32>
    %236 = arith.subf %233, %235 : vector<32x24xf32>
    %cst_94 = arith.constant 1.000000e+00 : f32
    %237 = vector.broadcast %cst_94 : f32 to vector<32x24xf32>
    %238 = arith.cmpf ogt, %236, %237 : vector<32x24xf32>
    %239 = arith.extui %238 : vector<32x24xi1> to vector<32x24xi32>
    %240 = arith.sitofp %239 : vector<32x24xi32> to vector<32x24xf32>
    %cst_95 = arith.constant 1.000000e+00 : f32
    %241 = vector.broadcast %cst_95 : f32 to vector<32x24xf32>
    %242 = arith.cmpf ogt, %186, %241 : vector<32x24xf32>
    %243 = arith.extui %242 : vector<32x24xi1> to vector<32x24xi32>
    %244 = arith.sitofp %243 : vector<32x24xi32> to vector<32x24xf32>
    %cst_96 = arith.constant 0.699999988 : f32
    %245 = vector.broadcast %cst_96 : f32 to vector<32x24xf32>
    %246 = arith.mulf %245, %180 : vector<32x24xf32>
    %247 = arith.addf %246, %197 : vector<32x24xf32>
    %cst_97 = arith.constant 5.000000e-01 : f32
    %248 = vector.broadcast %cst_97 : f32 to vector<32x24xf32>
    %249 = arith.mulf %248, %186 : vector<32x24xf32>
    %250 = arith.addf %249, %247 : vector<32x24xf32>
    %cst_98 = arith.constant 1.000000e+00 : f32
    %251 = vector.broadcast %cst_98 : f32 to vector<32x24xf32>
    %252 = arith.mulf %244, %251 : vector<32x24xf32>
    %253 = arith.subf %250, %252 : vector<32x24xf32>
    %cst_99 = arith.constant 1.000000e+00 : f32
    %254 = vector.broadcast %cst_99 : f32 to vector<32x24xf32>
    %255 = arith.cmpf ogt, %253, %254 : vector<32x24xf32>
    %256 = arith.extui %255 : vector<32x24xi1> to vector<32x24xi32>
    %257 = arith.sitofp %256 : vector<32x24xi32> to vector<32x24xf32>
    %c2_100 = arith.constant 2 : index
    %c0_101 = arith.constant 0 : index
    %c0_102 = arith.constant 0 : index
    %258 = vector.load %arg5[%c2_100, %c0_101, %c0_102] : memref<8x32x24xf32, #tpu.memory_space<vmem>>, vector<1x32x24xf32>
    %259 = vector.shape_cast %258 : vector<1x32x24xf32> to vector<32x24xf32>
    %260 = vector.shape_cast %257 : vector<32x24xf32> to vector<1x32x24xf32>
    tpu.vector_store %arg5[%c2_100, %c0_101, %c0_102], %260 {strides = array<i32>} : memref<8x32x24xf32, #tpu.memory_space<vmem>>, vector<1x32x24xf32>,
    %261 = tpu.concatenate %223, %240, %257 in 0 : vector<32x24xf32>, vector<32x24xf32>, vector<32x24xf32> -> vector<96x24xf32>
    %cst_103 = arith.constant dense<0.000000e+00> : vector<96x52xf32>
    %262 = tpu.matmul %261, %6, %cst_103 {dimension_numbers = #tpu.dot_dimension_numbers<[1], [0], [0], [1], [0, 0, 1, 1], [], []>} : vector<96x24xf32>, vector<24x52xf32>, vector<96x52xf32> -> vector<96x52xf32>
    %263 = vector.extract_strided_slice %262 {offsets = [0, 0], sizes = [32, 24], strides = [1, 1]} : vector<96x52xf32> to vector<32x24xf32>
    %264 = vector.extract_strided_slice %262 {offsets = [32, 24], sizes = [32, 24], strides = [1, 1]} : vector<96x52xf32> to vector<32x24xf32>
    %265 = vector.extract_strided_slice %262 {offsets = [64, 48], sizes = [32, 4], strides = [1, 1]} : vector<96x52xf32> to vector<32x4xf32>
    %cst_104 = arith.constant 0.949999988 : f32
    %266 = vector.broadcast %cst_104 : f32 to vector<32x4xf32>
    %267 = arith.mulf %266, %201 : vector<32x4xf32>
    %268 = arith.addf %267, %265 : vector<32x4xf32>
    %c2_105 = arith.constant 2 : index
    %c0_106 = arith.constant 0 : index
    %c0_107 = arith.constant 0 : index
    %269 = vector.load %arg4[%c2_105, %c0_106, %c0_107] : memref<8x32x4xf32, #tpu.memory_space<vmem>>, vector<1x32x4xf32>
    %270 = vector.shape_cast %269 : vector<1x32x4xf32> to vector<32x4xf32>
    %271 = vector.shape_cast %268 : vector<32x4xf32> to vector<1x32x4xf32>
    tpu.vector_store %arg4[%c2_105, %c0_106, %c0_107], %271 {strides = array<i32>} : memref<8x32x4xf32, #tpu.memory_space<vmem>>, vector<1x32x4xf32>,
    %c5 = arith.constant 5 : index
    %c0_108 = arith.constant 0 : index
    %c0_109 = arith.constant 0 : index
    %272 = vector.load %arg6[%c5, %c0_108, %c0_109] : memref<8x32x24xf32, #tpu.memory_space<vmem>>, vector<1x32x24xf32>
    %273 = vector.shape_cast %272 : vector<1x32x24xf32> to vector<32x24xf32>
    %cst_110 = arith.constant 1.000000e+00 : f32
    %274 = vector.broadcast %cst_110 : f32 to vector<32x24xf32>
    %275 = arith.cmpf ogt, %219, %274 : vector<32x24xf32>
    %276 = arith.extui %275 : vector<32x24xi1> to vector<32x24xi32>
    %277 = arith.sitofp %276 : vector<32x24xi32> to vector<32x24xf32>
    %cst_111 = arith.constant 0.899999976 : f32
    %278 = vector.broadcast %cst_111 : f32 to vector<32x24xf32>
    %279 = arith.mulf %278, %213 : vector<32x24xf32>
    %280 = arith.addf %279, %273 : vector<32x24xf32>
    %cst_112 = arith.constant 5.000000e-01 : f32
    %281 = vector.broadcast %cst_112 : f32 to vector<32x24xf32>
    %282 = arith.mulf %281, %219 : vector<32x24xf32>
    %283 = arith.addf %282, %280 : vector<32x24xf32>
    %cst_113 = arith.constant 1.000000e+00 : f32
    %284 = vector.broadcast %cst_113 : f32 to vector<32x24xf32>
    %285 = arith.mulf %277, %284 : vector<32x24xf32>
    %286 = arith.subf %283, %285 : vector<32x24xf32>
    %cst_114 = arith.constant 1.000000e+00 : f32
    %287 = vector.broadcast %cst_114 : f32 to vector<32x24xf32>
    %288 = arith.cmpf ogt, %286, %287 : vector<32x24xf32>
    %289 = arith.extui %288 : vector<32x24xi1> to vector<32x24xi32>
    %290 = arith.sitofp %289 : vector<32x24xi32> to vector<32x24xf32>
    %cst_115 = arith.constant 1.000000e+00 : f32
    %291 = vector.broadcast %cst_115 : f32 to vector<32x24xf32>
    %292 = arith.cmpf ogt, %236, %291 : vector<32x24xf32>
    %293 = arith.extui %292 : vector<32x24xi1> to vector<32x24xi32>
    %294 = arith.sitofp %293 : vector<32x24xi32> to vector<32x24xf32>
    %cst_116 = arith.constant 8.000000e-01 : f32
    %295 = vector.broadcast %cst_116 : f32 to vector<32x24xf32>
    %296 = arith.mulf %295, %230 : vector<32x24xf32>
    %297 = arith.addf %296, %263 : vector<32x24xf32>
    %cst_117 = arith.constant 5.000000e-01 : f32
    %298 = vector.broadcast %cst_117 : f32 to vector<32x24xf32>
    %299 = arith.mulf %298, %236 : vector<32x24xf32>
    %300 = arith.addf %299, %297 : vector<32x24xf32>
    %cst_118 = arith.constant 1.000000e+00 : f32
    %301 = vector.broadcast %cst_118 : f32 to vector<32x24xf32>
    %302 = arith.mulf %294, %301 : vector<32x24xf32>
    %303 = arith.subf %300, %302 : vector<32x24xf32>
    %cst_119 = arith.constant 1.000000e+00 : f32
    %304 = vector.broadcast %cst_119 : f32 to vector<32x24xf32>
    %305 = arith.cmpf ogt, %303, %304 : vector<32x24xf32>
    %306 = arith.extui %305 : vector<32x24xi1> to vector<32x24xi32>
    %307 = arith.sitofp %306 : vector<32x24xi32> to vector<32x24xf32>
    %cst_120 = arith.constant 1.000000e+00 : f32
    %308 = vector.broadcast %cst_120 : f32 to vector<32x24xf32>
    %309 = arith.cmpf ogt, %253, %308 : vector<32x24xf32>
    %310 = arith.extui %309 : vector<32x24xi1> to vector<32x24xi32>
    %311 = arith.sitofp %310 : vector<32x24xi32> to vector<32x24xf32>
    %cst_121 = arith.constant 0.699999988 : f32
    %312 = vector.broadcast %cst_121 : f32 to vector<32x24xf32>
    %313 = arith.mulf %312, %247 : vector<32x24xf32>
    %314 = arith.addf %313, %264 : vector<32x24xf32>
    %cst_122 = arith.constant 5.000000e-01 : f32
    %315 = vector.broadcast %cst_122 : f32 to vector<32x24xf32>
    %316 = arith.mulf %315, %253 : vector<32x24xf32>
    %317 = arith.addf %316, %314 : vector<32x24xf32>
    %cst_123 = arith.constant 1.000000e+00 : f32
    %318 = vector.broadcast %cst_123 : f32 to vector<32x24xf32>
    %319 = arith.mulf %311, %318 : vector<32x24xf32>
    %320 = arith.subf %317, %319 : vector<32x24xf32>
    %cst_124 = arith.constant 1.000000e+00 : f32
    %321 = vector.broadcast %cst_124 : f32 to vector<32x24xf32>
    %322 = arith.cmpf ogt, %320, %321 : vector<32x24xf32>
    %323 = arith.extui %322 : vector<32x24xi1> to vector<32x24xi32>
    %324 = arith.sitofp %323 : vector<32x24xi32> to vector<32x24xf32>
    %c3_125 = arith.constant 3 : index
    %c0_126 = arith.constant 0 : index
    %c0_127 = arith.constant 0 : index
    %325 = vector.load %arg5[%c3_125, %c0_126, %c0_127] : memref<8x32x24xf32, #tpu.memory_space<vmem>>, vector<1x32x24xf32>
    %326 = vector.shape_cast %325 : vector<1x32x24xf32> to vector<32x24xf32>
    %327 = vector.shape_cast %324 : vector<32x24xf32> to vector<1x32x24xf32>
    tpu.vector_store %arg5[%c3_125, %c0_126, %c0_127], %327 {strides = array<i32>} : memref<8x32x24xf32, #tpu.memory_space<vmem>>, vector<1x32x24xf32>,
    %328 = tpu.concatenate %290, %307, %324 in 0 : vector<32x24xf32>, vector<32x24xf32>, vector<32x24xf32> -> vector<96x24xf32>
    %cst_128 = arith.constant dense<0.000000e+00> : vector<96x52xf32>
    %329 = tpu.matmul %328, %6, %cst_128 {dimension_numbers = #tpu.dot_dimension_numbers<[1], [0], [0], [1], [0, 0, 1, 1], [], []>} : vector<96x24xf32>, vector<24x52xf32>, vector<96x52xf32> -> vector<96x52xf32>
    %330 = vector.extract_strided_slice %329 {offsets = [0, 0], sizes = [32, 24], strides = [1, 1]} : vector<96x52xf32> to vector<32x24xf32>
    %331 = vector.extract_strided_slice %329 {offsets = [32, 24], sizes = [32, 24], strides = [1, 1]} : vector<96x52xf32> to vector<32x24xf32>
    %332 = vector.extract_strided_slice %329 {offsets = [64, 48], sizes = [32, 4], strides = [1, 1]} : vector<96x52xf32> to vector<32x4xf32>
    %cst_129 = arith.constant 0.949999988 : f32
    %333 = vector.broadcast %cst_129 : f32 to vector<32x4xf32>
    %334 = arith.mulf %333, %268 : vector<32x4xf32>
    %335 = arith.addf %334, %332 : vector<32x4xf32>
    %c3_130 = arith.constant 3 : index
    %c0_131 = arith.constant 0 : index
    %c0_132 = arith.constant 0 : index
    %336 = vector.load %arg4[%c3_130, %c0_131, %c0_132] : memref<8x32x4xf32, #tpu.memory_space<vmem>>, vector<1x32x4xf32>
    %337 = vector.shape_cast %336 : vector<1x32x4xf32> to vector<32x4xf32>
    %338 = vector.shape_cast %335 : vector<32x4xf32> to vector<1x32x4xf32>
    tpu.vector_store %arg4[%c3_130, %c0_131, %c0_132], %338 {strides = array<i32>} : memref<8x32x4xf32, #tpu.memory_space<vmem>>, vector<1x32x4xf32>,
    %c6 = arith.constant 6 : index
    %c0_133 = arith.constant 0 : index
    %c0_134 = arith.constant 0 : index
    %339 = vector.load %arg6[%c6, %c0_133, %c0_134] : memref<8x32x24xf32, #tpu.memory_space<vmem>>, vector<1x32x24xf32>
    %340 = vector.shape_cast %339 : vector<1x32x24xf32> to vector<32x24xf32>
    %cst_135 = arith.constant 1.000000e+00 : f32
    %341 = vector.broadcast %cst_135 : f32 to vector<32x24xf32>
    %342 = arith.cmpf ogt, %286, %341 : vector<32x24xf32>
    %343 = arith.extui %342 : vector<32x24xi1> to vector<32x24xi32>
    %344 = arith.sitofp %343 : vector<32x24xi32> to vector<32x24xf32>
    %cst_136 = arith.constant 0.899999976 : f32
    %345 = vector.broadcast %cst_136 : f32 to vector<32x24xf32>
    %346 = arith.mulf %345, %280 : vector<32x24xf32>
    %347 = arith.addf %346, %340 : vector<32x24xf32>
    %cst_137 = arith.constant 5.000000e-01 : f32
    %348 = vector.broadcast %cst_137 : f32 to vector<32x24xf32>
    %349 = arith.mulf %348, %286 : vector<32x24xf32>
    %350 = arith.addf %349, %347 : vector<32x24xf32>
    %cst_138 = arith.constant 1.000000e+00 : f32
    %351 = vector.broadcast %cst_138 : f32 to vector<32x24xf32>
    %352 = arith.mulf %344, %351 : vector<32x24xf32>
    %353 = arith.subf %350, %352 : vector<32x24xf32>
    %cst_139 = arith.constant 1.000000e+00 : f32
    %354 = vector.broadcast %cst_139 : f32 to vector<32x24xf32>
    %355 = arith.cmpf ogt, %353, %354 : vector<32x24xf32>
    %356 = arith.extui %355 : vector<32x24xi1> to vector<32x24xi32>
    %357 = arith.sitofp %356 : vector<32x24xi32> to vector<32x24xf32>
    %cst_140 = arith.constant 1.000000e+00 : f32
    %358 = vector.broadcast %cst_140 : f32 to vector<32x24xf32>
    %359 = arith.cmpf ogt, %303, %358 : vector<32x24xf32>
    %360 = arith.extui %359 : vector<32x24xi1> to vector<32x24xi32>
    %361 = arith.sitofp %360 : vector<32x24xi32> to vector<32x24xf32>
    %cst_141 = arith.constant 8.000000e-01 : f32
    %362 = vector.broadcast %cst_141 : f32 to vector<32x24xf32>
    %363 = arith.mulf %362, %297 : vector<32x24xf32>
    %364 = arith.addf %363, %330 : vector<32x24xf32>
    %cst_142 = arith.constant 5.000000e-01 : f32
    %365 = vector.broadcast %cst_142 : f32 to vector<32x24xf32>
    %366 = arith.mulf %365, %303 : vector<32x24xf32>
    %367 = arith.addf %366, %364 : vector<32x24xf32>
    %cst_143 = arith.constant 1.000000e+00 : f32
    %368 = vector.broadcast %cst_143 : f32 to vector<32x24xf32>
    %369 = arith.mulf %361, %368 : vector<32x24xf32>
    %370 = arith.subf %367, %369 : vector<32x24xf32>
    %cst_144 = arith.constant 1.000000e+00 : f32
    %371 = vector.broadcast %cst_144 : f32 to vector<32x24xf32>
    %372 = arith.cmpf ogt, %370, %371 : vector<32x24xf32>
    %373 = arith.extui %372 : vector<32x24xi1> to vector<32x24xi32>
    %374 = arith.sitofp %373 : vector<32x24xi32> to vector<32x24xf32>
    %cst_145 = arith.constant 1.000000e+00 : f32
    %375 = vector.broadcast %cst_145 : f32 to vector<32x24xf32>
    %376 = arith.cmpf ogt, %320, %375 : vector<32x24xf32>
    %377 = arith.extui %376 : vector<32x24xi1> to vector<32x24xi32>
    %378 = arith.sitofp %377 : vector<32x24xi32> to vector<32x24xf32>
    %cst_146 = arith.constant 0.699999988 : f32
    %379 = vector.broadcast %cst_146 : f32 to vector<32x24xf32>
    %380 = arith.mulf %379, %314 : vector<32x24xf32>
    %381 = arith.addf %380, %331 : vector<32x24xf32>
    %cst_147 = arith.constant 5.000000e-01 : f32
    %382 = vector.broadcast %cst_147 : f32 to vector<32x24xf32>
    %383 = arith.mulf %382, %320 : vector<32x24xf32>
    %384 = arith.addf %383, %381 : vector<32x24xf32>
    %cst_148 = arith.constant 1.000000e+00 : f32
    %385 = vector.broadcast %cst_148 : f32 to vector<32x24xf32>
    %386 = arith.mulf %378, %385 : vector<32x24xf32>
    %387 = arith.subf %384, %386 : vector<32x24xf32>
    %cst_149 = arith.constant 1.000000e+00 : f32
    %388 = vector.broadcast %cst_149 : f32 to vector<32x24xf32>
    %389 = arith.cmpf ogt, %387, %388 : vector<32x24xf32>
    %390 = arith.extui %389 : vector<32x24xi1> to vector<32x24xi32>
    %391 = arith.sitofp %390 : vector<32x24xi32> to vector<32x24xf32>
    %c4_150 = arith.constant 4 : index
    %c0_151 = arith.constant 0 : index
    %c0_152 = arith.constant 0 : index
    %392 = vector.load %arg5[%c4_150, %c0_151, %c0_152] : memref<8x32x24xf32, #tpu.memory_space<vmem>>, vector<1x32x24xf32>
    %393 = vector.shape_cast %392 : vector<1x32x24xf32> to vector<32x24xf32>
    %394 = vector.shape_cast %391 : vector<32x24xf32> to vector<1x32x24xf32>
    tpu.vector_store %arg5[%c4_150, %c0_151, %c0_152], %394 {strides = array<i32>} : memref<8x32x24xf32, #tpu.memory_space<vmem>>, vector<1x32x24xf32>,
    %395 = tpu.concatenate %357, %374, %391 in 0 : vector<32x24xf32>, vector<32x24xf32>, vector<32x24xf32> -> vector<96x24xf32>
    %cst_153 = arith.constant dense<0.000000e+00> : vector<96x52xf32>
    %396 = tpu.matmul %395, %6, %cst_153 {dimension_numbers = #tpu.dot_dimension_numbers<[1], [0], [0], [1], [0, 0, 1, 1], [], []>} : vector<96x24xf32>, vector<24x52xf32>, vector<96x52xf32> -> vector<96x52xf32>
    %397 = vector.extract_strided_slice %396 {offsets = [0, 0], sizes = [32, 24], strides = [1, 1]} : vector<96x52xf32> to vector<32x24xf32>
    %398 = vector.extract_strided_slice %396 {offsets = [32, 24], sizes = [32, 24], strides = [1, 1]} : vector<96x52xf32> to vector<32x24xf32>
    %399 = vector.extract_strided_slice %396 {offsets = [64, 48], sizes = [32, 4], strides = [1, 1]} : vector<96x52xf32> to vector<32x4xf32>
    %cst_154 = arith.constant 0.949999988 : f32
    %400 = vector.broadcast %cst_154 : f32 to vector<32x4xf32>
    %401 = arith.mulf %400, %335 : vector<32x4xf32>
    %402 = arith.addf %401, %399 : vector<32x4xf32>
    %c4_155 = arith.constant 4 : index
    %c0_156 = arith.constant 0 : index
    %c0_157 = arith.constant 0 : index
    %403 = vector.load %arg4[%c4_155, %c0_156, %c0_157] : memref<8x32x4xf32, #tpu.memory_space<vmem>>, vector<1x32x4xf32>
    %404 = vector.shape_cast %403 : vector<1x32x4xf32> to vector<32x4xf32>
    %405 = vector.shape_cast %402 : vector<32x4xf32> to vector<1x32x4xf32>
    tpu.vector_store %arg4[%c4_155, %c0_156, %c0_157], %405 {strides = array<i32>} : memref<8x32x4xf32, #tpu.memory_space<vmem>>, vector<1x32x4xf32>,
    %c7 = arith.constant 7 : index
    %c0_158 = arith.constant 0 : index
    %c0_159 = arith.constant 0 : index
    %406 = vector.load %arg6[%c7, %c0_158, %c0_159] : memref<8x32x24xf32, #tpu.memory_space<vmem>>, vector<1x32x24xf32>
    %407 = vector.shape_cast %406 : vector<1x32x24xf32> to vector<32x24xf32>
    %cst_160 = arith.constant 1.000000e+00 : f32
    %408 = vector.broadcast %cst_160 : f32 to vector<32x24xf32>
    %409 = arith.cmpf ogt, %353, %408 : vector<32x24xf32>
    %410 = arith.extui %409 : vector<32x24xi1> to vector<32x24xi32>
    %411 = arith.sitofp %410 : vector<32x24xi32> to vector<32x24xf32>
    %cst_161 = arith.constant 0.899999976 : f32
    %412 = vector.broadcast %cst_161 : f32 to vector<32x24xf32>
    %413 = arith.mulf %412, %347 : vector<32x24xf32>
    %414 = arith.addf %413, %407 : vector<32x24xf32>
    %cst_162 = arith.constant 5.000000e-01 : f32
    %415 = vector.broadcast %cst_162 : f32 to vector<32x24xf32>
    %416 = arith.mulf %415, %353 : vector<32x24xf32>
    %417 = arith.addf %416, %414 : vector<32x24xf32>
    %cst_163 = arith.constant 1.000000e+00 : f32
    %418 = vector.broadcast %cst_163 : f32 to vector<32x24xf32>
    %419 = arith.mulf %411, %418 : vector<32x24xf32>
    %420 = arith.subf %417, %419 : vector<32x24xf32>
    %cst_164 = arith.constant 1.000000e+00 : f32
    %421 = vector.broadcast %cst_164 : f32 to vector<32x24xf32>
    %422 = arith.cmpf ogt, %420, %421 : vector<32x24xf32>
    %423 = arith.extui %422 : vector<32x24xi1> to vector<32x24xi32>
    %424 = arith.sitofp %423 : vector<32x24xi32> to vector<32x24xf32>
    %cst_165 = arith.constant 1.000000e+00 : f32
    %425 = vector.broadcast %cst_165 : f32 to vector<32x24xf32>
    %426 = arith.cmpf ogt, %370, %425 : vector<32x24xf32>
    %427 = arith.extui %426 : vector<32x24xi1> to vector<32x24xi32>
    %428 = arith.sitofp %427 : vector<32x24xi32> to vector<32x24xf32>
    %cst_166 = arith.constant 8.000000e-01 : f32
    %429 = vector.broadcast %cst_166 : f32 to vector<32x24xf32>
    %430 = arith.mulf %429, %364 : vector<32x24xf32>
    %431 = arith.addf %430, %397 : vector<32x24xf32>
    %cst_167 = arith.constant 5.000000e-01 : f32
    %432 = vector.broadcast %cst_167 : f32 to vector<32x24xf32>
    %433 = arith.mulf %432, %370 : vector<32x24xf32>
    %434 = arith.addf %433, %431 : vector<32x24xf32>
    %cst_168 = arith.constant 1.000000e+00 : f32
    %435 = vector.broadcast %cst_168 : f32 to vector<32x24xf32>
    %436 = arith.mulf %428, %435 : vector<32x24xf32>
    %437 = arith.subf %434, %436 : vector<32x24xf32>
    %cst_169 = arith.constant 1.000000e+00 : f32
    %438 = vector.broadcast %cst_169 : f32 to vector<32x24xf32>
    %439 = arith.cmpf ogt, %437, %438 : vector<32x24xf32>
    %440 = arith.extui %439 : vector<32x24xi1> to vector<32x24xi32>
    %441 = arith.sitofp %440 : vector<32x24xi32> to vector<32x24xf32>
    %cst_170 = arith.constant 1.000000e+00 : f32
    %442 = vector.broadcast %cst_170 : f32 to vector<32x24xf32>
    %443 = arith.cmpf ogt, %387, %442 : vector<32x24xf32>
    %444 = arith.extui %443 : vector<32x24xi1> to vector<32x24xi32>
    %445 = arith.sitofp %444 : vector<32x24xi32> to vector<32x24xf32>
    %cst_171 = arith.constant 0.699999988 : f32
    %446 = vector.broadcast %cst_171 : f32 to vector<32x24xf32>
    %447 = arith.mulf %446, %381 : vector<32x24xf32>
    %448 = arith.addf %447, %398 : vector<32x24xf32>
    %cst_172 = arith.constant 5.000000e-01 : f32
    %449 = vector.broadcast %cst_172 : f32 to vector<32x24xf32>
    %450 = arith.mulf %449, %387 : vector<32x24xf32>
    %451 = arith.addf %450, %448 : vector<32x24xf32>
    %cst_173 = arith.constant 1.000000e+00 : f32
    %452 = vector.broadcast %cst_173 : f32 to vector<32x24xf32>
    %453 = arith.mulf %445, %452 : vector<32x24xf32>
    %454 = arith.subf %451, %453 : vector<32x24xf32>
    %cst_174 = arith.constant 1.000000e+00 : f32
    %455 = vector.broadcast %cst_174 : f32 to vector<32x24xf32>
    %456 = arith.cmpf ogt, %454, %455 : vector<32x24xf32>
    %457 = arith.extui %456 : vector<32x24xi1> to vector<32x24xi32>
    %458 = arith.sitofp %457 : vector<32x24xi32> to vector<32x24xf32>
    %c5_175 = arith.constant 5 : index
    %c0_176 = arith.constant 0 : index
    %c0_177 = arith.constant 0 : index
    %459 = vector.load %arg5[%c5_175, %c0_176, %c0_177] : memref<8x32x24xf32, #tpu.memory_space<vmem>>, vector<1x32x24xf32>
    %460 = vector.shape_cast %459 : vector<1x32x24xf32> to vector<32x24xf32>
    %461 = vector.shape_cast %458 : vector<32x24xf32> to vector<1x32x24xf32>
    tpu.vector_store %arg5[%c5_175, %c0_176, %c0_177], %461 {strides = array<i32>} : memref<8x32x24xf32, #tpu.memory_space<vmem>>, vector<1x32x24xf32>,
    %462 = tpu.concatenate %424, %441, %458 in 0 : vector<32x24xf32>, vector<32x24xf32>, vector<32x24xf32> -> vector<96x24xf32>
    %cst_178 = arith.constant dense<0.000000e+00> : vector<96x52xf32>
    %463 = tpu.matmul %462, %6, %cst_178 {dimension_numbers = #tpu.dot_dimension_numbers<[1], [0], [0], [1], [0, 0, 1, 1], [], []>} : vector<96x24xf32>, vector<24x52xf32>, vector<96x52xf32> -> vector<96x52xf32>
    %464 = vector.extract_strided_slice %463 {offsets = [0, 0], sizes = [32, 24], strides = [1, 1]} : vector<96x52xf32> to vector<32x24xf32>
    %465 = vector.extract_strided_slice %463 {offsets = [32, 24], sizes = [32, 24], strides = [1, 1]} : vector<96x52xf32> to vector<32x24xf32>
    %466 = vector.extract_strided_slice %463 {offsets = [64, 48], sizes = [32, 4], strides = [1, 1]} : vector<96x52xf32> to vector<32x4xf32>
    %cst_179 = arith.constant 0.949999988 : f32
    %467 = vector.broadcast %cst_179 : f32 to vector<32x4xf32>
    %468 = arith.mulf %467, %402 : vector<32x4xf32>
    %469 = arith.addf %468, %466 : vector<32x4xf32>
    %c5_180 = arith.constant 5 : index
    %c0_181 = arith.constant 0 : index
    %c0_182 = arith.constant 0 : index
    %470 = vector.load %arg4[%c5_180, %c0_181, %c0_182] : memref<8x32x4xf32, #tpu.memory_space<vmem>>, vector<1x32x4xf32>
    %471 = vector.shape_cast %470 : vector<1x32x4xf32> to vector<32x4xf32>
    %472 = vector.shape_cast %469 : vector<32x4xf32> to vector<1x32x4xf32>
    tpu.vector_store %arg4[%c5_180, %c0_181, %c0_182], %472 {strides = array<i32>} : memref<8x32x4xf32, #tpu.memory_space<vmem>>, vector<1x32x4xf32>,
    %cst_183 = arith.constant 1.000000e+00 : f32
    %473 = vector.broadcast %cst_183 : f32 to vector<32x24xf32>
    %474 = arith.cmpf ogt, %437, %473 : vector<32x24xf32>
    %475 = arith.extui %474 : vector<32x24xi1> to vector<32x24xi32>
    %476 = arith.sitofp %475 : vector<32x24xi32> to vector<32x24xf32>
    %cst_184 = arith.constant 8.000000e-01 : f32
    %477 = vector.broadcast %cst_184 : f32 to vector<32x24xf32>
    %478 = arith.mulf %477, %431 : vector<32x24xf32>
    %479 = arith.addf %478, %464 : vector<32x24xf32>
    %cst_185 = arith.constant 5.000000e-01 : f32
    %480 = vector.broadcast %cst_185 : f32 to vector<32x24xf32>
    %481 = arith.mulf %480, %437 : vector<32x24xf32>
    %482 = arith.addf %481, %479 : vector<32x24xf32>
    %cst_186 = arith.constant 1.000000e+00 : f32
    %483 = vector.broadcast %cst_186 : f32 to vector<32x24xf32>
    %484 = arith.mulf %476, %483 : vector<32x24xf32>
    %485 = arith.subf %482, %484 : vector<32x24xf32>
    %cst_187 = arith.constant 1.000000e+00 : f32
    %486 = vector.broadcast %cst_187 : f32 to vector<32x24xf32>
    %487 = arith.cmpf ogt, %485, %486 : vector<32x24xf32>
    %488 = arith.extui %487 : vector<32x24xi1> to vector<32x24xi32>
    %489 = arith.sitofp %488 : vector<32x24xi32> to vector<32x24xf32>
    %cst_188 = arith.constant 1.000000e+00 : f32
    %490 = vector.broadcast %cst_188 : f32 to vector<32x24xf32>
    %491 = arith.cmpf ogt, %454, %490 : vector<32x24xf32>
    %492 = arith.extui %491 : vector<32x24xi1> to vector<32x24xi32>
    %493 = arith.sitofp %492 : vector<32x24xi32> to vector<32x24xf32>
    %cst_189 = arith.constant 0.699999988 : f32
    %494 = vector.broadcast %cst_189 : f32 to vector<32x24xf32>
    %495 = arith.mulf %494, %448 : vector<32x24xf32>
    %496 = arith.addf %495, %465 : vector<32x24xf32>
    %cst_190 = arith.constant 5.000000e-01 : f32
    %497 = vector.broadcast %cst_190 : f32 to vector<32x24xf32>
    %498 = arith.mulf %497, %454 : vector<32x24xf32>
    %499 = arith.addf %498, %496 : vector<32x24xf32>
    %cst_191 = arith.constant 1.000000e+00 : f32
    %500 = vector.broadcast %cst_191 : f32 to vector<32x24xf32>
    %501 = arith.mulf %493, %500 : vector<32x24xf32>
    %502 = arith.subf %499, %501 : vector<32x24xf32>
    %cst_192 = arith.constant 1.000000e+00 : f32
    %503 = vector.broadcast %cst_192 : f32 to vector<32x24xf32>
    %504 = arith.cmpf ogt, %502, %503 : vector<32x24xf32>
    %505 = arith.extui %504 : vector<32x24xi1> to vector<32x24xi32>
    %506 = arith.sitofp %505 : vector<32x24xi32> to vector<32x24xf32>
    %c6_193 = arith.constant 6 : index
    %c0_194 = arith.constant 0 : index
    %c0_195 = arith.constant 0 : index
    %507 = vector.load %arg5[%c6_193, %c0_194, %c0_195] : memref<8x32x24xf32, #tpu.memory_space<vmem>>, vector<1x32x24xf32>
    %508 = vector.shape_cast %507 : vector<1x32x24xf32> to vector<32x24xf32>
    %509 = vector.shape_cast %506 : vector<32x24xf32> to vector<1x32x24xf32>
    tpu.vector_store %arg5[%c6_193, %c0_194, %c0_195], %509 {strides = array<i32>} : memref<8x32x24xf32, #tpu.memory_space<vmem>>, vector<1x32x24xf32>,
    %510 = tpu.concatenate %424, %489, %506 in 0 : vector<32x24xf32>, vector<32x24xf32>, vector<32x24xf32> -> vector<96x24xf32>
    %cst_196 = arith.constant dense<0.000000e+00> : vector<96x52xf32>
    %511 = tpu.matmul %510, %6, %cst_196 {dimension_numbers = #tpu.dot_dimension_numbers<[1], [0], [0], [1], [0, 0, 1, 1], [], []>} : vector<96x24xf32>, vector<24x52xf32>, vector<96x52xf32> -> vector<96x52xf32>
    %512 = vector.extract_strided_slice %511 {offsets = [32, 24], sizes = [32, 24], strides = [1, 1]} : vector<96x52xf32> to vector<32x24xf32>
    %513 = vector.extract_strided_slice %511 {offsets = [64, 48], sizes = [32, 4], strides = [1, 1]} : vector<96x52xf32> to vector<32x4xf32>
    %cst_197 = arith.constant 0.949999988 : f32
    %514 = vector.broadcast %cst_197 : f32 to vector<32x4xf32>
    %515 = arith.mulf %514, %469 : vector<32x4xf32>
    %516 = arith.addf %515, %513 : vector<32x4xf32>
    %c6_198 = arith.constant 6 : index
    %c0_199 = arith.constant 0 : index
    %c0_200 = arith.constant 0 : index
    %517 = vector.load %arg4[%c6_198, %c0_199, %c0_200] : memref<8x32x4xf32, #tpu.memory_space<vmem>>, vector<1x32x4xf32>
    %518 = vector.shape_cast %517 : vector<1x32x4xf32> to vector<32x4xf32>
    %519 = vector.shape_cast %516 : vector<32x4xf32> to vector<1x32x4xf32>
    tpu.vector_store %arg4[%c6_198, %c0_199, %c0_200], %519 {strides = array<i32>} : memref<8x32x4xf32, #tpu.memory_space<vmem>>, vector<1x32x4xf32>,
    %cst_201 = arith.constant 1.000000e+00 : f32
    %520 = vector.broadcast %cst_201 : f32 to vector<32x24xf32>
    %521 = arith.cmpf ogt, %502, %520 : vector<32x24xf32>
    %522 = arith.extui %521 : vector<32x24xi1> to vector<32x24xi32>
    %523 = arith.sitofp %522 : vector<32x24xi32> to vector<32x24xf32>
    %cst_202 = arith.constant 0.699999988 : f32
    %524 = vector.broadcast %cst_202 : f32 to vector<32x24xf32>
    %525 = arith.mulf %524, %496 : vector<32x24xf32>
    %526 = arith.addf %525, %512 : vector<32x24xf32>
    %cst_203 = arith.constant 5.000000e-01 : f32
    %527 = vector.broadcast %cst_203 : f32 to vector<32x24xf32>
    %528 = arith.mulf %527, %502 : vector<32x24xf32>
    %529 = arith.addf %528, %526 : vector<32x24xf32>
    %cst_204 = arith.constant 1.000000e+00 : f32
    %530 = vector.broadcast %cst_204 : f32 to vector<32x24xf32>
    %531 = arith.mulf %523, %530 : vector<32x24xf32>
    %532 = arith.subf %529, %531 : vector<32x24xf32>
    %cst_205 = arith.constant 1.000000e+00 : f32
    %533 = vector.broadcast %cst_205 : f32 to vector<32x24xf32>
    %534 = arith.cmpf ogt, %532, %533 : vector<32x24xf32>
    %535 = arith.extui %534 : vector<32x24xi1> to vector<32x24xi32>
    %536 = arith.sitofp %535 : vector<32x24xi32> to vector<32x24xf32>
    %c7_206 = arith.constant 7 : index
    %c0_207 = arith.constant 0 : index
    %c0_208 = arith.constant 0 : index
    %537 = vector.load %arg5[%c7_206, %c0_207, %c0_208] : memref<8x32x24xf32, #tpu.memory_space<vmem>>, vector<1x32x24xf32>
    %538 = vector.shape_cast %537 : vector<1x32x24xf32> to vector<32x24xf32>
    %539 = vector.shape_cast %536 : vector<32x24xf32> to vector<1x32x24xf32>
    tpu.vector_store %arg5[%c7_206, %c0_207, %c0_208], %539 {strides = array<i32>} : memref<8x32x24xf32, #tpu.memory_space<vmem>>, vector<1x32x24xf32>,
    %540 = tpu.concatenate %424, %489, %536 in 0 : vector<32x24xf32>, vector<32x24xf32>, vector<32x24xf32> -> vector<96x24xf32>
    %cst_209 = arith.constant dense<0.000000e+00> : vector<96x52xf32>
    %541 = tpu.matmul %540, %6, %cst_209 {dimension_numbers = #tpu.dot_dimension_numbers<[1], [0], [0], [1], [0, 0, 1, 1], [], []>} : vector<96x24xf32>, vector<24x52xf32>, vector<96x52xf32> -> vector<96x52xf32>
    %542 = vector.extract_strided_slice %541 {offsets = [64, 48], sizes = [32, 4], strides = [1, 1]} : vector<96x52xf32> to vector<32x4xf32>
    %cst_210 = arith.constant 0.949999988 : f32
    %543 = vector.broadcast %cst_210 : f32 to vector<32x4xf32>
    %544 = arith.mulf %543, %516 : vector<32x4xf32>
    %545 = arith.addf %544, %542 : vector<32x4xf32>
    %c7_211 = arith.constant 7 : index
    %c0_212 = arith.constant 0 : index
    %c0_213 = arith.constant 0 : index
    %546 = vector.load %arg4[%c7_211, %c0_212, %c0_213] : memref<8x32x4xf32, #tpu.memory_space<vmem>>, vector<1x32x4xf32>
    %547 = vector.shape_cast %546 : vector<1x32x4xf32> to vector<32x4xf32>
    %548 = vector.shape_cast %545 : vector<32x4xf32> to vector<1x32x4xf32>
    tpu.vector_store %arg4[%c7_211, %c0_212, %c0_213], %548 {strides = array<i32>} : memref<8x32x4xf32, #tpu.memory_space<vmem>>, vector<1x32x4xf32>,
    return
  }
  func.func @transform_0(%arg0: i32) -> (i32, i32, i32) {
    %c0_i32 = arith.constant 0 : i32
    %c0_i32_0 = arith.constant 0 : i32
    %c0_i32_1 = arith.constant 0 : i32
    return %c0_i32, %arg0, %c0_i32_0 : i32, i32, i32
  }
  func.func @transform_1(%arg0: i32) -> (i32, i32) {
    %c0_i32 = arith.constant 0 : i32
    %c0_i32_0 = arith.constant 0 : i32
    %c0_i32_1 = arith.constant 0 : i32
    return %c0_i32, %c0_i32_0 : i32, i32
  }
  func.func @transform_2(%arg0: i32) -> (i32, i32) {
    %c0_i32 = arith.constant 0 : i32
    %c0_i32_0 = arith.constant 0 : i32
    %c0_i32_1 = arith.constant 0 : i32
    return %c0_i32, %c0_i32_0 : i32, i32
  }
  func.func @transform_3(%arg0: i32) -> (i32, i32, i32) {
    %c0_i32 = arith.constant 0 : i32
    %c0_i32_0 = arith.constant 0 : i32
    %c0_i32_1 = arith.constant 0 : i32
    return %c0_i32, %arg0, %c0_i32_0 : i32, i32, i32
  }
  func.func @transform_4(%arg0: i32) -> (i32, i32, i32) {
    %c0_i32 = arith.constant 0 : i32
    %c0_i32_0 = arith.constant 0 : i32
    %c0_i32_1 = arith.constant 0 : i32
    return %c0_i32, %arg0, %c0_i32_0 : i32, i32, i32
  }
}

</mosaic_0001>

<bundles_post_ra>
// kernel: snnqut_forward.1
= control target key start
LH: loop header
LB: loop body
LE: loop exit
PB: predicated region body
PF: predicated region fallthrough
CT: control target
= control target key end

     0   :  { %vm50_vm0 = vcmask 130048   ;;  %vm260_vm1 = vcmask 195584   ;;  %v2601_v30 = vmov 0.0   ;;  %s2603_s10 = smov 80   ;;  %s3778_s1 = inlined_call_operand.vmem [shape: f32[16,24], index: 1, kind: input, shape index: {}]   ;;  %s3779_s0 = inlined_call_operand.vmem [shape: f32[8,32,16], index: 0, kind: input, shape index: {}]   ;;  %s3780_s2 = inlined_call_operand.vmem [shape: f32[24,52], index: 2, kind: input, shape index: {}]   ;;  %s3781_s4 = inlined_call_operand.vmem [shape: f32[8,32,24], index: 4, kind: output, shape index: {1}]   ;;  %s3782_s3 = inlined_call_operand.vmem [shape: f32[8,32,4], index: 3, kind: output, shape index: {0}]  }
   0x1   :  { %v49_v0 = vld [vmem:[%s3778_s1 + $0x8] sm:$0xff]  ;;  %v48_v1 = vld [vmem:[%s3778_s1] sm:$0xff]  ;;  %v18_v4 = vld [vmem:[%s3779_s0 + $0x10] sm:$0xff] }
   0x2   :  { %161 = vmatpush.msra.mxu0 %v49_v0  ;;  %v16_v2 = vld [vmem:[%s3779_s0] sm:$0xff]  ;;  %2542 = vmatpush.msra.mxu1 %v49_v0  ;;  %v17_v3 = vld [vmem:[%s3779_s0 + $0x8] sm:$0xff]  ;;  %v19_v5 = vld [vmem:[%s3779_s0 + $0x18] sm:$0xff] }
   0x3   :  { %2543 = vmatpush.msra.mxu2 %v49_v0  ;;  %2544 = vmatpush.msra.mxu3 %v49_v0  ;;  %v20_v6 = vld [vmem:[%s3779_s0 + $0x20] sm:$0xff]  ;;  %v21_v7 = vld [vmem:[%s3779_s0 + $0x28] sm:$0xff]  ;;  %v22_v8 = vld [vmem:[%s3779_s0 + $0x30] sm:$0xff] }
   0x4   :  { %162 = vmatpush.msra.mxu0 %v48_v1  ;;  %2545 = vmatpush.msra.mxu1 %v48_v1  ;;  %v23_v9 = vld [vmem:[%s3779_s0 + $0x38] sm:$0xff]  ;;  %v24_v10 = vld [vmem:[%s3779_s0 + $0x40] sm:$0xff]  ;;  %v25_v11 = vld [vmem:[%s3779_s0 + $0x48] sm:$0xff] }
   0x5   :  { %2250 = vmatmul.msk.f32.vlgmr.msra.gmra.mxu0 %vm50_vm0, %v16_v2  ;;  %2546 = vmatpush.msra.mxu2 %v48_v1  ;;  %v26_v12 = vld [vmem:[%s3779_s0 + $0x50] sm:$0xff]  ;;  %v27_v13 = vld [vmem:[%s3779_s0 + $0x58] sm:$0xff]  ;;  %v28_v15 = vld [vmem:[%s3779_s0 + $0x60] sm:$0xff] }
   0x6   :  { %2547 = vmatpush.msra.mxu3 %v48_v1  ;;  %v42_v14 = vld [vmem:[%s3779_s0 + $0xd0] sm:$0xff]  ;;  %v43_v16 = vld [vmem:[%s3779_s0 + $0xd8] sm:$0xff]  ;;  %v2707_v18 = vld [vmem:[%s3780_s2 + $0x8] sm:$0xff] }
   0x7   :  { %2276 = vmatmul.msk.f32.vlgmr.msra.gmra.mxu1 %vm50_vm0, %v42_v14  ;;  %v2698_v17 = vld [vmem:[%s3780_s2 + $0x10] sm:$0xff]  ;;  %v29_v19 = vld [vmem:[%s3779_s0 + $0x68] sm:$0xff]  ;;  %v2717_v20 = vld [vmem:[%s3780_s2] sm:$0xff] }
   0x8   :  { %355 = vmatpush.msrb.mxu1 %v2698_v17  ;;  %485 = vmatpush.msrb.mxu2 %v2698_v17  ;;  %v30_v21 = vld [vmem:[%s3779_s0 + $0x70] sm:$0xff]  ;;  %v31_v22 = vld [vmem:[%s3779_s0 + $0x78] sm:$0xff]  ;;  %v32_v24 = vld [vmem:[%s3779_s0 + $0x80] sm:$0xff] }
   0x9   :  { %679 = vmatpush.msrb.mxu3 %v2698_v17  ;;  %2181 = vmatpush.msrb.mxu0 %v2698_v17  ;;  %v44_v25 = vld [vmem:[%s3779_s0 + $0xe0] sm:$0xff]  ;;  %v33_v27 = vld [vmem:[%s3779_s0 + $0x88] sm:$0xff]  ;;  %v34_v33 = vld [vmem:[%s3779_s0 + $0x90] sm:$0xff] }
   0xa   :  { %356 = vmatpush.msrb.mxu1 %v2707_v18  ;;  %486 = vmatpush.msrb.mxu2 %v2707_v18  ;;  %v45_v29 = vld [vmem:[%s3779_s0 + $0xe8] sm:$0xff]  ;;  %v46_v36 = vld [vmem:[%s3779_s0 + $0xf0] sm:$0xff]  ;;  %v35_v38 = vld [vmem:[%s3779_s0 + $0x98] sm:$0xff] }
   0xb   :  { %680 = vmatpush.msrb.mxu3 %v2707_v18  ;;  %2182 = vmatpush.msrb.mxu0 %v2707_v18  ;;  %v47_v41 = vld [vmem:[%s3779_s0 + $0xf8] sm:$0xff]  ;;  %v36_v43 = vld [vmem:[%s3779_s0 + $0xa0] sm:$0xff]  ;;  %v37_v48 = vld [vmem:[%s3779_s0 + $0xa8] sm:$0xff] }
   0xc   :  { %357 = vmatpush.msrb.mxu1 %v2717_v20  ;;  %487 = vmatpush.msrb.mxu2 %v2717_v20  ;;  %v38_v57 = vld [vmem:[%s3779_s0 + $0xb0] sm:$0xff]  ;;  %v39_v2 = vld [vmem:[%s3779_s0 + $0xb8] sm:$0xff] }
   0xd   :  { %2251 = vmatmul.msk.f32.gmra.mxu0 %vm50_vm0, %v17_v3  ;;  %681 = vmatpush.msrb.mxu3 %v2717_v20 }
   0xe   :  { %911 = vmatpush.msra.mxu1 %v2698_v17  ;;  %2183 = vmatpush.msrb.mxu0 %v2717_v20 }
   0xf   :  { %2277 = vmatmul.msk.f32.gmra.mxu1 %vm50_vm0, %v43_v16  ;;  %2278 = vmatmul.msk.f32.vlgmr.msra.gmra.mxu2 %vm50_vm0, %v44_v25 }
  0x10   :  { %912 = vmatpush.msra.mxu1 %v2707_v18  ;;  %1147 = vmatpush.msra.mxu2 %v2698_v17 }
  0x11   :  { %2280 = vmatmul.msk.f32.vlgmr.msra.gmra.mxu3 %vm50_vm0, %v46_v36 }
  0x12   :  { %913 = vmatpush.msra.mxu1 %v2717_v20  ;;  %1148 = vmatpush.msra.mxu2 %v2707_v18 }
  0x13   :  { %1383 = vmatpush.msra.mxu3 %v2698_v17 }
  0x14   :  { %1149 = vmatpush.msra.mxu2 %v2717_v20 }
  0x15   :  { %2252 = vmatmul.msk.f32.gmra.mxu0 %vm50_vm0, %v18_v4  ;;  %1384 = vmatpush.msra.mxu3 %v2707_v18 }
  0x17   :  { %2279 = vmatmul.msk.f32.gmra.mxu2 %vm50_vm0, %v45_v29  ;;  %1385 = vmatpush.msra.mxu3 %v2717_v20 }
  0x19   :  { %2281 = vmatmul.msk.f32.gmra.mxu3 %vm50_vm0, %v47_v41 }
  0x1d   :  { %2253 = vmatmul.msk.f32.gmra.mxu0 %vm50_vm0, %v19_v5 }
  0x25   :  { %2254 = vmatmul.msk.f32.gmra.mxu0 %vm50_vm0, %v20_v6 }
  0x2d   :  { %2255 = vmatmul.msk.f32.gmra.mxu0 %vm50_vm0, %v21_v7 }
  0x35   :  { %2256 = vmatmul.msk.f32.gmra.mxu0 %vm50_vm0, %v22_v8 }
  0x3d   :  { %2257 = vmatmul.msk.f32.gmra.mxu0 %vm50_vm0, %v23_v9 }
  0x45   :  { %2258 = vmatmul.msk.f32.gmra.mxu0 %vm50_vm0, %v24_v10 }
  0x4d   :  { %2259 = vmatmul.msk.f32.gmra.mxu0 %vm50_vm0, %v25_v11  ;;  %v40_v11 = vld [vmem:[%s3779_s0 + $0xc0] sm:$0xff] }
  0x55   :  { %2260 = vmatmul.msk.f32.gmra.mxu0 %vm50_vm0, %v26_v12 }
  0x5d   :  { %2261 = vmatmul.msk.f32.gmra.mxu0 %vm50_vm0, %v27_v13 }
  0x65   :  { %2262 = vmatmul.msk.f32.gmra.mxu0 %vm50_vm0, %v28_v15 }
  0x6d   :  { %2263 = vmatmul.msk.f32.gmra.mxu0 %vm50_vm0, %v29_v19 }
  0x75   :  { %2264 = vmatmul.msk.f32.gmra.mxu0 %vm50_vm0, %v30_v21 }
  0x7d   :  { %2265 = vmatmul.msk.f32.gmra.mxu0 %vm50_vm0, %v31_v22 }
  0x82   :  { %v164_v23 = vpop.f32.mrf.mxu0 }
  0x83   :  { %261 = vst.msk [vmem:[#allocation2] sm:$0xff] %vm260_vm1, %v164_v23  ;;  %v41_v23 = vld [vmem:[%s3779_s0 + $0xc8] sm:$0xff]  ;;  %s2602_s0 = smov 104  }
  0x85   :  { %2266 = vmatmul.msk.f32.gmra.mxu0 %vm50_vm0, %v32_v24 }
  0x8a   :  { %v167_v26 = vpop.f32.mrf.mxu0  ;;  %v296_v28 = vld [vmem:[#allocation2] sm:$0xff] }
  0x8b   :  { %262 = vst.msk [vmem:[#allocation2 + $0x8] sm:$0xff] %vm260_vm1, %v167_v26  ;;  %vm315_vm2 = vcmp.gt.f32.partialorder %v296_v28, 1.0  ;;  %v392_v46 = vmul.f32 0.9, %v296_v28  ;;  %v400_v50 = vmul.f32 0.5, %v296_v28 }
  0x8c   :  { %v2282_v31 = vsel %vm315_vm2, 1.0, %v2601_v30 }
  0x8d   :  { %2267 = vmatmul.msk.f32.gmra.mxu0 %vm50_vm0, %v33_v27  ;;  %2286 = vmatmul.msk.f32.vlgmr.msrb.gmra.mxu1 %vm260_vm1, %v2282_v31 }
  0x8e   :  { %1619 = vmatpush.msrb.mxu1 %v2698_v17 }
  0x90   :  { %1620 = vmatpush.msrb.mxu1 %v2707_v18 }
  0x92   :  { %v170_v32 = vpop.f32.mrf.mxu0  ;;  %v297_v34 = vld [vmem:[#allocation2 + $0x8] sm:$0xff]  ;;  %1621 = vmatpush.msrb.mxu1 %v2717_v20 }
  0x93   :  { %263 = vst.msk [vmem:[#allocation2 + $0x10] sm:$0xff] %vm260_vm1, %v170_v32  ;;  %vm316_vm3 = vcmp.gt.f32.partialorder %v297_v34, 1.0  ;;  %v393_v54 = vmul.f32 0.9, %v297_v34  ;;  %v401_v59 = vmul.f32 0.5, %v297_v34 }
  0x94   :  { %v2283_v35 = vsel %vm316_vm3, 1.0, %v2601_v30 }
  0x95   :  { %2268 = vmatmul.msk.f32.gmra.mxu0 %vm50_vm0, %v34_v33  ;;  %2287 = vmatmul.msk.f32.gmra.mxu1 %vm260_vm1, %v2283_v35 }
  0x9a   :  { %v173_v37 = vpop.f32.mrf.mxu0  ;;  %v298_v39 = vld [vmem:[#allocation2 + $0x10] sm:$0xff] }
  0x9b   :  { %264 = vst.msk [vmem:[#allocation2 + $0x18] sm:$0xff] %vm260_vm1, %v173_v37  ;;  %vm317_vm4 = vcmp.gt.f32.partialorder %v298_v39, 1.0  ;;  %v394_v63 = vmul.f32 0.9, %v298_v39  ;;  %v402_v4 = vmul.f32 0.5, %v298_v39 }
  0x9c   :  { %v2284_v40 = vsel %vm317_vm4, 1.0, %v2601_v30 }
  0x9d   :  { %2269 = vmatmul.msk.f32.gmra.mxu0 %vm50_vm0, %v35_v38  ;;  %2288 = vmatmul.msk.f32.gmra.mxu1 %vm260_vm1, %v2284_v40 }
  0xa2   :  { %v176_v42 = vpop.f32.mrf.mxu0  ;;  %v299_v44 = vld [vmem:[#allocation2 + $0x18] sm:$0xff] }
  0xa3   :  { %265 = vst.msk [vmem:[#allocation2 + $0x20] sm:$0xff] %vm260_vm1, %v176_v42  ;;  %vm318_vm5 = vcmp.gt.f32.partialorder %v299_v44, 1.0  ;;  %v395_v8 = vmul.f32 0.9, %v299_v44  ;;  %v403_v13 = vmul.f32 0.5, %v299_v44  ;;  %v242_v42 = vpop.f32.mrf.mxu1 }
  0xa4   :  { %v2285_v45 = vsel %vm318_vm5, 1.0, %v2601_v30  ;;  %287 = vst.msk [vmem:[#allocation2 + $0xd0] sm:$0xff] %vm260_vm1, %v242_v42 }
  0xa5   :  { %2270 = vmatmul.msk.f32.gmra.mxu0 %vm50_vm0, %v36_v43  ;;  %2289 = vmatmul.msk.f32.gmra.mxu1 %vm260_vm1, %v2285_v45 }
  0xaa   :  { %v179_v47 = vpop.f32.mrf.mxu0  ;;  %v388_v49 = vld [vmem:[#allocation2 + $0x20] sm:$0xff] }
  0xab   :  { %266 = vst.msk [vmem:[#allocation2 + $0x28] sm:$0xff] %vm260_vm1, %v179_v47  ;;  %v396_v51 = vadd.f32 %v392_v46, %v388_v49 }
  0xad   :  { %2271 = vmatmul.msk.f32.gmra.mxu0 %vm50_vm0, %v37_v48  ;;  %370 = vmatmul.f32.gmra.mxu1 %v2601_v30  ;;  %v404_v52 = vadd.f32 %v400_v50, %v396_v51  ;;  %v526_v19 = vmul.f32 0.9, %v396_v51  ;;  %v245_v50 = vpop.f32.mrf.mxu1 }
  0xae   :  { %288 = vst.msk [vmem:[#allocation2 + $0xd8] sm:$0xff] %vm260_vm1, %v245_v50 }
  0xaf   :  { %v408_v53 = vsub.f32 %v404_v52, %v2282_v31 }
  0xb1   :  { %vm412_vm6 = vcmp.gt.f32.partialorder %v408_v53, 1.0  ;;  %v534_v25 = vmul.f32 0.5, %v408_v53 }
  0xb2   :  { %v182_v55 = vpop.f32.mrf.mxu0  ;;  %v2290_v56 = vsel %vm412_vm6, 1.0, %v2601_v30  ;;  %v389_v58 = vld [vmem:[#allocation2 + $0x28] sm:$0xff] }
  0xb3   :  { %267 = vst.msk [vmem:[#allocation2 + $0x30] sm:$0xff] %vm260_vm1, %v182_v55  ;;  %2298 = vmatmul.msk.f32.vlgmr.msrb.gmra.mxu2 %vm260_vm1, %v2290_v56  ;;  %v397_v60 = vadd.f32 %v393_v54, %v389_v58 }
  0xb4   :  { %1855 = vmatpush.msrb.mxu2 %v2698_v17 }
  0xb5   :  { %2272 = vmatmul.msk.f32.gmra.mxu0 %vm50_vm0, %v38_v57  ;;  %372 = vmatmul.f32.gmra.mxu1 %v2601_v30  ;;  %v405_v61 = vadd.f32 %v401_v59, %v397_v60  ;;  %v527_v29 = vmul.f32 0.9, %v397_v60 }
  0xb6   :  { %1856 = vmatpush.msrb.mxu2 %v2707_v18 }
  0xb7   :  { %v409_v62 = vsub.f32 %v405_v61, %v2283_v35 }
  0xb8   :  { %1857 = vmatpush.msrb.mxu2 %v2717_v20 }
  0xb9   :  { %vm413_vm7 = vcmp.gt.f32.partialorder %v409_v62, 1.0  ;;  %v535_v34 = vmul.f32 0.5, %v409_v62 }
  0xba   :  { %v185_v0 = vpop.f32.mrf.mxu0  ;;  %v2291_v1 = vsel %vm413_vm7, 1.0, %v2601_v30  ;;  %v390_v3 = vld [vmem:[#allocation2 + $0x30] sm:$0xff] }
  0xbb   :  { %268 = vst.msk [vmem:[#allocation2 + $0x38] sm:$0xff] %vm260_vm1, %v185_v0  ;;  %2299 = vmatmul.msk.f32.gmra.mxu2 %vm260_vm1, %v2291_v1  ;;  %v398_v5 = vadd.f32 %v394_v63, %v390_v3 }
  0xbd   :  { %2273 = vmatmul.msk.f32.gmra.mxu0 %vm50_vm0, %v39_v2  ;;  %374 = vmatmul.f32.gmra.mxu1 %v2601_v30  ;;  %v406_v6 = vadd.f32 %v402_v4, %v398_v5  ;;  %v528_v38 = vmul.f32 0.9, %v398_v5 }
  0xbf   :  { %v410_v7 = vsub.f32 %v406_v6, %v2284_v40 }
  0xc1   :  { %vm414_vm8 = vcmp.gt.f32.partialorder %v410_v7, 1.0  ;;  %v536_v43 = vmul.f32 0.5, %v410_v7 }
  0xc2   :  { %v188_v9 = vpop.f32.mrf.mxu0  ;;  %v2292_v10 = vsel %vm414_vm8, 1.0, %v2601_v30  ;;  %v391_v12 = vld [vmem:[#allocation2 + $0x38] sm:$0xff] }
  0xc3   :  { %269 = vst.msk [vmem:[#allocation2 + $0x40] sm:$0xff] %vm260_vm1, %v188_v9  ;;  %2300 = vmatmul.msk.f32.gmra.mxu2 %vm260_vm1, %v2292_v10  ;;  %v399_v14 = vadd.f32 %v395_v8, %v391_v12 }
  0xc5   :  { %2274 = vmatmul.msk.f32.gmra.mxu0 %vm50_vm0, %v40_v11  ;;  %376 = vmatmul.f32.gmra.mxu1 %v2601_v30  ;;  %v407_v15 = vadd.f32 %v403_v13, %v399_v14 }
  0xc7   :  { %v411_v16 = vsub.f32 %v407_v15, %v2285_v45 }
  0xc9   :  { %vm415_vm9 = vcmp.gt.f32.partialorder %v411_v16, 1.0  ;;  %v537_v48 = vmul.f32 0.5, %v411_v16 }
  0xca   :  { %v191_v21 = vpop.f32.mrf.mxu0  ;;  %v2293_v22 = vsel %vm415_vm9, 1.0, %v2601_v30  ;;  %v522_v24 = vld [vmem:[#allocation2 + $0x40] sm:$0xff] }
  0xcb   :  { %270 = vst.msk [vmem:[#allocation2 + $0x48] sm:$0xff] %vm260_vm1, %v191_v21  ;;  %2301 = vmatmul.msk.f32.gmra.mxu2 %vm260_vm1, %v2293_v22  ;;  %v530_v26 = vadd.f32 %v526_v19, %v522_v24 }
  0xcd   :  { %2275 = vmatmul.msk.f32.gmra.mxu0 %vm50_vm0, %v41_v23  ;;  %378 = vmatmul.f32.gmra.mxu1 %v2601_v30  ;;  %v538_v27 = vadd.f32 %v534_v25, %v530_v26  ;;  %v749_v53 = vmul.f32 0.9, %v530_v26  ;;  %v248_v23 = vpop.f32.mrf.mxu2 }
  0xce   :  { %289 = vst.msk [vmem:[#allocation2 + $0xe0] sm:$0xff] %vm260_vm1, %v248_v23 }
  0xcf   :  { %v542_v28 = vsub.f32 %v538_v27, %v2290_v56 }
  0xd1   :  { %vm546_vm10 = vcmp.gt.f32.partialorder %v542_v28, 1.0  ;;  %v757_v57 = vmul.f32 0.5, %v542_v28 }
  0xd2   :  { %v194_v31 = vpop.f32.mrf.mxu0  ;;  %v2306_v32 = vsel %vm546_vm10, 1.0, %v2601_v30  ;;  %v523_v33 = vld [vmem:[#allocation2 + $0x48] sm:$0xff] }
  0xd3   :  { %271 = vst.msk [vmem:[#allocation2 + $0x50] sm:$0xff] %vm260_vm1, %v194_v31  ;;  %2318 = vmatmul.msk.f32.vlgmr.msrb.gmra.mxu3 %vm260_vm1, %v2306_v32  ;;  %v531_v35 = vadd.f32 %v527_v29, %v523_v33 }
  0xd4   :  { %2042 = vmatpush.msrb.mxu3 %v2698_v17 }
  0xd5   :  { %380 = vmatmul.f32.gmra.mxu1 %v2601_v30  ;;  %v539_v36 = vadd.f32 %v535_v34, %v531_v35  ;;  %v750_v61 = vmul.f32 0.9, %v531_v35  ;;  %v251_v35 = vpop.f32.mrf.mxu2 }
  0xd6   :  { %2043 = vmatpush.msrb.mxu3 %v2707_v18  ;;  %290 = vst.msk [vmem:[#allocation2 + $0xe8] sm:$0xff] %vm260_vm1, %v251_v35 }
  0xd7   :  { %v543_v37 = vsub.f32 %v539_v36, %v2291_v1 }
  0xd8   :  { %2044 = vmatpush.msrb.mxu3 %v2717_v20  ;;  %v529_v20 = vmul.f32 0.9, %v399_v14 }
  0xd9   :  { %vm547_vm11 = vcmp.gt.f32.partialorder %v543_v37, 1.0  ;;  %v758_v1 = vmul.f32 0.5, %v543_v37 }
  0xda   :  { %v197_v39 = vpop.f32.mrf.mxu0  ;;  %v2307_v40 = vsel %vm547_vm11, 1.0, %v2601_v30  ;;  %v524_v41 = vld [vmem:[#allocation2 + $0x50] sm:$0xff] }
  0xdb   :  { %272 = vst.msk [vmem:[#allocation2 + $0x58] sm:$0xff] %vm260_vm1, %v197_v39  ;;  %2319 = vmatmul.msk.f32.gmra.mxu3 %vm260_vm1, %v2307_v40  ;;  %v532_v17 = vadd.f32 %v528_v38, %v524_v41 }
  0xdd   :  { %382 = vmatmul.f32.gmra.mxu1 %v2601_v30  ;;  %v540_v18 = vadd.f32 %v536_v43, %v532_v17  ;;  %v751_v5 = vmul.f32 0.9, %v532_v17 }
  0xdf   :  { %v544_v44 = vsub.f32 %v540_v18, %v2292_v10 }
  0xe1   :  { %vm548_vm12 = vcmp.gt.f32.partialorder %v544_v44, 1.0  ;;  %v759_v9 = vmul.f32 0.5, %v544_v44 }
  0xe2   :  { %v200_v45 = vpop.f32.mrf.mxu0  ;;  %v2308_v46 = vsel %vm548_vm12, 1.0, %v2601_v30  ;;  %v525_v47 = vld [vmem:[#allocation2 + $0x58] sm:$0xff] }
  0xe3   :  { %273 = vst.msk [vmem:[#allocation2 + $0x60] sm:$0xff] %vm260_vm1, %v200_v45  ;;  %2320 = vmatmul.msk.f32.gmra.mxu3 %vm260_vm1, %v2308_v46  ;;  %v533_v49 = vadd.f32 %v529_v20, %v525_v47 }
  0xe5   :  { %384 = vmatmul.f32.gmra.mxu1 %v2601_v30  ;;  %v541_v51 = vadd.f32 %v537_v48, %v533_v49  ;;  %v752_v13 = vmul.f32 0.9, %v533_v49  ;;  %v254_v48 = vpop.f32.mrf.mxu3 }
  0xe6   :  { %291 = vst.msk [vmem:[#allocation2 + $0xf0] sm:$0xff] %vm260_vm1, %v254_v48 }
  0xe7   :  { %v545_v52 = vsub.f32 %v541_v51, %v2293_v22 }
  0xe9   :  { %vm549_vm13 = vcmp.gt.f32.partialorder %v545_v52, 1.0  ;;  %v760_v19 = vmul.f32 0.5, %v545_v52 }
  0xea   :  { %v203_v54 = vpop.f32.mrf.mxu0  ;;  %v2309_v55 = vsel %vm549_vm13, 1.0, %v2601_v30  ;;  %v745_v56 = vld [vmem:[#allocation2 + $0x60] sm:$0xff] }
  0xeb   :  { %274 = vst.msk [vmem:[#allocation2 + $0x68] sm:$0xff] %vm260_vm1, %v203_v54  ;;  %2321 = vmatmul.msk.f32.gmra.mxu3 %vm260_vm1, %v2309_v55  ;;  %v753_v58 = vadd.f32 %v749_v53, %v745_v56 }
  0xed   :  { %v761_v59 = vadd.f32 %v757_v57, %v753_v58  ;;  %v985_v25 = vmul.f32 0.9, %v753_v58  ;;  %v257_v58 = vpop.f32.mrf.mxu3 }
  0xee   :  { %292 = vst.msk [vmem:[#allocation2 + $0xf8] sm:$0xff] %vm260_vm1, %v257_v58 }
  0xef   :  { %v765_v60 = vsub.f32 %v761_v59, %v2306_v32 }
  0xf1   :  { %vm769_vm14 = vcmp.gt.f32.partialorder %v765_v60, 1.0  ;;  %v993_v31 = vmul.f32 0.5, %v765_v60 }
  0xf2   :  { %v206_v62 = vpop.f32.mrf.mxu0  ;;  %v2330_v63 = vsel %vm769_vm14, 1.0, %v2601_v30  ;;  %v746_v0 = vld [vmem:[#allocation2 + $0x68] sm:$0xff] }
  0xf3   :  { %275 = vst.msk [vmem:[#allocation2 + $0x70] sm:$0xff] %vm260_vm1, %v206_v62  ;;  %2346 = vmatmul.msk.f32.vlgmr.msra.gmra.mxu1 %vm260_vm1, %v2330_v63  ;;  %v754_v2 = vadd.f32 %v750_v61, %v746_v0 }
  0xf5   :  { %v762_v3 = vadd.f32 %v758_v1, %v754_v2  ;;  %v986_v37 = vmul.f32 0.9, %v754_v2 }
  0xf7   :  { %v766_v4 = vsub.f32 %v762_v3, %v2307_v40 }
  0xf9   :  { %vm770_vm15 = vcmp.gt.f32.partialorder %v766_v4, 1.0  ;;  %v994_v41 = vmul.f32 0.5, %v766_v4 }
  0xfa   :  { %v209_v6 = vpop.f32.mrf.mxu0  ;;  %v2331_v7 = vsel %vm770_vm15, 1.0, %v2601_v30  ;;  %v747_v8 = vld [vmem:[#allocation2 + $0x70] sm:$0xff] }
  0xfb   :  { %276 = vst.msk [vmem:[#allocation2 + $0x78] sm:$0xff] %vm260_vm1, %v209_v6  ;;  %2347 = vmatmul.msk.f32.gmra.mxu1 %vm260_vm1, %v2331_v7  ;;  %v755_v10 = vadd.f32 %v751_v5, %v747_v8 }
  0xfd   :  { %v763_v11 = vadd.f32 %v759_v9, %v755_v10  ;;  %v987_v44 = vmul.f32 0.9, %v755_v10 }
  0xff   :  { %v767_v12 = vsub.f32 %v763_v11, %v2308_v46 }
 0x101   :  { %vm771_vm0 = vcmp.gt.f32.partialorder %v767_v12, 1.0  ;;  %v995_v47 = vmul.f32 0.5, %v767_v12 }
 0x102   :  { %v212_v14 = vpop.f32.mrf.mxu0  ;;  %v2332_v15 = vsel %vm771_vm0, 1.0, %v2601_v30  ;;  %v748_v16 = vld [vmem:[#allocation2 + $0x78] sm:$0xff] }
 0x103   :  { %277 = vst.msk [vmem:[#allocation2 + $0x80] sm:$0xff] %vm260_vm1, %v212_v14  ;;  %2348 = vmatmul.msk.f32.gmra.mxu1 %vm260_vm1, %v2332_v15  ;;  %v756_v21 = vadd.f32 %v752_v13, %v748_v16 }
 0x105   :  { %v764_v22 = vadd.f32 %v760_v19, %v756_v21  ;;  %v988_v53 = vmul.f32 0.9, %v756_v21 }
 0x107   :  { %v768_v24 = vsub.f32 %v764_v22, %v2309_v55 }
 0x109   :  { %vm772_vm2 = vcmp.gt.f32.partialorder %v768_v24, 1.0  ;;  %v996_v57 = vmul.f32 0.5, %v768_v24 }
 0x10a   :  { %v215_v26 = vpop.f32.mrf.mxu0  ;;  %v2866_v27 = vpop.f32.mrf.mxu1  ;;  %v2333_v28 = vsel %vm772_vm2, 1.0, %v2601_v30  ;;  %v981_v29 = vld [vmem:[#allocation2 + $0x80] sm:$0xff] }
 0x10b   :  { %278 = vst.msk [vmem:[#allocation2 + $0x88] sm:$0xff] %vm260_vm1, %v215_v26  ;;  %2349 = vmatmul.msk.f32.gmra.mxu1 %vm260_vm1, %v2333_v28  ;;  %vm436_vm3 = vcmp.gt.f32.partialorder %v2866_v27, 1.0  ;;  %v989_v32 = vadd.f32 %v985_v25, %v981_v29  ;;  %v558_v14 = vmul.f32 0.8, %v2866_v27  ;;  %v566_v22 = vmul.f32 0.5, %v2866_v27 }
 0x10c   :  { %v2873_v33 = vsel %vm436_vm3, 1.0, %v2601_v30 }
 0x10d   :  { %2302 = vmatmul.msk.f32.gmra.mxu2 %vm260_vm1, %v2873_v33  ;;  %v997_v34 = vadd.f32 %v993_v31, %v989_v32 }
 0x10f   :  { %v1001_v36 = vsub.f32 %v997_v34, %v2330_v63  ;;  %v1221_v63 = vmul.f32 0.9, %v989_v32 }
 0x111   :  { %vm1005_vm7 = vcmp.gt.f32.partialorder %v1001_v36, 1.0  ;;  %v1229_v4 = vmul.f32 0.5, %v1001_v36  ;;  %v1455_v36 = vld [vmem:[#allocation2 + $0xd0] sm:$0xff] }
 0x112   :  { %v218_v38 = vpop.f32.mrf.mxu0  ;;  %v2878_v39 = vpop.f32.mrf.mxu1  ;;  %v982_v40 = vld [vmem:[#allocation2 + $0x88] sm:$0xff]  ;;  %v2915_v6 = vsel %vm1005_vm7, 1.0, %v2601_v30 }
 0x113   :  { %279 = vst.msk [vmem:[#allocation2 + $0x90] sm:$0xff] %vm260_vm1, %v218_v38  ;;  %vm437_vm4 = vcmp.gt.f32.partialorder %v2878_v39, 1.0  ;;  %v990_v42 = vadd.f32 %v986_v37, %v982_v40  ;;  %v559_v27 = vmul.f32 0.8, %v2878_v39 }
 0x114   :  { %v2883_v43 = vsel %vm437_vm4, 1.0, %v2601_v30 }
 0x115   :  { %2303 = vmatmul.msk.f32.gmra.mxu2 %vm260_vm1, %v2883_v43  ;;  %v998_v17 = vadd.f32 %v994_v41, %v990_v42  ;;  %v1222_v8 = vmul.f32 0.9, %v990_v42  ;;  %v567_v42 = vmul.f32 0.5, %v2878_v39 }
 0x117   :  { %v1002_v18 = vsub.f32 %v998_v17, %v2331_v7 }
 0x119   :  { %vm1006_vm8 = vcmp.gt.f32.partialorder %v1002_v18, 1.0  ;;  %v1230_v13 = vmul.f32 0.5, %v1002_v18 }
 0x11a   :  { %v221_v20 = vpop.f32.mrf.mxu0  ;;  %v2887_v45 = vpop.f32.mrf.mxu1  ;;  %v983_v46 = vld [vmem:[#allocation2 + $0x90] sm:$0xff]  ;;  %v2927_v19 = vsel %vm1006_vm8, 1.0, %v2601_v30 }
 0x11b   :  { %280 = vst.msk [vmem:[#allocation2 + $0x98] sm:$0xff] %vm260_vm1, %v221_v20  ;;  %vm438_vm5 = vcmp.gt.f32.partialorder %v2887_v45, 1.0  ;;  %v991_v49 = vadd.f32 %v987_v44, %v983_v46 }
 0x11c   :  { %v2892_v50 = vsel %vm438_vm5, 1.0, %v2601_v30 }
 0x11d   :  { %2304 = vmatmul.msk.f32.gmra.mxu2 %vm260_vm1, %v2892_v50  ;;  %v999_v51 = vadd.f32 %v995_v47, %v991_v49  ;;  %v1223_v25 = vmul.f32 0.9, %v991_v49 }
 0x11f   :  { %v1003_v52 = vsub.f32 %v999_v51, %v2332_v15 }
 0x121   :  { %vm1007_vm9 = vcmp.gt.f32.partialorder %v1003_v52, 1.0  ;;  %v1231_v34 = vmul.f32 0.5, %v1003_v52 }
 0x122   :  { %v224_v54 = vpop.f32.mrf.mxu0  ;;  %v2897_v55 = vpop.f32.mrf.mxu1  ;;  %v984_v56 = vld [vmem:[#allocation2 + $0x98] sm:$0xff]  ;;  %v2947_v41 = vsel %vm1007_vm9, 1.0, %v2601_v30 }
 0x123   :  { %281 = vst.msk [vmem:[#allocation2 + $0xa0] sm:$0xff] %vm260_vm1, %v224_v54  ;;  %vm439_vm6 = vcmp.gt.f32.partialorder %v2897_v55, 1.0  ;;  %v992_v59 = vadd.f32 %v988_v53, %v984_v56 }
 0x124   :  { %v2902_v60 = vsel %vm439_vm6, 1.0, %v2601_v30 }
 0x125   :  { %2305 = vmatmul.msk.f32.gmra.mxu2 %vm260_vm1, %v2902_v60  ;;  %v1000_v61 = vadd.f32 %v996_v57, %v992_v59  ;;  %v1224_v46 = vmul.f32 0.9, %v992_v59  ;;  %v560_v57 = vmul.f32 0.8, %v2887_v45 }
 0x127   :  { %v2907_v62 = vsub.f32 %v1000_v61, %v2333_v28  ;;  %v1691_v61 = vld [vmem:[#allocation2 + $0xf0] sm:$0xff] }
 0x129   :  { %vm1008_vm12 = vcmp.gt.f32.partialorder %v2907_v62, 1.0  ;;  %v1232_v53 = vmul.f32 0.5, %v2907_v62 }
 0x12a   :  { %v227_v0 = vpop.f32.mrf.mxu0  ;;  %v371_v1 = vpop.f32.mrf.mxu1  ;;  %v1217_v2 = vld [vmem:[#allocation2 + $0xa0] sm:$0xff] }
 0x12b   :  { %282 = vst.msk [vmem:[#allocation2 + $0xa8] sm:$0xff] %vm260_vm1, %v227_v0  ;;  %v2910_v3 = vadd.f32 %v1221_v63, %v1217_v2  ;;  %v2977_v1 = vsel %vm1008_vm12, 1.0, %v2601_v30 }
 0x12d   :  { %512 = vmatmul.f32.gmra.mxu2 %v2601_v30  ;;  %v1233_v5 = vadd.f32 %v1229_v4, %v2910_v3  ;;  %v1457_v62 = vmul.f32 0.9, %v2910_v3  ;;  %v561_v3 = vmul.f32 0.8, %v2897_v55 }
 0x12f   :  { %v2918_v7 = vsub.f32 %v1233_v5, %v2915_v6  ;;  %v568_v5 = vmul.f32 0.5, %v2887_v45 }
 0x131   :  { %vm1241_vm15 = vcmp.gt.f32.partialorder %v2918_v7, 1.0 }
 0x132   :  { %v230_v9 = vpop.f32.mrf.mxu0  ;;  %v373_v10 = vpop.f32.mrf.mxu1  ;;  %v1218_v11 = vld [vmem:[#allocation2 + $0xa8] sm:$0xff] }
 0x133   :  { %283 = vst.msk [vmem:[#allocation2 + $0xb0] sm:$0xff] %vm260_vm1, %v230_v9  ;;  %v2921_v12 = vadd.f32 %v1222_v8, %v1218_v11 }
 0x135   :  { %514 = vmatmul.f32.gmra.mxu2 %v2601_v30  ;;  %v1234_v15 = vadd.f32 %v1230_v13, %v2921_v12 }
 0x136   :  { %v489_v16 = vpop.f32.mrf.mxu2 }
 0x137   :  { %v2929_v21 = vadd.f32 %v558_v14, %v489_v16  ;;  %v2933_v23 = vsub.f32 %v1234_v15, %v2927_v19 }
 0x139   :  { %v570_v24 = vadd.f32 %v566_v22, %v2929_v21  ;;  %vm1242_vm3 = vcmp.gt.f32.partialorder %v2933_v23, 1.0 }
 0x13a   :  { %v233_v26 = vpop.f32.mrf.mxu0  ;;  %v375_v28 = vpop.f32.mrf.mxu1  ;;  %v1219_v29 = vld [vmem:[#allocation2 + $0xb0] sm:$0xff] }
 0x13b   :  { %284 = vst.msk [vmem:[#allocation2 + $0xb8] sm:$0xff] %vm260_vm1, %v233_v26  ;;  %v2938_v31 = vsub.f32 %v570_v24, %v2873_v33  ;;  %v1227_v32 = vadd.f32 %v1223_v25, %v1219_v29  ;;  %v1465_v25 = vmul.f32 0.5, %v2918_v7  ;;  %v1689_v7 = vld [vmem:[#allocation2 + $0xe0] sm:$0xff] }
 0x13d   :  { %516 = vmatmul.f32.gmra.mxu2 %v2601_v30  ;;  %vm578_vm10 = vcmp.gt.f32.partialorder %v2938_v31, 1.0  ;;  %v1235_v35 = vadd.f32 %v1231_v34, %v1227_v32  ;;  %v1459_v37 = vmul.f32 0.9, %v1227_v32 }
 0x13e   :  { %v492_v38 = vpop.f32.mrf.mxu2  ;;  %v2944_v40 = vsel %vm578_vm10, 1.0, %v2601_v30 }
 0x13f   :  { %v2949_v33 = vadd.f32 %v559_v27, %v492_v38  ;;  %2322 = vmatmul.msk.f32.gmra.mxu3 %vm260_vm1, %v2944_v40  ;;  %v1239_v17 = vsub.f32 %v1235_v35, %v2947_v41  ;;  %v1463_v18 = vadd.f32 %v1459_v37, %v1455_v36  ;;  %v1692_v36 = vld [vmem:[#allocation2 + $0xf8] sm:$0xff] }
 0x141   :  { %v571_v44 = vadd.f32 %v567_v42, %v2949_v33  ;;  %vm1243_vm11 = vcmp.gt.f32.partialorder %v1239_v17, 1.0  ;;  %v1467_v20 = vmul.f32 0.5, %v1239_v17  ;;  %v1695_v56 = vmul.f32 0.9, %v1463_v18 }
 0x142   :  { %v236_v47 = vpop.f32.mrf.mxu0  ;;  %v377_v48 = vpop.f32.mrf.mxu1  ;;  %v1220_v49 = vld [vmem:[#allocation2 + $0xb8] sm:$0xff]  ;;  %v2963_v54 = vsel %vm1243_vm11, 1.0, %v2601_v30  ;;  %v569_v17 = vmul.f32 0.5, %v2897_v55 }
 0x143   :  { %285 = vst.msk [vmem:[#allocation2 + $0xc0] sm:$0xff] %vm260_vm1, %v236_v47  ;;  %v2959_v39 = vsub.f32 %v571_v44, %v2883_v43  ;;  %v1471_v51 = vadd.f32 %v1467_v20, %v1463_v18  ;;  %v1228_v52 = vadd.f32 %v1224_v46, %v1220_v49  ;;  %v1456_v43 = vld [vmem:[#allocation2 + $0xd8] sm:$0xff]  ;;  %v1699_v11 = vadd.f32 %v1695_v56, %v1691_v61 }
 0x144   :  { %v1458_v44 = vmul.f32 0.9, %v2921_v12 }
 0x145   :  { %518 = vmatmul.f32.gmra.mxu2 %v2601_v30  ;;  %vm579_vm13 = vcmp.gt.f32.partialorder %v2959_v39, 1.0  ;;  %v2969_v58 = vsub.f32 %v1471_v51, %v2963_v54  ;;  %v1236_v59 = vadd.f32 %v1232_v53, %v1228_v52  ;;  %v1460_v2 = vmul.f32 0.9, %v1228_v52 }
 0x146   :  { %v495_v63 = vpop.f32.mrf.mxu2  ;;  %v2972_v0 = vsel %vm579_vm13, 1.0, %v2601_v30  ;;  %v1466_v53 = vmul.f32 0.5, %v2933_v23  ;;  %v3039_v23 = vsel %vm1242_vm3, 1.0, %v2601_v30 }
 0x147   :  { %v2979_v4 = vadd.f32 %v560_v57, %v495_v63  ;;  %2323 = vmatmul.msk.f32.gmra.mxu3 %vm260_vm1, %v2972_v0  ;;  %v1703_v8 = vmul.f32 0.5, %v2969_v58  ;;  %v1240_v9 = vsub.f32 %v1236_v59, %v2977_v1  ;;  %v1464_v10 = vadd.f32 %v1460_v2, %v1456_v43 }
 0x148   :  { %v781_v57 = vmul.f32 0.8, %v2929_v21  ;;  %vm1479_vm8 = vcmp.gt.f32.partialorder %v2969_v58, 1.0 }
 0x149   :  { %v572_v13 = vadd.f32 %v568_v5, %v2979_v4  ;;  %vm1244_vm14 = vcmp.gt.f32.partialorder %v1240_v9, 1.0  ;;  %v1468_v14 = vmul.f32 0.5, %v1240_v9  ;;  %v2989_v22 = vadd.f32 %v1703_v8, %v1699_v11  ;;  %v1690_v9 = vld [vmem:[#allocation2 + $0xe8] sm:$0xff] }
 0x14a   :  { %v239_v15 = vpop.f32.mrf.mxu0  ;;  %v1453_v16 = vld [vmem:[#allocation2 + $0xc0] sm:$0xff]  ;;  %v379_v45 = vpop.f32.mrf.mxu1  ;;  %v2998_v29 = vsel %vm1244_vm14, 1.0, %v2601_v30  ;;  %v1696_v32 = vmul.f32 0.9, %v1464_v10  ;;  %v789_v8 = vmul.f32 0.5, %v2938_v31 }
 0x14b   :  { %286 = vst.msk [vmem:[#allocation2 + $0xc8] sm:$0xff] %vm260_vm1, %v239_v15  ;;  %v1461_v24 = vadd.f32 %v1457_v62, %v1453_v16  ;;  %v2994_v26 = vsub.f32 %v572_v13, %v2892_v50  ;;  %v1472_v28 = vadd.f32 %v1468_v14, %v1464_v10  ;;  %v3009_v50 = vsel %vm1241_vm15, 1.0, %v2601_v30 }
 0x14c   :  { %v1700_v20 = vadd.f32 %v1696_v32, %v1692_v36  ;;  %v782_v16 = vmul.f32 0.8, %v2949_v33 }
 0x14d   :  { %2378 = vmatmul.msk.f32.vlgmr.msra.gmra.mxu2 %vm260_vm1, %v2915_v6  ;;  %v1469_v34 = vadd.f32 %v1465_v25, %v1461_v24  ;;  %vm580_vm0 = vcmp.gt.f32.partialorder %v2994_v26, 1.0  ;;  %v1693_v27 = vmul.f32 0.9, %v1461_v24  ;;  %v3004_v35 = vsub.f32 %v1472_v28, %v2998_v29 }
 0x14e   :  { %v498_v37 = vpop.f32.mrf.mxu2  ;;  %v3012_v38 = vsel %vm580_vm0, 1.0, %v2601_v30 }
 0x14f   :  { %v1473_v42 = vsub.f32 %v1469_v34, %v3009_v50  ;;  %v3015_v6 = vadd.f32 %v561_v3, %v498_v37  ;;  %2324 = vmatmul.msk.f32.gmra.mxu3 %vm260_vm1, %v3012_v38  ;;  %v1704_v18 = vmul.f32 0.5, %v3004_v35  ;;  %v1697_v47 = vadd.f32 %v1693_v27, %v1689_v7 }
 0x150   :  { %vm1480_vm12 = vcmp.gt.f32.partialorder %v3004_v35, 1.0 }
 0x151   :  { %v573_v46 = vadd.f32 %v569_v17, %v3015_v6  ;;  %vm1477_vm2 = vcmp.gt.f32.partialorder %v1473_v42, 1.0  ;;  %v1701_v48 = vmul.f32 0.5, %v1473_v42  ;;  %v3024_v52 = vadd.f32 %v1704_v18, %v1700_v20 }
 0x152   :  { %v1454_v49 = vld [vmem:[#allocation2 + $0xc8] sm:$0xff]  ;;  %v381_v51 = vpop.f32.mrf.mxu1  ;;  %v3032_v59 = vsel %vm1477_vm2, 1.0, %v2601_v30  ;;  %v791_v42 = vmul.f32 0.5, %v2994_v26  ;;  %v784_v17 = vmul.f32 0.8, %v3015_v6 }
 0x153   :  { %v1462_v55 = vadd.f32 %v1458_v44, %v1454_v49  ;;  %v3028_v56 = vsub.f32 %v573_v46, %v2902_v60  ;;  %v1705_v12 = vadd.f32 %v1701_v48, %v1697_v47 }
 0x155   :  { %2379 = vmatmul.msk.f32.gmra.mxu2 %vm260_vm1, %v2927_v19  ;;  %v1470_v43 = vadd.f32 %v1466_v53, %v1462_v55  ;;  %v1694_v61 = vmul.f32 0.9, %v1462_v55  ;;  %vm581_vm4 = vcmp.gt.f32.partialorder %v3028_v56, 1.0  ;;  %v1709_v63 = vsub.f32 %v1705_v12, %v3032_v59 }
 0x156   :  { %v683_v60 = vpop.f32.mrf.mxu3  ;;  %v3042_v2 = vsel %vm581_vm4, 1.0, %v2601_v30  ;;  %v792_v7 = vmul.f32 0.5, %v3028_v56 }
 0x157   :  { %v1474_v21 = vsub.f32 %v1470_v43, %v3039_v23  ;;  %v785_v5 = vadd.f32 %v781_v57, %v683_v60  ;;  %2325 = vmatmul.msk.f32.gmra.mxu3 %vm260_vm1, %v3042_v2  ;;  %vm1713_vm5 = vcmp.gt.f32.partialorder %v1709_v63, 1.0  ;;  %v1698_v13 = vadd.f32 %v1694_v61, %v1690_v9 }
 0x158   :  { %v3049_v19 = vsel %vm1713_vm5, 1.0, %v2601_v30 }
 0x159   :  { %v1702_v10 = vmul.f32 0.5, %v1474_v21  ;;  %v793_v11 = vadd.f32 %v789_v8, %v785_v5  ;;  %2526 = vmatmul.msk.f32.vlgmr.msrb.gmra.mxu0 %vm260_vm1, %v3049_v19  ;;  %vm1478_vm6 = vcmp.gt.f32.partialorder %v1474_v21, 1.0  ;;  %v1017_v20 = vmul.f32 0.8, %v785_v5 }
 0x15a   :  { %v383_v62 = vpop.f32.mrf.mxu1  ;;  %v3055_v31 = vsel %vm1478_vm6, 1.0, %v2601_v30 }
 0x15b   :  { %v797_v14 = vsub.f32 %v793_v11, %v2944_v40  ;;  %v1706_v15 = vadd.f32 %v1702_v10, %v1698_v13  ;;  %v790_v40 = vmul.f32 0.5, %v2959_v39  ;;  %v783_v39 = vmul.f32 0.8, %v2979_v4 }
 0x15d   :  { %2380 = vmatmul.msk.f32.gmra.mxu2 %vm260_vm1, %v2947_v41  ;;  %vm801_vm7 = vcmp.gt.f32.partialorder %v797_v14, 1.0  ;;  %v1710_v45 = vsub.f32 %v1706_v15, %v3055_v31  ;;  %v3069_v41 = vsel %vm1479_vm8, 1.0, %v2601_v30 }
 0x15e   :  { %v686_v24 = vpop.f32.mrf.mxu3  ;;  %v2334_v25 = vsel %vm801_vm7, 1.0, %v2601_v30  ;;  %v1711_v58 = vsub.f32 %v2989_v22, %v3069_v41 }
 0x15f   :  { %v786_v28 = vadd.f32 %v782_v16, %v686_v24  ;;  %2350 = vmatmul.msk.f32.gmra.mxu1 %vm260_vm1, %v2334_v25  ;;  %vm1714_vm9 = vcmp.gt.f32.partialorder %v1710_v45, 1.0 }
 0x160   :  { %v3066_v3 = vsel %vm1714_vm9, 1.0, %v2601_v30  ;;  %vm1715_vm11 = vcmp.gt.f32.partialorder %v1711_v58, 1.0 }
 0x161   :  { %v794_v33 = vadd.f32 %v790_v40, %v786_v28  ;;  %2527 = vmatmul.msk.f32.gmra.mxu0 %vm260_vm1, %v3066_v3  ;;  %v3084_v22 = vsel %vm1715_vm11, 1.0, %v2601_v30  ;;  %v1018_v53 = vmul.f32 0.8, %v786_v28 }
 0x162   :  { %v385_v32 = vpop.f32.mrf.mxu1 }
 0x163   :  { %v798_v34 = vsub.f32 %v794_v33, %v2972_v0  ;;  %v3087_v0 = vsel %vm1480_vm12, 1.0, %v2601_v30 }
 0x164   :  { %v1712_v4 = vsub.f32 %v3024_v52, %v3087_v0 }
 0x165   :  { %2381 = vmatmul.msk.f32.gmra.mxu2 %vm260_vm1, %v2977_v1  ;;  %vm802_vm10 = vcmp.gt.f32.partialorder %v798_v34, 1.0  ;;  %v1026_v43 = vmul.f32 0.5, %v798_v34 }
 0x166   :  { %v689_v27 = vpop.f32.mrf.mxu3  ;;  %v2335_v36 = vsel %vm802_vm10, 1.0, %v2601_v30  ;;  %vm1716_vm14 = vcmp.gt.f32.partialorder %v1712_v4, 1.0 }
 0x167   :  { %v787_v37 = vadd.f32 %v783_v39, %v689_v27  ;;  %2351 = vmatmul.msk.f32.gmra.mxu1 %vm260_vm1, %v2335_v36  ;;  %v3099_v47 = vsel %vm1716_vm14, 1.0, %v2601_v30 }
 0x169   :  { %v795_v1 = vadd.f32 %v791_v42, %v787_v37  ;;  %2528 = vmatmul.msk.f32.gmra.mxu0 %vm260_vm1, %v3084_v22  ;;  %v1019_v60 = vmul.f32 0.8, %v787_v37 }
 0x16b   :  { %v799_v35 = vsub.f32 %v795_v1, %v3012_v38  ;;  %v1025_v38 = vmul.f32 0.5, %v797_v14 }
 0x16d   :  { %vm803_vm13 = vcmp.gt.f32.partialorder %v799_v35, 1.0  ;;  %v1027_v8 = vmul.f32 0.5, %v799_v35 }
 0x16e   :  { %v692_v26 = vpop.f32.mrf.mxu3  ;;  %v2336_v18 = vsel %vm803_vm13, 1.0, %v2601_v30 }
 0x16f   :  { %v788_v44 = vadd.f32 %v784_v17, %v692_v26  ;;  %2352 = vmatmul.msk.f32.gmra.mxu1 %vm260_vm1, %v2336_v18 }
 0x170   :  { %v915_v46 = vpop.f32.mrf.mxu1 }
 0x171   :  { %v796_v48 = vadd.f32 %v792_v7, %v788_v44  ;;  %v1021_v49 = vadd.f32 %v1017_v20, %v915_v46  ;;  %2529 = vmatmul.msk.f32.gmra.mxu0 %vm260_vm1, %v3099_v47  ;;  %v1020_v11 = vmul.f32 0.8, %v788_v44 }
 0x173   :  { %v1029_v6 = vadd.f32 %v1025_v38, %v1021_v49  ;;  %v800_v51 = vsub.f32 %v796_v48, %v3042_v2  ;;  %v1253_v44 = vmul.f32 0.8, %v1021_v49 }
 0x175   :  { %v1033_v52 = vsub.f32 %v1029_v6, %v2334_v25  ;;  %vm804_vm15 = vcmp.gt.f32.partialorder %v800_v51, 1.0  ;;  %v1028_v15 = vmul.f32 0.5, %v800_v51 }
 0x176   :  { %v2337_v55 = vsel %vm804_vm15, 1.0, %v2601_v30 }
 0x177   :  { %2353 = vmatmul.msk.f32.gmra.mxu1 %vm260_vm1, %v2337_v55  ;;  %vm1037_vm0 = vcmp.gt.f32.partialorder %v1033_v52, 1.0  ;;  %v1261_v48 = vmul.f32 0.5, %v1033_v52 }
 0x178   :  { %v918_v56 = vpop.f32.mrf.mxu1  ;;  %v3107_v12 = vsel %vm1037_vm0, 1.0, %v2601_v30 }
 0x179   :  { %v1022_v57 = vadd.f32 %v1018_v53, %v918_v56  ;;  %2382 = vmatmul.msk.f32.gmra.mxu2 %vm260_vm1, %v3107_v12 }
 0x17b   :  { %v1030_v61 = vadd.f32 %v1026_v43, %v1022_v57 }
 0x17d   :  { %v1034_v63 = vsub.f32 %v1030_v61, %v2335_v36 }
 0x17f   :  { %vm1038_vm2 = vcmp.gt.f32.partialorder %v1034_v63, 1.0  ;;  %v1262_v61 = vmul.f32 0.5, %v1034_v63 }
 0x180   :  { %v921_v2 = vpop.f32.mrf.mxu1  ;;  %v3112_v21 = vsel %vm1038_vm2, 1.0, %v2601_v30 }
 0x181   :  { %v3114_v5 = vadd.f32 %v1019_v60, %v921_v2  ;;  %2383 = vmatmul.msk.f32.gmra.mxu2 %vm260_vm1, %v3112_v21 }
 0x183   :  { %v1031_v9 = vadd.f32 %v1027_v8, %v3114_v5 }
 0x185   :  { %v3119_v10 = vsub.f32 %v1031_v9, %v2336_v18 }
 0x187   :  { %vm1039_vm3 = vcmp.gt.f32.partialorder %v3119_v10, 1.0  ;;  %v1263_v63 = vmul.f32 0.5, %v3119_v10 }
 0x188   :  { %v924_v13 = vpop.f32.mrf.mxu1  ;;  %v3123_v62 = vsel %vm1039_vm3, 1.0, %v2601_v30 }
 0x189   :  { %v3125_v14 = vadd.f32 %v1020_v11, %v924_v13  ;;  %2384 = vmatmul.msk.f32.gmra.mxu2 %vm260_vm1, %v3123_v62 }
 0x18b   :  { %v1032_v16 = vadd.f32 %v1028_v15, %v3125_v14 }
 0x18d   :  { %v3130_v45 = vsub.f32 %v1032_v16, %v2337_v55  ;;  %v1254_v55 = vmul.f32 0.8, %v1022_v57 }
 0x18f   :  { %vm1040_vm4 = vcmp.gt.f32.partialorder %v3130_v45, 1.0 }
 0x190   :  { %v501_v24 = vpop.f32.mrf.mxu2  ;;  %v3134_v25 = vsel %vm1040_vm4, 1.0, %v2601_v30 }
 0x191   :  { %2385 = vmatmul.msk.f32.gmra.mxu2 %vm260_vm1, %v3134_v25  ;;  %vm602_vm5 = vcmp.gt.f32.partialorder %v501_v24, 1.0  ;;  %v813_v27 = vmul.f32 0.7, %v501_v24  ;;  %v821_v42 = vmul.f32 0.5, %v501_v24  ;;  %v1255_v24 = vmul.f32 0.8, %v3114_v5 }
 0x192   :  { %v2314_v28 = vsel %vm602_vm5, 1.0, %v2601_v30 }
 0x193   :  { %618 = vrot.lane.b32.xlu0 %v2314_v28, %s2602_s0 }
 0x198   :  { %v504_v40 = vpop.f32.mrf.mxu2 }
 0x199   :  { %vm603_vm6 = vcmp.gt.f32.partialorder %v504_v40, 1.0  ;;  %v814_v6 = vmul.f32 0.7, %v504_v40  ;;  %v822_v60 = vmul.f32 0.5, %v504_v40 }
 0x19a   :  { %v2315_v17 = vsel %vm603_vm6, 1.0, %v2601_v30 }
 0x1a0   :  { %v507_v33 = vpop.f32.mrf.mxu2 }
 0x1a1   :  { %v815_v16 = vmul.f32 0.7, %v507_v33  ;;  %vm604_vm8 = vcmp.gt.f32.partialorder %v507_v33, 1.0 }
 0x1a2   :  { %v2316_v10 = vsel %vm604_vm8, 1.0, %v2601_v30 }
 0x1a8   :  { %v3140_v58 = vpop.f32.mrf.mxu2 }
 0x1a9   :  { %v816_v5 = vmul.f32 0.7, %v3140_v58  ;;  %vm605_vm11 = vcmp.gt.f32.partialorder %v3140_v58, 1.0 }
 0x1b0   :  { %v513_v32 = vpop.f32.mrf.mxu2 }
 0x1b8   :  { %v515_v34 = vpop.f32.mrf.mxu2 }
 0x1c0   :  { %v517_v39 = vpop.f32.mrf.mxu2 }
 0x1c2   :  { %v695_v36 = vpop.f32.mrf.mxu3 }
 0x1c3   :  { %v817_v37 = vadd.f32 %v813_v27, %v695_v36  ;;  %v823_v27 = vmul.f32 0.5, %v507_v33 }
 0x1c5   :  { %v825_v1 = vadd.f32 %v821_v42, %v817_v37  ;;  %v1049_v8 = vmul.f32 0.7, %v817_v37 }
 0x1c7   :  { %v829_v4 = vsub.f32 %v825_v1, %v2314_v28 }
 0x1c8   :  { %v519_v35 = vpop.f32.mrf.mxu2 }
 0x1c9   :  { %vm833_vm7 = vcmp.gt.f32.partialorder %v829_v4, 1.0  ;;  %v1057_v13 = vmul.f32 0.5, %v829_v4 }
 0x1ca   :  { %v2338_v26 = vsel %vm833_vm7, 1.0, %v2601_v30  ;;  %v698_v7 = vpop.f32.mrf.mxu3 }
 0x1cb   :  { %v2551_v18 = vpack.i.bf16 %v2338_v26, %v2315_v17  ;;  %v818_v53 = vadd.f32 %v814_v6, %v698_v7  ;;  %v1264_v6 = vmul.f32 0.5, %v3130_v45 }
 0x1cd   :  { %2552 = vrot.lane.b32.xlu0 %v2551_v18, %s2602_s0  ;;  %v826_v9 = vadd.f32 %v822_v60, %v818_v53  ;;  %v1050_v37 = vmul.f32 0.7, %v818_v53 }
 0x1cf   :  { %v830_v28 = vsub.f32 %v826_v9, %v2315_v17 }
 0x1d0   :  { %v1151_v20 = vpop.f32.mrf.mxu2 }
 0x1d1   :  { %v3145_v46 = vadd.f32 %v1253_v44, %v1151_v20  ;;  %v1058_v4 = vmul.f32 0.5, %v830_v28  ;;  %vm834_vm10 = vcmp.gt.f32.partialorder %v830_v28, 1.0  ;;  %v1256_v20 = vmul.f32 0.8, %v3125_v14 }
 0x1d2   :  { %v701_v2 = vpop.f32.mrf.mxu3  ;;  %v2317_v14 = vsel %vm605_vm11, 1.0, %v2601_v30 }
 0x1d3   :  { %v3148_v38 = vadd.f32 %v1261_v48, %v3145_v46  ;;  %v819_v40 = vadd.f32 %v815_v16, %v701_v2 }
 0x1d5   :  { %v827_v17 = vadd.f32 %v823_v27, %v819_v40 }
 0x1d6   :  { %v2185_v51 = vpop.f32.mrf.mxu0 }
 0x1d7   :  { %v2339_v51 = vsel %vm834_vm10, 1.0, %v2601_v30  ;;  %v831_v53 = vsub.f32 %v827_v17, %v2316_v10 }
 0x1d8   :  { %v1154_v56 = vpop.f32.mrf.mxu2 }
 0x1d9   :  { %v3150_v43 = vadd.f32 %v1254_v55, %v1154_v56  ;;  %v824_v55 = vmul.f32 0.5, %v3140_v58  ;;  %v2561_v58 = vpack.i.bf16 %v2317_v14, %v2339_v51  ;;  %vm835_vm13 = vcmp.gt.f32.partialorder %v831_v53, 1.0 }
 0x1da   :  { %v704_v42 = vpop.f32.mrf.mxu3 }
 0x1db   :  { %v3153_v49 = vadd.f32 %v1262_v61, %v3150_v43  ;;  %v820_v44 = vadd.f32 %v816_v5, %v704_v42 }
 0x1dc   :  { %v927_v11 = vpop.f32.mrf.mxu1 }
 0x1dd   :  { %v3155_v52 = vadd.f32 %v1049_v8, %v927_v11  ;;  %v828_v60 = vadd.f32 %v824_v55, %v820_v44  ;;  %v1051_v8 = vmul.f32 0.7, %v819_v40 }
 0x1de   :  { %v2187_v15 = vpop.f32.mrf.mxu0 }
 0x1df   :  { %v1061_v57 = vadd.f32 %v1057_v13, %v3155_v52  ;;  %v1059_v13 = vmul.f32 0.5, %v831_v53  ;;  %v832_v16 = vsub.f32 %v828_v60, %v2317_v14 }
 0x1e0   :  { %v1157_v32 = vpop.f32.mrf.mxu2 }
 0x1e1   :  { %v3160_v34 = vsub.f32 %v1061_v57, %v2338_v26  ;;  %v3162_v39 = vadd.f32 %v1255_v24, %v1157_v32  ;;  %v2340_v24 = vsel %vm835_vm13, 1.0, %v2601_v30  ;;  %v1052_v32 = vmul.f32 0.7, %v820_v44 }
 0x1e2   :  { %vm836_vm15 = vcmp.gt.f32.partialorder %v832_v16, 1.0 }
 0x1e3   :  { %v3165_v36 = vadd.f32 %v1263_v63, %v3162_v39  ;;  %vm1069_vm9 = vcmp.gt.f32.partialorder %v3160_v34, 1.0  ;;  %v2341_v42 = vsel %vm836_vm15, 1.0, %v2601_v30 }
 0x1e4   :  { %v930_v1 = vpop.f32.mrf.mxu1  ;;  %v2370_v35 = vsel %vm1069_vm9, 1.0, %v2601_v30 }
 0x1e5   :  { %v1054_v26 = vadd.f32 %v1050_v37, %v930_v1  ;;  %v2556_v18 = vpack.i.bf16 %v2370_v35, %v2316_v10  ;;  %v1060_v37 = vmul.f32 0.5, %v832_v16 }
 0x1e6   :  { %v2189_v33 = vpop.f32.mrf.mxu0 }
 0x1e7   :  { %v1062_v7 = vadd.f32 %v1058_v4, %v1054_v26  ;;  %2557 = vrot.lane.b32.xlu1 %v2556_v18, %s2602_s0  ;;  %v1285_v4 = vmul.f32 0.7, %v3155_v52  ;;  %v1293_v33 = vmul.f32 0.5, %v3160_v34 }
 0x1e8   :  { %v1160_v48 = vpop.f32.mrf.mxu2 }
 0x1e9   :  { %v3177_v56 = vadd.f32 %v1256_v20, %v1160_v48  ;;  %v1066_v61 = vsub.f32 %v1062_v7, %v2339_v51  ;;  %v1286_v20 = vmul.f32 0.7, %v1054_v26 }
 0x1eb   :  { %v3180_v2 = vadd.f32 %v1264_v6, %v3177_v56  ;;  %vm1070_vm12 = vcmp.gt.f32.partialorder %v1066_v61, 1.0  ;;  %v1294_v51 = vmul.f32 0.5, %v1066_v61 }
 0x1ec   :  { %v933_v9 = vpop.f32.mrf.mxu1  ;;  %v2371_v11 = vsel %vm1070_vm12, 1.0, %v2601_v30 }
 0x1ed   :  { %v1055_v45 = vadd.f32 %v1051_v8, %v933_v9  ;;  %1087 = vrot.lane.b32.xlu2 %v2371_v11, %s2602_s0 }
 0x1ee   :  { %v2191_v15 = vpop.f32.mrf.mxu0 }
 0x1ef   :  { %v1063_v57 = vadd.f32 %v1059_v13, %v1055_v45  ;;  %2562 = vrot.lane.b32.xlu1 %v2561_v58, %s2602_s0  ;;  %v1287_v26 = vmul.f32 0.7, %v1055_v45 }
 0x1f1   :  { %v1067_v28 = vsub.f32 %v1063_v57, %v2340_v24 }
 0x1f3   :  { %vm1071_vm14 = vcmp.gt.f32.partialorder %v1067_v28, 1.0  ;;  %v1295_v8 = vmul.f32 0.5, %v1067_v28 }
 0x1f4   :  { %v936_v63 = vpop.f32.mrf.mxu1  ;;  %v2372_v40 = vsel %vm1071_vm14, 1.0, %v2601_v30 }
 0x1f5   :  { %v1056_v27 = vadd.f32 %v1052_v32, %v936_v63  ;;  %853 = vrot.lane.b32.xlu2 %v2340_v24, %s2602_s0  ;;  %1089 = vrot.lane.b32.xlu0 %v2372_v40, %s2602_s0 }
 0x1f7   :  { %v1064_v5 = vadd.f32 %v1060_v37, %v1056_v27  ;;  %855 = vrot.lane.b32.xlu1 %v2341_v42, %s2602_s0  ;;  %v1288_v13 = vmul.f32 0.7, %v1056_v27 }
 0x1f9   :  { %v1068_v1 = vsub.f32 %v1064_v5, %v2341_v42 }
 0x1fb   :  { %vm1072_vm0 = vcmp.gt.f32.partialorder %v1068_v1, 1.0  ;;  %v1296_v15 = vmul.f32 0.5, %v1068_v1 }
 0x1fc   :  { %v1163_v10 = vpop.f32.mrf.mxu2  ;;  %v2373_v17 = vsel %vm1072_vm0, 1.0, %v2601_v30 }
 0x1fd   :  { %v3194_v18 = vadd.f32 %v1285_v4, %v1163_v10  ;;  %1091 = vrot.lane.b32.xlu2 %v2373_v17, %s2602_s0 }
 0x1ff   :  { %v1297_v44 = vadd.f32 %v1293_v33, %v3194_v18 }
 0x201   :  { %v3199_v7 = vsub.f32 %v1297_v44, %v2370_v35 }
 0x203   :  { %vm1305_vm2 = vcmp.gt.f32.partialorder %v3199_v7, 1.0 }
 0x204   :  { %v1166_v48 = vpop.f32.mrf.mxu2  ;;  %v3203_v52 = vsel %vm1305_vm2, 1.0, %v2601_v30 }
 0x205   :  { %v3205_v6 = vadd.f32 %v1286_v20, %v1166_v48  ;;  %v619_v55 = vpop.permute.xlu0 %618  ;;  %1321 = vrot.lane.b32.xlu0 %v3203_v52, %s2602_s0 }
 0x206   :  { %630 = vst.msk [vmem:[%s3781_s4] sm:$0xff] %vm260_vm1, %v619_v55  ;;  %2326 = vmatmul.msk.f32.gmra.mxu3 %vm260_vm1, %v619_v55 }
 0x207   :  { %v1298_v34 = vadd.f32 %v1294_v51, %v3205_v6 }
 0x209   :  { %v3215_v35 = vsub.f32 %v1298_v34, %v2371_v11 }
 0x20b   :  { %vm1306_vm3 = vcmp.gt.f32.partialorder %v3215_v35, 1.0 }
 0x20c   :  { %v1169_v53 = vpop.f32.mrf.mxu2  ;;  %v3219_v61 = vsel %vm1306_vm3, 1.0, %v2601_v30 }
 0x20d   :  { %v3221_v60 = vadd.f32 %v1287_v26, %v1169_v53  ;;  %1323 = vrot.lane.b32.xlu1 %v3219_v61, %s2602_s0 }
 0x20f   :  { %v1299_v14 = vadd.f32 %v1295_v8, %v3221_v60 }
 0x211   :  { %v3226_v9 = vsub.f32 %v1299_v14, %v2372_v40 }
 0x213   :  { %vm1307_vm4 = vcmp.gt.f32.partialorder %v3226_v9, 1.0 }
 0x214   :  { %v1172_v11 = vpop.f32.mrf.mxu2  ;;  %v3230_v45 = vsel %vm1307_vm4, 1.0, %v2601_v30 }
 0x215   :  { %v3232_v58 = vadd.f32 %v1288_v13, %v1172_v11  ;;  %1325 = vrot.lane.b32.xlu2 %v3230_v45, %s2602_s0 }
 0x217   :  { %v1300_v16 = vadd.f32 %v1296_v15, %v3232_v58 }
 0x219   :  { %v3237_v57 = vsub.f32 %v1300_v16, %v2373_v17  ;;  %v1489_v16 = vmul.f32 0.8, %v3145_v46 }
 0x21b   :  { %vm1308_vm5 = vcmp.gt.f32.partialorder %v3237_v57, 1.0 }
 0x21c   :  { %v3241_v24 = vsel %vm1308_vm5, 1.0, %v2601_v30 }
 0x21d   :  { %1327 = vrot.lane.b32.xlu0 %v3241_v24, %s2602_s0 }
 0x23f   :  { %v2553_v28 = vpop.permute.xlu0 %2552 }
 0x240   :  { %v2555_v32 = vunpack.i.h.bf16 %v2553_v28  ;;  %v2554_v63 = vunpack.i.l.bf16 %v2553_v28 }
 0x242   :  { %2342 = vst.msk [vmem:[%s3781_s4 + $0x20] sm:$0xff] %vm260_vm1, %v2555_v32  ;;  %2327 = vmatmul.msk.f32.gmra.mxu3 %vm260_vm1, %v2554_v63  ;;  %2354 = vmatmul.msk.f32.gmra.mxu1 %vm260_vm1, %v2555_v32 }
 0x243   :  { %631 = vst.msk [vmem:[%s3781_s4 + $0x8] sm:$0xff] %vm260_vm1, %v2554_v63 }
 0x247   :  { %v1088_v40 = vpop.permute.xlu2 %1087 }
 0x248   :  { %2375 = vst.msk [vmem:[%s3781_s4 + $0x48] sm:$0xff] %vm260_vm1, %v1088_v40 }
 0x24f   :  { %v854_v27 = vpop.permute.xlu2 %853 }
 0x250   :  { %2344 = vst.msk [vmem:[%s3781_s4 + $0x30] sm:$0xff] %vm260_vm1, %v854_v27 }
 0x257   :  { %v1092_v37 = vpop.permute.xlu2 %1091 }
 0x258   :  { %2377 = vst.msk [vmem:[%s3781_s4 + $0x58] sm:$0xff] %vm260_vm1, %v1092_v37 }
 0x259   :  { %v2558_v42 = vpop.permute.xlu1 %2557 }
 0x25a   :  { %v2560_v5 = vunpack.i.h.bf16 %v2558_v42  ;;  %v2559_v1 = vunpack.i.l.bf16 %v2558_v42 }
 0x25c   :  { %2374 = vst.msk [vmem:[%s3781_s4 + $0x40] sm:$0xff] %vm260_vm1, %v2560_v5  ;;  %2328 = vmatmul.msk.f32.gmra.mxu3 %vm260_vm1, %v2559_v1  ;;  %2386 = vmatmul.msk.f32.gmra.mxu2 %vm260_vm1, %v2560_v5 }
 0x25d   :  { %632 = vst.msk [vmem:[%s3781_s4 + $0x10] sm:$0xff] %vm260_vm1, %v2559_v1 }
 0x261   :  { %v2563_v4 = vpop.permute.xlu1 %2562 }
 0x262   :  { %v2565_v10 = vunpack.i.h.bf16 %v2563_v4  ;;  %v2564_v17 = vunpack.i.l.bf16 %v2563_v4 }
 0x264   :  { %633 = vst.msk [vmem:[%s3781_s4 + $0x18] sm:$0xff] %vm260_vm1, %v2565_v10  ;;  %2329 = vmatmul.msk.f32.gmra.mxu3 %vm260_vm1, %v2565_v10  ;;  %2355 = vmatmul.msk.f32.gmra.mxu1 %vm260_vm1, %v2564_v17  ;;  %v1490_v10 = vmul.f32 0.8, %v3150_v43 }
 0x265   :  { %2343 = vst.msk [vmem:[%s3781_s4 + $0x28] sm:$0xff] %vm260_vm1, %v2564_v17  ;;  %2387 = vmatmul.msk.f32.gmra.mxu2 %vm260_vm1, %v1088_v40 }
 0x267   :  { %v1090_v33 = vpop.permute.xlu0 %1089 }
 0x268   :  { %2376 = vst.msk [vmem:[%s3781_s4 + $0x50] sm:$0xff] %vm260_vm1, %v1090_v33 }
 0x269   :  { %v856_v44 = vpop.permute.xlu1 %855 }
 0x26a   :  { %2345 = vst.msk [vmem:[%s3781_s4 + $0x38] sm:$0xff] %vm260_vm1, %v856_v44 }
 0x26c   :  { %2356 = vmatmul.msk.f32.gmra.mxu1 %vm260_vm1, %v854_v27  ;;  %2410 = vmatmul.msk.f32.vlgmr.msra.gmra.mxu3 %vm260_vm1, %v3009_v50 }
 0x26d   :  { %2388 = vmatmul.msk.f32.gmra.mxu2 %vm260_vm1, %v1090_v33 }
 0x26f   :  { %v1326_v20 = vpop.permute.xlu2 %1325 }
 0x270   :  { %2408 = vst.msk [vmem:[%s3781_s4 + $0x70] sm:$0xff] %vm260_vm1, %v1326_v20 }
 0x274   :  { %2357 = vmatmul.msk.f32.gmra.mxu1 %vm260_vm1, %v856_v44  ;;  %2411 = vmatmul.msk.f32.gmra.mxu3 %vm260_vm1, %v3039_v23  ;;  %v1269_v23 = vsub.f32 %v3148_v38, %v3107_v12  ;;  %v3350_v12 = vsub.f32 %v3165_v36, %v3123_v62 }
 0x275   :  { %2389 = vmatmul.msk.f32.gmra.mxu2 %vm260_vm1, %v1092_v37 }
 0x276   :  { %vm1273_vm6 = vcmp.gt.f32.partialorder %v1269_v23, 1.0  ;;  %vm1275_vm8 = vcmp.gt.f32.partialorder %v3350_v12, 1.0 }
 0x277   :  { %v1322_v48 = vpop.permute.xlu0 %1321 }
 0x278   :  { %2406 = vst.msk [vmem:[%s3781_s4 + $0x60] sm:$0xff] %vm260_vm1, %v1322_v48 }
 0x27c   :  { %2412 = vmatmul.msk.f32.gmra.mxu3 %vm260_vm1, %v2963_v54  ;;  %2442 = vmatmul.msk.f32.vlgmr.msrb.gmra.mxu1 %vm260_vm1, %v3032_v59  ;;  %v2398_v54 = vsel %vm1273_vm6, 1.0, %v2601_v30  ;;  %v3333_v59 = vsub.f32 %v3153_v49, %v3112_v21  ;;  %v3364_v21 = vsub.f32 %v3180_v2, %v3134_v25 }
 0x27d   :  { %2474 = vmatmul.msk.f32.vlgmr.msrb.gmra.mxu2 %vm260_vm1, %v3049_v19 }
 0x27e   :  { %vm1274_vm7 = vcmp.gt.f32.partialorder %v3333_v59, 1.0  ;;  %vm1276_vm9 = vcmp.gt.f32.partialorder %v3364_v21, 1.0 }
 0x27f   :  { %v1324_v50 = vpop.permute.xlu1 %1323  ;;  %v3370_v62 = vsel %vm1276_vm9, 1.0, %v2601_v30 }
 0x280   :  { %2407 = vst.msk [vmem:[%s3781_s4 + $0x68] sm:$0xff] %vm260_vm1, %v1324_v50 }
 0x284   :  { %2413 = vmatmul.msk.f32.gmra.mxu3 %vm260_vm1, %v2998_v29  ;;  %2443 = vmatmul.msk.f32.gmra.mxu1 %vm260_vm1, %v3055_v31  ;;  %v3346_v31 = vsel %vm1274_vm7, 1.0, %v2601_v30 }
 0x285   :  { %2475 = vmatmul.msk.f32.gmra.mxu2 %vm260_vm1, %v3066_v3 }
 0x28c   :  { %2414 = vmatmul.msk.f32.gmra.mxu3 %vm260_vm1, %v2398_v54  ;;  %2444 = vmatmul.msk.f32.gmra.mxu1 %vm260_vm1, %v3069_v41  ;;  %v3360_v41 = vsel %vm1275_vm8, 1.0, %v2601_v30 }
 0x28d   :  { %2476 = vmatmul.msk.f32.gmra.mxu2 %vm260_vm1, %v3084_v22 }
 0x28f   :  { %v1328_v29 = vpop.permute.xlu0 %1327 }
 0x290   :  { %2409 = vst.msk [vmem:[%s3781_s4 + $0x78] sm:$0xff] %vm260_vm1, %v1328_v29 }
 0x294   :  { %2415 = vmatmul.msk.f32.gmra.mxu3 %vm260_vm1, %v3346_v31  ;;  %2445 = vmatmul.msk.f32.gmra.mxu1 %vm260_vm1, %v3087_v0  ;;  %v3380_v0 = vpop.f32.mrf.mxu3 }
 0x295   :  { %2477 = vmatmul.msk.f32.gmra.mxu2 %vm260_vm1, %v3099_v47  ;;  %v951_v49 = vmul.f32 0.95, %v3380_v0 }
 0x29c   :  { %2416 = vmatmul.msk.f32.gmra.mxu3 %vm260_vm1, %v3360_v41 }
 0x2a4   :  { %2417 = vmatmul.msk.f32.gmra.mxu3 %vm260_vm1, %v3370_v62 }
 0x2ac   :  { %2418 = vmatmul.msk.f32.gmra.mxu3 %vm260_vm1, %v1322_v48  ;;  %v1498_v48 = vmul.f32 0.5, %v3333_v59 }
 0x2b4   :  { %2419 = vmatmul.msk.f32.gmra.mxu3 %vm260_vm1, %v1324_v50 }
 0x2bc   :  { %2420 = vmatmul.msk.f32.gmra.mxu3 %vm260_vm1, %v1326_v20 }
 0x2bf   :  { %v939_v25 = vpop.f32.mrf.mxu1 }
 0x2c0   :  { %v3387_v36 = vadd.f32 %v951_v49, %v939_v25 }
 0x2c2   :  { %v1187_v2 = vmul.f32 0.95, %v3387_v36 }
 0x2c4   :  { %2421 = vmatmul.msk.f32.gmra.mxu3 %vm260_vm1, %v1328_v29 }
 0x2c5   :  { %v3384_v38 = vpop.f32.mrf.mxu3 }
 0x2cc   :  { %2502 = vmatmul.msk.f32.vlgmr.msrb.gmra.mxu3 %vm260_vm1, %v3049_v19 }
 0x2d4   :  { %2503 = vmatmul.msk.f32.gmra.mxu3 %vm260_vm1, %v3066_v3  ;;  %v952_v3 = vmul.f32 0.95, %v3384_v38 }
 0x2dc   :  { %2504 = vmatmul.msk.f32.gmra.mxu3 %vm260_vm1, %v3084_v22 }
 0x2df   :  { %v3392_v51 = vpop.f32.mrf.mxu3  ;;  %v1175_v19 = vpop.f32.mrf.mxu2 }
 0x2e0   :  { %v3394_v55 = vadd.f32 %v1187_v2, %v1175_v19  ;;  %v953_v11 = vmul.f32 0.95, %v3392_v51 }
 0x2e1   :  { %v942_v34 = vpop.f32.mrf.mxu1 }
 0x2e2   :  { %v3397_v26 = vadd.f32 %v952_v3, %v942_v34  ;;  %v1491_v34 = vmul.f32 0.8, %v3162_v39 }
 0x2e4   :  { %2505 = vmatmul.msk.f32.gmra.mxu3 %vm260_vm1, %v3099_v47  ;;  %v1188_v8 = vmul.f32 0.95, %v3397_v26  ;;  %v1497_v47 = vmul.f32 0.5, %v1269_v23 }
 0x2e7   :  { %v3401_v53 = vpop.f32.mrf.mxu3 }
 0x2e8   :  { %v1178_v22 = vpop.f32.mrf.mxu2  ;;  %v954_v42 = vmul.f32 0.95, %v3401_v53 }
 0x2e9   :  { %v3404_v14 = vadd.f32 %v1188_v8, %v1178_v22  ;;  %v945_v13 = vpop.f32.mrf.mxu1  ;;  %v1499_v8 = vmul.f32 0.5, %v3350_v12 }
 0x2ea   :  { %v3407_v15 = vadd.f32 %v953_v11, %v945_v13 }
 0x2ec   :  { %v1189_v28 = vmul.f32 0.95, %v3407_v15 }
 0x2ef   :  { %v1387_v32 = vpop.f32.mrf.mxu3 }
 0x2f0   :  { %v1181_v63 = vpop.f32.mrf.mxu2  ;;  %v1493_v40 = vadd.f32 %v1489_v16, %v1387_v32 }
 0x2f1   :  { %v3411_v27 = vadd.f32 %v1189_v28, %v1181_v63  ;;  %v948_v37 = vpop.f32.mrf.mxu1 }
 0x2f2   :  { %v1501_v5 = vadd.f32 %v1497_v47, %v1493_v40  ;;  %v3414_v1 = vadd.f32 %v954_v42, %v948_v37  ;;  %v1725_v50 = vmul.f32 0.8, %v1493_v40 }
 0x2f4   :  { %v1505_v4 = vsub.f32 %v1501_v5, %v2398_v54  ;;  %v1190_v46 = vmul.f32 0.95, %v3414_v1 }
 0x2f6   :  { %vm1509_vm10 = vcmp.gt.f32.partialorder %v1505_v4, 1.0  ;;  %v1733_v49 = vmul.f32 0.5, %v1505_v4 }
 0x2f7   :  { %v1390_v17 = vpop.f32.mrf.mxu3  ;;  %v2430_v33 = vsel %vm1509_vm10, 1.0, %v2601_v30 }
 0x2f8   :  { %v1184_v44 = vpop.f32.mrf.mxu2  ;;  %v1494_v20 = vadd.f32 %v1490_v10, %v1390_v17  ;;  %2446 = vmatmul.msk.f32.gmra.mxu1 %vm260_vm1, %v2430_v33  ;;  %v1492_v10 = vmul.f32 0.8, %v3177_v56 }
 0x2f9   :  { %v3421_v23 = vadd.f32 %v1190_v46, %v1184_v44  ;;  %v1623_v29 = vpop.f32.mrf.mxu1  ;;  %v1500_v46 = vmul.f32 0.5, %v3364_v21 }
 0x2fa   :  { %v1502_v25 = vadd.f32 %v1498_v48, %v1494_v20  ;;  %v1729_v54 = vadd.f32 %v1725_v50, %v1623_v29  ;;  %v1726_v28 = vmul.f32 0.8, %v1494_v20 }
 0x2fc   :  { %v1506_v43 = vsub.f32 %v1502_v25, %v3346_v31  ;;  %v1737_v2 = vadd.f32 %v1733_v49, %v1729_v54  ;;  %v1924_v59 = vmul.f32 0.8, %v1729_v54 }
 0x2fe   :  { %v1741_v19 = vsub.f32 %v1737_v2, %v2430_v33  ;;  %vm1510_vm11 = vcmp.gt.f32.partialorder %v1506_v43, 1.0  ;;  %v1734_v47 = vmul.f32 0.5, %v1506_v43 }
 0x2ff   :  { %v1393_v3 = vpop.f32.mrf.mxu3  ;;  %v2431_v22 = vsel %vm1510_vm11, 1.0, %v2601_v30 }
 0x300   :  { %v1495_v13 = vadd.f32 %v1491_v34, %v1393_v3  ;;  %v1859_v11 = vpop.f32.mrf.mxu2  ;;  %v1932_v16 = vmul.f32 0.5, %v1741_v19  ;;  %2447 = vmatmul.msk.f32.gmra.mxu1 %vm260_vm1, %v2431_v22  ;;  %vm1745_vm12 = vcmp.gt.f32.partialorder %v1741_v19, 1.0 }
 0x301   :  { %v1928_v32 = vadd.f32 %v1924_v59, %v1859_v11  ;;  %v1626_v31 = vpop.f32.mrf.mxu1  ;;  %v2462_v63 = vsel %vm1745_vm12, 1.0, %v2601_v30  ;;  %v1521_v59 = vmul.f32 0.7, %v3194_v18 }
 0x302   :  { %v1503_v40 = vadd.f32 %v1499_v8, %v1495_v13  ;;  %v1730_v39 = vadd.f32 %v1726_v28, %v1626_v31  ;;  %2478 = vmatmul.msk.f32.gmra.mxu2 %vm260_vm1, %v2462_v63  ;;  %v1727_v20 = vmul.f32 0.8, %v1495_v13 }
 0x303   :  { %v1936_v12 = vadd.f32 %v1932_v16, %v1928_v32 }
 0x304   :  { %v1507_v37 = vsub.f32 %v1503_v40, %v3360_v41  ;;  %v1738_v42 = vadd.f32 %v1734_v47, %v1730_v39  ;;  %v1925_v33 = vmul.f32 0.8, %v1730_v39 }
 0x305   :  { %v1940_v5 = vsub.f32 %v1936_v12, %v2462_v63 }
 0x306   :  { %v1742_v4 = vsub.f32 %v1738_v42, %v2431_v22  ;;  %vm1511_vm13 = vcmp.gt.f32.partialorder %v1507_v37, 1.0  ;;  %v1735_v43 = vmul.f32 0.5, %v1507_v37  ;;  %v1529_v22 = vmul.f32 0.5, %v3199_v7 }
 0x307   :  { %v1396_v17 = vpop.f32.mrf.mxu3  ;;  %v2432_v44 = vsel %vm1511_vm13, 1.0, %v2601_v30  ;;  %vm1944_vm14 = vcmp.gt.f32.partialorder %v1940_v5, 1.0 }
 0x308   :  { %v1496_v48 = vadd.f32 %v1492_v10, %v1396_v17  ;;  %v1862_v50 = vpop.f32.mrf.mxu2  ;;  %v1933_v29 = vmul.f32 0.5, %v1742_v4  ;;  %2448 = vmatmul.msk.f32.gmra.mxu1 %vm260_vm1, %v2432_v44  ;;  %v2490_v41 = vsel %vm1944_vm14, 1.0, %v2601_v30  ;;  %vm1746_vm15 = vcmp.gt.f32.partialorder %v1742_v4, 1.0 }
 0x309   :  { %v1929_v25 = vadd.f32 %v1925_v33, %v1862_v50  ;;  %2506 = vmatmul.msk.f32.gmra.mxu3 %vm260_vm1, %v2490_v41  ;;  %2530 = vmatmul.msk.f32.gmra.mxu0 %vm260_vm1, %v2490_v41  ;;  %v1629_v56 = vpop.f32.mrf.mxu1  ;;  %v2463_v21 = vsel %vm1746_vm15, 1.0, %v2601_v30  ;;  %v1522_v10 = vmul.f32 0.7, %v3205_v6  ;;  %v1530_v17 = vmul.f32 0.5, %v3215_v35 }
 0x30a   :  { %v1504_v54 = vadd.f32 %v1500_v46, %v1496_v48  ;;  %v1731_v49 = vadd.f32 %v1727_v20, %v1629_v56  ;;  %2479 = vmatmul.msk.f32.gmra.mxu2 %vm260_vm1, %v2463_v21  ;;  %v1728_v28 = vmul.f32 0.8, %v1496_v48  ;;  %v1523_v56 = vmul.f32 0.7, %v3221_v60 }
 0x30b   :  { %v1937_v2 = vadd.f32 %v1933_v29, %v1929_v25  ;;  %v1423_v60 = vmul.f32 0.95, %v3394_v55 }
 0x30c   :  { %v1508_v19 = vsub.f32 %v1504_v54, %v3370_v62  ;;  %v1739_v34 = vadd.f32 %v1735_v43, %v1731_v49  ;;  %v1926_v11 = vmul.f32 0.8, %v1731_v49  ;;  %v1531_v49 = vmul.f32 0.5, %v3226_v9 }
 0x30d   :  { %v1941_v3 = vsub.f32 %v1937_v2, %v2463_v21  ;;  %v1424_v9 = vmul.f32 0.95, %v3404_v14 }
 0x30e   :  { %v1743_v8 = vsub.f32 %v1739_v34, %v2432_v44  ;;  %vm1512_vm0 = vcmp.gt.f32.partialorder %v1508_v19, 1.0  ;;  %v1736_v12 = vmul.f32 0.5, %v1508_v19  ;;  %v1524_v19 = vmul.f32 0.7, %v3232_v58 }
 0x30f   :  { %v1399_v13 = vpop.f32.mrf.mxu3  ;;  %v2433_v16 = vsel %vm1512_vm0, 1.0, %v2601_v30  ;;  %vm1945_vm2 = vcmp.gt.f32.partialorder %v1941_v3, 1.0  ;;  %v1426_v58 = vmul.f32 0.95, %v3421_v23 }
 0x310   :  { %v3444_v32 = vadd.f32 %v1521_v59, %v1399_v13  ;;  %v1865_v31 = vpop.f32.mrf.mxu2  ;;  %v1934_v63 = vmul.f32 0.5, %v1743_v8  ;;  %2449 = vmatmul.msk.f32.gmra.mxu1 %vm260_vm1, %v2433_v16  ;;  %v2491_v62 = vsel %vm1945_vm2, 1.0, %v2601_v30  ;;  %vm1747_vm3 = vcmp.gt.f32.partialorder %v1743_v8, 1.0 }
 0x311   :  { %v1930_v40 = vadd.f32 %v1926_v11, %v1865_v31  ;;  %2507 = vmatmul.msk.f32.gmra.mxu3 %vm260_vm1, %v2491_v62  ;;  %2531 = vmatmul.msk.f32.gmra.mxu0 %vm260_vm1, %v2491_v62  ;;  %v1632_v18 = vpop.f32.mrf.mxu1  ;;  %v2464_v7 = vsel %vm1747_vm3, 1.0, %v2601_v30  ;;  %v1532_v8 = vmul.f32 0.5, %v3237_v57 }
 0x312   :  { %v1533_v39 = vadd.f32 %v1529_v22, %v3444_v32  ;;  %v1732_v47 = vadd.f32 %v1728_v28, %v1632_v18  ;;  %2480 = vmatmul.msk.f32.gmra.mxu2 %vm260_vm1, %v2464_v7  ;;  %v1425_v28 = vmul.f32 0.95, %v3411_v27 }
 0x313   :  { %v1938_v37 = vadd.f32 %v1934_v63, %v1930_v40 }
 0x314   :  { %v1740_v42 = vadd.f32 %v1736_v12, %v1732_v47  ;;  %v1927_v33 = vmul.f32 0.8, %v1732_v47  ;;  %v1537_v12 = vsub.f32 %v1533_v39, %v3203_v52 }
 0x315   :  { %v1942_v5 = vsub.f32 %v1938_v37, %v2464_v7  ;;  %v1757_v37 = vmul.f32 0.7, %v3444_v32 }
 0x316   :  { %v1744_v4 = vsub.f32 %v1740_v42, %v2433_v16  ;;  %vm1541_vm7 = vcmp.gt.f32.partialorder %v1537_v12, 1.0 }
 0x317   :  { %v1402_v46 = vpop.f32.mrf.mxu3  ;;  %vm1946_vm4 = vcmp.gt.f32.partialorder %v1942_v5, 1.0 }
 0x318   :  { %v1526_v44 = vadd.f32 %v1522_v10, %v1402_v46  ;;  %v1868_v20 = vpop.f32.mrf.mxu2  ;;  %v1935_v48 = vmul.f32 0.5, %v1744_v4  ;;  %v2492_v50 = vsel %vm1946_vm4, 1.0, %v2601_v30  ;;  %vm1748_vm5 = vcmp.gt.f32.partialorder %v1744_v4, 1.0 }
 0x319   :  { %v1931_v29 = vadd.f32 %v1927_v33, %v1868_v20  ;;  %2508 = vmatmul.msk.f32.gmra.mxu3 %vm260_vm1, %v2492_v50  ;;  %2532 = vmatmul.msk.f32.gmra.mxu0 %vm260_vm1, %v2492_v50  ;;  %v2465_v41 = vsel %vm1748_vm5, 1.0, %v2601_v30  ;;  %v1765_v4 = vmul.f32 0.5, %v1537_v12  ;;  %v2434_v46 = vsel %vm1541_vm7, 1.0, %v2601_v30 }
 0x31a   :  { %v1534_v25 = vadd.f32 %v1530_v17, %v1526_v44  ;;  %2481 = vmatmul.msk.f32.gmra.mxu2 %vm260_vm1, %v2465_v41  ;;  %v1758_v20 = vmul.f32 0.7, %v1526_v44 }
 0x31b   :  { %v1939_v6 = vadd.f32 %v1935_v48, %v1931_v29 }
 0x31c   :  { %v1538_v17 = vsub.f32 %v1534_v25, %v3219_v61 }
 0x31d   :  { %v1943_v35 = vsub.f32 %v1939_v6, %v2465_v41 }
 0x31e   :  { %vm1542_vm9 = vcmp.gt.f32.partialorder %v1538_v17, 1.0  ;;  %v1766_v52 = vmul.f32 0.5, %v1538_v17 }
 0x31f   :  { %v1405_v21 = vpop.f32.mrf.mxu3  ;;  %vm1947_vm6 = vcmp.gt.f32.partialorder %v1943_v35, 1.0  ;;  %v3487_v6 = vsel %vm1542_vm9, 1.0, %v2601_v30 }
 0x320   :  { %v1527_v54 = vadd.f32 %v1523_v56, %v1405_v21  ;;  %v2493_v43 = vsel %vm1947_vm6, 1.0, %v2601_v30 }
 0x321   :  { %2509 = vmatmul.msk.f32.gmra.mxu3 %vm260_vm1, %v2493_v43  ;;  %2533 = vmatmul.msk.f32.gmra.mxu0 %vm260_vm1, %v2493_v43 }
 0x322   :  { %v1535_v2 = vadd.f32 %v1531_v49, %v1527_v54  ;;  %v1759_v25 = vmul.f32 0.7, %v1527_v54 }
 0x324   :  { %v1539_v41 = vsub.f32 %v1535_v2, %v3230_v45 }
 0x326   :  { %vm1543_vm10 = vcmp.gt.f32.partialorder %v1539_v41, 1.0  ;;  %v1767_v49 = vmul.f32 0.5, %v1539_v41 }
 0x327   :  { %v1408_v34 = vpop.f32.mrf.mxu3  ;;  %v3492_v45 = vsel %vm1543_vm10, 1.0, %v2601_v30 }
 0x328   :  { %v1528_v3 = vadd.f32 %v1524_v19, %v1408_v34 }
 0x32a   :  { %v1536_v59 = vadd.f32 %v1532_v8, %v1528_v3 }
 0x32c   :  { %v1540_v8 = vsub.f32 %v1536_v59, %v3241_v24 }
 0x32e   :  { %vm1544_vm13 = vcmp.gt.f32.partialorder %v1540_v8, 1.0  ;;  %v1768_v59 = vmul.f32 0.5, %v1540_v8 }
 0x32f   :  { %v1411_v22 = vpop.f32.mrf.mxu3  ;;  %v2437_v17 = vsel %vm1544_vm13, 1.0, %v2601_v30 }
 0x330   :  { %v3468_v13 = vadd.f32 %v1423_v60, %v1411_v22 }
 0x337   :  { %v1414_v11 = vpop.f32.mrf.mxu3 }
 0x338   :  { %v3471_v16 = vadd.f32 %v1424_v9, %v1414_v11  ;;  %v1760_v11 = vmul.f32 0.7, %v1528_v3 }
 0x33f   :  { %v1417_v31 = vpop.f32.mrf.mxu3 }
 0x340   :  { %v3474_v63 = vadd.f32 %v1425_v28, %v1417_v31 }
 0x347   :  { %v1420_v62 = vpop.f32.mrf.mxu3 }
 0x348   :  { %v3477_v57 = vadd.f32 %v1426_v58, %v1420_v62 }
 0x34f   :  { %v2046_v40 = vpop.f32.mrf.mxu3 }
 0x357   :  { %v2048_v18 = vpop.f32.mrf.mxu3 }
 0x35f   :  { %v2050_v7 = vpop.f32.mrf.mxu3 }
 0x367   :  { %v2052_v47 = vpop.f32.mrf.mxu3 }
 0x375   :  { %v1635_v42 = vpop.f32.mrf.mxu1 }
 0x376   :  { %v1761_v5 = vadd.f32 %v1757_v37, %v1635_v42 }
 0x378   :  { %v1769_v10 = vadd.f32 %v1765_v4, %v1761_v5  ;;  %v1956_v44 = vmul.f32 0.7, %v1761_v5 }
 0x37a   :  { %v1773_v33 = vsub.f32 %v1769_v10, %v2434_v46 }
 0x37c   :  { %vm1777_vm8 = vcmp.gt.f32.partialorder %v1773_v33, 1.0  ;;  %v1964_v19 = vmul.f32 0.5, %v1773_v33 }
 0x37d   :  { %v1638_v48 = vpop.f32.mrf.mxu1  ;;  %v2466_v50 = vsel %vm1777_vm8, 1.0, %v2601_v30  ;;  %vm739_vm8 = vcmask 31744  }
 0x37e   :  { %v1762_v29 = vadd.f32 %v1758_v20, %v1638_v48  ;;  %v2566_v39 = vpack.i.bf16 %v2434_v46, %v2466_v50 }
 0x380   :  { %v1770_v32 = vadd.f32 %v1766_v52, %v1762_v29  ;;  %2567 = vrot.lane.b32.xlu1 %v2566_v39, %s2602_s0  ;;  %v1957_v58 = vmul.f32 0.7, %v1762_v29 }
 0x382   :  { %v1774_v61 = vsub.f32 %v1770_v32, %v3487_v6 }
 0x384   :  { %vm1778_vm11 = vcmp.gt.f32.partialorder %v1774_v61, 1.0  ;;  %v1965_v37 = vmul.f32 0.5, %v1774_v61 }
 0x385   :  { %v1641_v35 = vpop.f32.mrf.mxu1  ;;  %v1871_v56 = vpop.f32.mrf.mxu2  ;;  %v2467_v18 = vsel %vm1778_vm11, 1.0, %v2601_v30 }
 0x386   :  { %v1763_v21 = vadd.f32 %v1759_v25, %v1641_v35  ;;  %v1960_v43 = vadd.f32 %v1956_v44, %v1871_v56  ;;  %v2193_v34 = vpop.f32.mrf.mxu0 }
 0x388   :  { %v1771_v60 = vadd.f32 %v1767_v49, %v1763_v21  ;;  %v1968_v22 = vadd.f32 %v1964_v19, %v1960_v43  ;;  %v2107_v54 = vmul.f32 0.7, %v1960_v43 }
 0x38a   :  { %v1775_v2 = vsub.f32 %v1771_v60, %v3492_v45  ;;  %v1972_v9 = vsub.f32 %v1968_v22, %v2466_v50  ;;  %v1958_v50 = vmul.f32 0.7, %v1763_v21 }
 0x38c   :  { %vm1976_vm12 = vcmp.gt.f32.partialorder %v1972_v9, 1.0  ;;  %v2054_v28 = vpop.f32.mrf.mxu3  ;;  %v2115_v31 = vmul.f32 0.5, %v1972_v9  ;;  %vm1779_vm14 = vcmp.gt.f32.partialorder %v1775_v2, 1.0  ;;  %v1966_v56 = vmul.f32 0.5, %v1775_v2 }
 0x38d   :  { %v2494_v62 = vsel %vm1976_vm12, 1.0, %v2601_v30  ;;  %v2111_v40 = vadd.f32 %v2107_v54, %v2054_v28  ;;  %v1644_v24 = vpop.f32.mrf.mxu1  ;;  %v1874_v7 = vpop.f32.mrf.mxu2  ;;  %v2468_v39 = vsel %vm1779_vm14, 1.0, %v2601_v30 }
 0x38e   :  { %v1764_v47 = vadd.f32 %v1760_v11, %v1644_v24  ;;  %v1961_v12 = vadd.f32 %v1957_v58, %v1874_v7  ;;  %v2195_v42 = vpop.f32.mrf.mxu0  ;;  %v2571_v5 = vpack.i.bf16 %v2467_v18, %v2494_v62 }
 0x38f   :  { %v2119_v4 = vadd.f32 %v2115_v31, %v2111_v40 }
 0x390   :  { %v1772_v3 = vadd.f32 %v1768_v59, %v1764_v47  ;;  %v1969_v10 = vadd.f32 %v1965_v37, %v1961_v12  ;;  %2572 = vrot.lane.b32.xlu2 %v2571_v5, %s2602_s0  ;;  %v2108_v48 = vmul.f32 0.7, %v1961_v12  ;;  %v1959_v22 = vmul.f32 0.7, %v1764_v47 }
 0x391   :  { %v2123_v46 = vsub.f32 %v2119_v4, %v2494_v62 }
 0x392   :  { %v1776_v33 = vsub.f32 %v1772_v3, %v2437_v17  ;;  %v1973_v20 = vsub.f32 %v1969_v10, %v2467_v18 }
 0x393   :  { %vm2127_vm15 = vcmp.gt.f32.partialorder %v2123_v46, 1.0 }
 0x394   :  { %vm1977_vm0 = vcmp.gt.f32.partialorder %v1973_v20, 1.0  ;;  %v2057_v29 = vpop.f32.mrf.mxu3  ;;  %v2116_v52 = vmul.f32 0.5, %v1973_v20  ;;  %v2518_v32 = vsel %vm2127_vm15, 1.0, %v2601_v30  ;;  %vm1780_vm2 = vcmp.gt.f32.partialorder %v1776_v33, 1.0 }
 0x395   :  { %v2495_v41 = vsel %vm1977_vm0, 1.0, %v2601_v30  ;;  %v2112_v61 = vadd.f32 %v2108_v48, %v2057_v29  ;;  %v1877_v25 = vpop.f32.mrf.mxu2  ;;  %v2581_v44 = vpack.i.bf16 %v2468_v39, %v2518_v32  ;;  %v2469_v11 = vsel %vm1780_vm2, 1.0, %v2601_v30 }
 0x396   :  { %v1962_v35 = vadd.f32 %v1958_v50, %v1877_v25  ;;  %v2197_v49 = vpop.f32.mrf.mxu0  ;;  %v2576_v43 = vpack.i.bf16 %v2495_v41, %v3487_v6  ;;  %v1967_v40 = vmul.f32 0.5, %v1776_v33 }
 0x397   :  { %v2120_v19 = vadd.f32 %v2116_v52, %v2112_v61  ;;  %2582 = vrot.lane.b32.xlu1 %v2581_v44, %s2602_s0 }
 0x398   :  { %v1970_v21 = vadd.f32 %v1966_v56, %v1962_v35  ;;  %2577 = vrot.lane.b32.xlu0 %v2576_v43, %s2602_s0  ;;  %v2109_v60 = vmul.f32 0.7, %v1962_v35 }
 0x399   :  { %v2124_v34 = vsub.f32 %v2120_v19, %v2495_v41 }
 0x39a   :  { %v1974_v8 = vsub.f32 %v1970_v21, %v2468_v39 }
 0x39b   :  { %vm2128_vm3 = vcmp.gt.f32.partialorder %v2124_v34, 1.0 }
 0x39c   :  { %v2060_v9 = vpop.f32.mrf.mxu3  ;;  %v2117_v54 = vmul.f32 0.5, %v1974_v8  ;;  %vm1978_vm4 = vcmp.gt.f32.partialorder %v1974_v8, 1.0  ;;  %v2519_v2 = vsel %vm2128_vm3, 1.0, %v2601_v30 }
 0x39d   :  { %v2113_v6 = vadd.f32 %v2109_v60, %v2060_v9  ;;  %v1880_v28 = vpop.f32.mrf.mxu2  ;;  %v2496_v31 = vsel %vm1978_vm4, 1.0, %v2601_v30  ;;  %v2591_v58 = vpack.i.bf16 %v2469_v11, %v2519_v2 }
 0x39e   :  { %v1963_v62 = vadd.f32 %v1959_v22, %v1880_v28  ;;  %v2199_v24 = vpop.f32.mrf.mxu0  ;;  %v2586_v59 = vpack.i.bf16 %v2496_v31, %v3492_v45  ;;  %v1659_v28 = vmul.f32 0.95, %v3468_v13 }
 0x39f   :  { %v2121_v18 = vadd.f32 %v2117_v54, %v2113_v6 }
 0x3a0   :  { %v1971_v7 = vadd.f32 %v1967_v40, %v1963_v62  ;;  %2587 = vrot.lane.b32.xlu2 %v2586_v59, %s2602_s0  ;;  %2592 = vrot.lane.b32.xlu0 %v2591_v58, %s2602_s0  ;;  %v2110_v37 = vmul.f32 0.7, %v1963_v62  ;;  %v1660_v40 = vmul.f32 0.95, %v3471_v16 }
 0x3a1   :  { %v2125_v47 = vsub.f32 %v2121_v18, %v2496_v31 }
 0x3a2   :  { %v1975_v12 = vsub.f32 %v1971_v7, %v2469_v11 }
 0x3a3   :  { %vm2129_vm5 = vcmp.gt.f32.partialorder %v2125_v47, 1.0 }
 0x3a4   :  { %v2063_v42 = vpop.f32.mrf.mxu3  ;;  %v2118_v5 = vmul.f32 0.5, %v1975_v12  ;;  %vm1979_vm6 = vcmp.gt.f32.partialorder %v1975_v12, 1.0  ;;  %v2520_v45 = vsel %vm2129_vm5, 1.0, %v2601_v30  ;;  %v1661_v12 = vmul.f32 0.95, %v3474_v63 }
 0x3a5   :  { %v2114_v4 = vadd.f32 %v2110_v37, %v2063_v42  ;;  %v2497_v3 = vsel %vm1979_vm6, 1.0, %v2601_v30 }
 0x3a6   :  { %v2596_v10 = vpack.i.bf16 %v2497_v3, %v2437_v17 }
 0x3a7   :  { %v2122_v46 = vadd.f32 %v2118_v5, %v2114_v4 }
 0x3a8   :  { %2147 = vrot.lane.b32.xlu2 %v2520_v45, %s2602_s0  ;;  %2597 = vrot.lane.b32.xlu1 %v2596_v10, %s2602_s0 }
 0x3a9   :  { %v2126_v33 = vsub.f32 %v2122_v46, %v2497_v3 }
 0x3ab   :  { %vm2130_vm7 = vcmp.gt.f32.partialorder %v2126_v33, 1.0 }
 0x3ac   :  { %v2521_v20 = vsel %vm2130_vm7, 1.0, %v2601_v30 }
 0x3ad   :  { %2149 = vrot.lane.b32.xlu0 %v2521_v20, %s2602_s0 }
 0x3b0   :  { %729 = vrot.lane.b32.xlu2 %v3384_v38, %s2603_s10  ;;  %727 = vrot.lane.b32.xlu1 %v3380_v0, %s2603_s10 }
 0x3b5   :  { %731 = vrot.lane.b32.xlu0 %v3392_v51, %s2603_s10 }
 0x3b8   :  { %963 = vrot.lane.b32.xlu2 %v3387_v36, %s2603_s10  ;;  %733 = vrot.lane.b32.xlu1 %v3401_v53, %s2603_s10 }
 0x3bd   :  { %965 = vrot.lane.b32.xlu0 %v3397_v26, %s2603_s10 }
 0x3c0   :  { %969 = vrot.lane.b32.xlu2 %v3414_v1, %s2603_s10  ;;  %967 = vrot.lane.b32.xlu1 %v3407_v15, %s2603_s10 }
 0x3c5   :  { %1199 = vrot.lane.b32.xlu0 %v3394_v55, %s2603_s10 }
 0x3c8   :  { %1203 = vrot.lane.b32.xlu2 %v3411_v27, %s2603_s10  ;;  %1201 = vrot.lane.b32.xlu1 %v3404_v14, %s2603_s10 }
 0x3cd   :  { %1205 = vrot.lane.b32.xlu0 %v3421_v23, %s2603_s10 }
 0x3d0   :  { %1437 = vrot.lane.b32.xlu2 %v3471_v16, %s2603_s10  ;;  %1435 = vrot.lane.b32.xlu1 %v3468_v13, %s2603_s10  ;;  %v1662_v16 = vmul.f32 0.95, %v3477_v57 }
 0x3d5   :  { %1439 = vrot.lane.b32.xlu0 %v3474_v63, %s2603_s10 }
 0x3d8   :  { %1441 = vrot.lane.b32.xlu1 %v3477_v57, %s2603_s10 }
 0x3ea   :  { %v2573_v30 = vpop.permute.xlu2 %2572 }
 0x3eb   :  { %v2575_v0 = vunpack.i.h.bf16 %v2573_v30  ;;  %v2574_v38 = vunpack.i.l.bf16 %v2573_v30 }
 0x3ed   :  { %2471 = vst.msk [vmem:[%s3781_s4 + $0xa8] sm:$0xff] %vm260_vm1, %v2575_v0  ;;  %2510 = vmatmul.msk.f32.gmra.mxu3 %vm260_vm1, %v2574_v38 }
 0x3ee   :  { %2498 = vst.msk [vmem:[%s3781_s4 + $0xc0] sm:$0xff] %vm260_vm1, %v2574_v38 }
 0x3f2   :  { %v2568_v36 = vpop.permute.xlu1 %2567 }
 0x3f3   :  { %v2570_v51 = vunpack.i.h.bf16 %v2568_v36  ;;  %v2569_v55 = vunpack.i.l.bf16 %v2568_v36 }
 0x3f5   :  { %2438 = vst.msk [vmem:[%s3781_s4 + $0x80] sm:$0xff] %vm260_vm1, %v2570_v51  ;;  %2450 = vmatmul.msk.f32.gmra.mxu1 %vm260_vm1, %v2570_v51  ;;  %2482 = vmatmul.msk.f32.gmra.mxu2 %vm260_vm1, %v2569_v55 }
 0x3f6   :  { %2470 = vst.msk [vmem:[%s3781_s4 + $0xa0] sm:$0xff] %vm260_vm1, %v2569_v55 }
 0x3fa   :  { %v2588_v26 = vpop.permute.xlu2 %2587 }
 0x3fb   :  { %v2590_v53 = vunpack.i.h.bf16 %v2588_v26  ;;  %v2589_v14 = vunpack.i.l.bf16 %v2588_v26 }
 0x3fd   :  { %2500 = vst.msk [vmem:[%s3781_s4 + $0xd0] sm:$0xff] %vm260_vm1, %v2590_v53  ;;  %2483 = vmatmul.msk.f32.gmra.mxu2 %vm260_vm1, %v2575_v0 }
 0x3fe   :  { %2440 = vst.msk [vmem:[%s3781_s4 + $0x90] sm:$0xff] %vm260_vm1, %v2589_v14 }
 0x402   :  { %v2148_v15 = vpop.permute.xlu2 %2147 }
 0x403   :  { %2524 = vst.msk [vmem:[%s3781_s4 + $0xf0] sm:$0xff] %vm260_vm1, %v2148_v15 }
 0x409   :  { %v2583_v27 = vpop.permute.xlu1 %2582 }
 0x40a   :  { %v2585_v1 = vunpack.i.h.bf16 %v2583_v27  ;;  %v2584_v23 = vunpack.i.l.bf16 %v2583_v27  ;;  %v2578_v17 = vpop.permute.xlu0 %2577  ;;  %v730_v48 = vpop.permute.xlu2 %729 }
 0x40b   :  { %v2580_v50 = vunpack.i.h.bf16 %v2578_v17  ;;  %v2579_v29 = vunpack.i.l.bf16 %v2578_v17  ;;  %741 = vst.msk [vmem:[%s3782_s3 + $0x8] sm:$0xff] %vm739_vm8, %v730_v48 }
 0x40c   :  { %2472 = vst.msk [vmem:[%s3781_s4 + $0xb0] sm:$0xff] %vm260_vm1, %v2585_v1  ;;  %2484 = vmatmul.msk.f32.gmra.mxu2 %vm260_vm1, %v2585_v1  ;;  %2534 = vmatmul.msk.f32.gmra.mxu0 %vm260_vm1, %v2584_v23 }
 0x40d   :  { %2522 = vst.msk [vmem:[%s3781_s4 + $0xe0] sm:$0xff] %vm260_vm1, %v2584_v23  ;;  %2451 = vmatmul.msk.f32.gmra.mxu1 %vm260_vm1, %v2579_v29  ;;  %2511 = vmatmul.msk.f32.gmra.mxu3 %vm260_vm1, %v2580_v50 }
 0x40e   :  { %2499 = vst.msk [vmem:[%s3781_s4 + $0xc8] sm:$0xff] %vm260_vm1, %v2580_v50 }
 0x40f   :  { %2439 = vst.msk [vmem:[%s3781_s4 + $0x88] sm:$0xff] %vm260_vm1, %v2579_v29 }
 0x412   :  { %v964_v52 = vpop.permute.xlu2 %963  ;;  %v2593_v39 = vpop.permute.xlu0 %2592 }
 0x413   :  { %2358 = vst.msk [vmem:[%s3782_s3 + $0x20] sm:$0xff] %vm739_vm8, %v964_v52  ;;  %v2595_v32 = vunpack.i.h.bf16 %v2593_v39  ;;  %v2594_v41 = vunpack.i.l.bf16 %v2593_v39 }
 0x415   :  { %2473 = vst.msk [vmem:[%s3781_s4 + $0xb8] sm:$0xff] %vm260_vm1, %v2595_v32  ;;  %2452 = vmatmul.msk.f32.gmra.mxu1 %vm260_vm1, %v2589_v14  ;;  %2485 = vmatmul.msk.f32.gmra.mxu2 %vm260_vm1, %v2595_v32 }
 0x416   :  { %2523 = vst.msk [vmem:[%s3781_s4 + $0xe8] sm:$0xff] %vm260_vm1, %v2594_v41  ;;  %2512 = vmatmul.msk.f32.gmra.mxu3 %vm260_vm1, %v2590_v53  ;;  %2535 = vmatmul.msk.f32.gmra.mxu0 %vm260_vm1, %v2594_v41 }
 0x41a   :  { %v970_v61 = vpop.permute.xlu2 %969  ;;  %v2598_v25 = vpop.permute.xlu1 %2597 }
 0x41b   :  { %2361 = vst.msk [vmem:[%s3782_s3 + $0x38] sm:$0xff] %vm739_vm8, %v970_v61  ;;  %v2600_v44 = vunpack.i.h.bf16 %v2598_v25  ;;  %v2599_v35 = vunpack.i.l.bf16 %v2598_v25 }
 0x41d   :  { %2501 = vst.msk [vmem:[%s3781_s4 + $0xd8] sm:$0xff] %vm260_vm1, %v2600_v44  ;;  %2453 = vmatmul.msk.f32.gmra.mxu1 %vm260_vm1, %v2599_v35 }
 0x41e   :  { %2441 = vst.msk [vmem:[%s3781_s4 + $0x98] sm:$0xff] %vm260_vm1, %v2599_v35  ;;  %2513 = vmatmul.msk.f32.gmra.mxu3 %vm260_vm1, %v2600_v44  ;;  %2536 = vmatmul.msk.f32.gmra.mxu0 %vm260_vm1, %v2148_v15 }
 0x41f   :  { %v2150_v56 = vpop.permute.xlu0 %2149 }
 0x420   :  { %2525 = vst.msk [vmem:[%s3781_s4 + $0xf8] sm:$0xff] %vm260_vm1, %v2150_v56 }
 0x422   :  { %v1204_v49 = vpop.permute.xlu2 %1203  ;;  %v728_v43 = vpop.permute.xlu1 %727 }
 0x423   :  { %2392 = vst.msk [vmem:[%s3782_s3 + $0x50] sm:$0xff] %vm739_vm8, %v1204_v49 }
 0x424   :  { %740 = vst.msk [vmem:[%s3782_s3] sm:$0xff] %vm739_vm8, %v728_v43 }
 0x426   :  { %2537 = vmatmul.msk.f32.gmra.mxu0 %vm260_vm1, %v2150_v56 }
 0x427   :  { %v732_v19 = vpop.permute.xlu0 %731 }
 0x428   :  { %742 = vst.msk [vmem:[%s3782_s3 + $0x10] sm:$0xff] %vm739_vm8, %v732_v19 }
 0x42a   :  { %v1438_v21 = vpop.permute.xlu2 %1437  ;;  %v734_v34 = vpop.permute.xlu1 %733 }
 0x42b   :  { %2423 = vst.msk [vmem:[%s3782_s3 + $0x68] sm:$0xff] %vm739_vm8, %v1438_v21 }
 0x42c   :  { %743 = vst.msk [vmem:[%s3782_s3 + $0x18] sm:$0xff] %vm739_vm8, %v734_v34 }
 0x42f   :  { %v966_v8 = vpop.permute.xlu0 %965 }
 0x430   :  { %2359 = vst.msk [vmem:[%s3782_s3 + $0x28] sm:$0xff] %vm739_vm8, %v966_v8 }
 0x432   :  { %v968_v60 = vpop.permute.xlu1 %967 }
 0x433   :  { %2360 = vst.msk [vmem:[%s3782_s3 + $0x30] sm:$0xff] %vm739_vm8, %v968_v60 }
 0x437   :  { %v1200_v22 = vpop.permute.xlu0 %1199 }
 0x438   :  { %2390 = vst.msk [vmem:[%s3782_s3 + $0x40] sm:$0xff] %vm739_vm8, %v1200_v22 }
 0x43a   :  { %v1202_v9 = vpop.permute.xlu1 %1201 }
 0x43b   :  { %2391 = vst.msk [vmem:[%s3782_s3 + $0x48] sm:$0xff] %vm739_vm8, %v1202_v9 }
 0x43f   :  { %v1206_v54 = vpop.permute.xlu0 %1205 }
 0x440   :  { %2393 = vst.msk [vmem:[%s3782_s3 + $0x58] sm:$0xff] %vm739_vm8, %v1206_v54 }
 0x442   :  { %v1436_v11 = vpop.permute.xlu1 %1435 }
 0x443   :  { %2422 = vst.msk [vmem:[%s3782_s3 + $0x60] sm:$0xff] %vm739_vm8, %v1436_v11 }
 0x447   :  { %v1440_v2 = vpop.permute.xlu0 %1439 }
 0x448   :  { %2424 = vst.msk [vmem:[%s3782_s3 + $0x70] sm:$0xff] %vm739_vm8, %v1440_v2 }
 0x44a   :  { %v1442_v6 = vpop.permute.xlu1 %1441 }
 0x44b   :  { %2425 = vst.msk [vmem:[%s3782_s3 + $0x78] sm:$0xff] %vm739_vm8, %v1442_v6 }
 0x470   :  { %v2066_v18 = vpop.f32.mrf.mxu3 }
 0x472   :  { %v1647_v31 = vpop.f32.mrf.mxu1 }
 0x473   :  { %v1663_v58 = vadd.f32 %v1659_v28, %v1647_v31 }
 0x475   :  { %1671 = vrot.lane.b32.xlu2 %v1663_v58, %s2603_s10  ;;  %v1895_v47 = vmul.f32 0.95, %v1663_v58 }
 0x478   :  { %v1883_v62 = vpop.f32.mrf.mxu2 }
 0x479   :  { %v1899_v42 = vadd.f32 %v1895_v47, %v1883_v62 }
 0x47b   :  { %v2078_v0 = vmul.f32 0.95, %v1899_v42 }
 0x47d   :  { %v2082_v55 = vadd.f32 %v2078_v0, %v2066_v18 }
 0x47f   :  { %v2213_v52 = vmul.f32 0.95, %v2082_v55 }
 0x480   :  { %v1886_v7 = vpop.f32.mrf.mxu2 }
 0x489   :  { %v2201_v63 = vpop.f32.mrf.mxu0 }
 0x48a   :  { %v1650_v24 = vpop.f32.mrf.mxu1  ;;  %v2217_v39 = vadd.f32 %v2213_v52, %v2201_v63 }
 0x48b   :  { %v1664_v59 = vadd.f32 %v1660_v40, %v1650_v24 }
 0x48d   :  { %1673 = vrot.lane.b32.xlu0 %v1664_v59, %s2603_s10  ;;  %v1896_v3 = vmul.f32 0.95, %v1664_v59 }
 0x48f   :  { %v1889_v13 = vpop.f32.mrf.mxu2  ;;  %v1900_v46 = vadd.f32 %v1896_v3, %v1886_v7 }
 0x490   :  { %v2069_v4 = vpop.f32.mrf.mxu3 }
 0x491   :  { %v2079_v26 = vmul.f32 0.95, %v1900_v46 }
 0x492   :  { %v1653_v37 = vpop.f32.mrf.mxu1 }
 0x493   :  { %v1665_v5 = vadd.f32 %v1661_v12, %v1653_v37  ;;  %v2204_v53 = vpop.f32.mrf.mxu0  ;;  %v2083_v14 = vadd.f32 %v2079_v26, %v2069_v4 }
 0x495   :  { %1907 = vrot.lane.b32.xlu0 %v1899_v42, %s2603_s10  ;;  %1675 = vrot.lane.b32.xlu1 %v1665_v5, %s2603_s10  ;;  %v1897_v45 = vmul.f32 0.95, %v1665_v5  ;;  %v2214_v23 = vmul.f32 0.95, %v2083_v14 }
 0x497   :  { %v1901_v38 = vadd.f32 %v1897_v45, %v1889_v13  ;;  %v2218_v48 = vadd.f32 %v2214_v23, %v2204_v53 }
 0x498   :  { %v1892_v30 = vpop.f32.mrf.mxu2 }
 0x499   :  { %v2072_v51 = vpop.f32.mrf.mxu3  ;;  %v2080_v57 = vmul.f32 0.95, %v1901_v38 }
 0x49a   :  { %v1656_v10 = vpop.f32.mrf.mxu1 }
 0x49b   :  { %v1666_v33 = vadd.f32 %v1662_v16, %v1656_v10  ;;  %v2084_v15 = vadd.f32 %v2080_v57, %v2072_v51  ;;  %v2207_v29 = vpop.f32.mrf.mxu0 }
 0x49d   :  { %v1898_v20 = vmul.f32 0.95, %v1666_v33  ;;  %1909 = vrot.lane.b32.xlu1 %v1900_v46, %s2603_s10  ;;  %1677 = vrot.lane.b32.xlu2 %v1666_v33, %s2603_s10  ;;  %v2215_v50 = vmul.f32 0.95, %v2084_v15 }
 0x49f   :  { %v1902_v36 = vadd.f32 %v1898_v20, %v1892_v30  ;;  %v2219_v32 = vadd.f32 %v2215_v50, %v2207_v29 }
 0x4a1   :  { %1913 = vrot.lane.b32.xlu0 %v1902_v36, %s2603_s10  ;;  %v2081_v27 = vmul.f32 0.95, %v1902_v36  ;;  %v2075_v1 = vpop.f32.mrf.mxu3 }
 0x4a3   :  { %v2085_v17 = vadd.f32 %v2081_v27, %v2075_v1  ;;  %v2210_v61 = vpop.f32.mrf.mxu0 }
 0x4a5   :  { %2090 = vrot.lane.b32.xlu1 %v2082_v55, %s2603_s10  ;;  %1911 = vrot.lane.b32.xlu2 %v1901_v38, %s2603_s10  ;;  %v2216_v41 = vmul.f32 0.95, %v2085_v17 }
 0x4a7   :  { %v2220_v25 = vadd.f32 %v2216_v41, %v2210_v61 }
 0x4a9   :  { %2094 = vrot.lane.b32.xlu0 %v2084_v15, %s2603_s10 }
 0x4ad   :  { %2092 = vrot.lane.b32.xlu2 %v2083_v14, %s2603_s10  ;;  %2096 = vrot.lane.b32.xlu1 %v2085_v17, %s2603_s10 }
 0x4b1   :  { %2227 = vrot.lane.b32.xlu0 %v2218_v48, %s2603_s10 }
 0x4b5   :  { %2225 = vrot.lane.b32.xlu2 %v2217_v39, %s2603_s10  ;;  %2229 = vrot.lane.b32.xlu1 %v2219_v32, %s2603_s10 }
 0x4bd   :  { %2231 = vrot.lane.b32.xlu2 %v2220_v25, %s2603_s10 }
 0x4cf   :  { %v1672_v44 = vpop.permute.xlu2 %1671 }
 0x4d0   :  { %2454 = vst.msk [vmem:[%s3782_s3 + $0x80] sm:$0xff] %vm739_vm8, %v1672_v44 }
 0x4f7   :  { %v1678_v35 = vpop.permute.xlu2 %1677 }
 0x4f8   :  { %2457 = vst.msk [vmem:[%s3782_s3 + $0x98] sm:$0xff] %vm739_vm8, %v1678_v35 }
 0x4ff   :  { %v1674_v56 = vpop.permute.xlu0 %1673  ;;  %v1912_v49 = vpop.permute.xlu2 %1911 }
 0x500   :  { %2455 = vst.msk [vmem:[%s3782_s3 + $0x88] sm:$0xff] %vm739_vm8, %v1674_v56 }
 0x501   :  { %2488 = vst.msk [vmem:[%s3782_s3 + $0xb0] sm:$0xff] %vm739_vm8, %v1912_v49 }
 0x507   :  { %v1908_v43 = vpop.permute.xlu0 %1907  ;;  %v1676_v19 = vpop.permute.xlu1 %1675 }
 0x508   :  { %2486 = vst.msk [vmem:[%s3782_s3 + $0xa0] sm:$0xff] %vm739_vm8, %v1908_v43  ;;  %v2093_v21 = vpop.permute.xlu2 %2092 }
 0x509   :  { %2456 = vst.msk [vmem:[%s3782_s3 + $0x90] sm:$0xff] %vm739_vm8, %v1676_v19 }
 0x50a   :  { %2515 = vst.msk [vmem:[%s3782_s3 + $0xc8] sm:$0xff] %vm739_vm8, %v2093_v21 }
 0x50f   :  { %v1910_v34 = vpop.permute.xlu1 %1909 }
 0x510   :  { %2487 = vst.msk [vmem:[%s3782_s3 + $0xa8] sm:$0xff] %vm739_vm8, %v1910_v34  ;;  %v2226_v8 = vpop.permute.xlu2 %2225 }
 0x511   :  { %2538 = vst.msk [vmem:[%s3782_s3 + $0xe0] sm:$0xff] %vm739_vm8, %v2226_v8 }
 0x513   :  { %v1914_v60 = vpop.permute.xlu0 %1913 }
 0x514   :  { %2489 = vst.msk [vmem:[%s3782_s3 + $0xb8] sm:$0xff] %vm739_vm8, %v1914_v60 }
 0x517   :  { %v2091_v22 = vpop.permute.xlu1 %2090 }
 0x518   :  { %2514 = vst.msk [vmem:[%s3782_s3 + $0xc0] sm:$0xff] %vm739_vm8, %v2091_v22  ;;  %v2232_v9 = vpop.permute.xlu2 %2231 }
 0x519   :  { %2541 = vst.msk [vmem:[%s3782_s3 + $0xf8] sm:$0xff] %vm739_vm8, %v2232_v9 }
 0x51b   :  { %v2095_v54 = vpop.permute.xlu0 %2094 }
 0x51c   :  { %2516 = vst.msk [vmem:[%s3782_s3 + $0xd0] sm:$0xff] %vm739_vm8, %v2095_v54 }
 0x51f   :  { %v2097_v11 = vpop.permute.xlu1 %2096 }
 0x520   :  { %2517 = vst.msk [vmem:[%s3782_s3 + $0xd8] sm:$0xff] %vm739_vm8, %v2097_v11 }
 0x523   :  { %v2228_v2 = vpop.permute.xlu0 %2227 }
 0x524   :  { %2539 = vst.msk [vmem:[%s3782_s3 + $0xe8] sm:$0xff] %vm739_vm8, %v2228_v2 }
 0x527   :  { %v2230_v6 = vpop.permute.xlu1 %2229 }
 0x528   :  { %2540 = vst.msk [vmem:[%s3782_s3 + $0xf0] sm:$0xff] %vm739_vm8, %v2230_v6 }

</bundles_post_ra>
